<compile_context>
chip_gen: v7x
topology: tpu7x:2x2x1
jax: 0.10.0
libtpu: 0.0.40
codegen_flags: <defaults>
</compile_context>

<pallas_src>
import functools

import numpy as np

import jax
import jax.numpy as jnp
from jax.experimental import pallas as pl
from jax.experimental.pallas import tpu as pltpu


# ----------------------------------------------------------------------------
# Generation-aware VMEM budget (review: v7x has 64 MiB/TC, v5e/v6e 128 MiB).
# ----------------------------------------------------------------------------
@functools.lru_cache(maxsize=None)
def _vmem_limit_bytes():
    try:
        info = pltpu.get_tpu_info()
        cap = getattr(info, "vmem_capacity_bytes", None)
        if cap:
            return int(min(cap * 3 // 4, 112 * 1024 * 1024))
    except Exception:
        pass
    return 48 * 1024 * 1024  # v7x-safe fallback


def _pick_block_batch(batch, cap=8):
    """Images per conv grid step: >=2 steps when B>=2 (v7x megacore), <=cap
    images per step, and an exact divisor of B (no padding needed)."""
    if batch <= 1:
        return 1
    target = min(cap, max(1, batch // 2))
    for bt in range(target, 0, -1):
        if batch % bt == 0:
            return bt
    return 1


# ----------------------------------------------------------------------------
# Fused conv + bias + LeakyReLU + 2x2 maxpool (+ output halo) kernel
# ----------------------------------------------------------------------------
def _conv_pool_kernel(x_ref, w_ref, b_ref, o_ref, *, kh, ho, wo, cout, out_pad):
    """x_ref: (bt, hp, wp*cin) bf16 (lane-merged NHWC, spatial padding already
    present as zero rows/lanes).  w_ref: (kh, wp*cin, wo*cout) bf16 banded
    matrices, output columns ordered (w-parity, w//2, cout).  b_ref: (1,
    wo*cout) f32 (same column order).  o_ref: (bt, ho//2 + 2*out_pad,
    (wo//2 + 2*out_pad)*cout) bf16 pooled output with zero halo."""
    bt = x_ref.shape[0]
    lk = x_ref.shape[2]                       # wp * cin
    x = x_ref[...]                            # (bt, hp, wp*cin)
    m = bt * ho
    n = wo * cout

    acc = jnp.zeros((m, n), jnp.float32)
    for i in range(kh):                       # kh dots, wo folded into N (MXU-friendly)
        lhs = x[:, i:i + ho, :].reshape(m, lk)
        acc = acc + jnp.dot(lhs, w_ref[i], preferred_element_type=jnp.float32)

    acc = acc + b_ref[...]                    # bias (f32)
    acc = jnp.where(acc > 0, acc, 0.01 * acc)  # LeakyReLU(0.01)

    # 2x2 / stride-2 max pool.  Columns are (w-parity, w//2, cout), so pooling
    # along W is a max of the two static lane halves; pooling along H is a max
    # over adjacent row pairs (leading-dim reshape only, minor dim untouched).
    ho2, wo2 = ho // 2, wo // 2
    half = wo2 * cout
    wmax = jnp.maximum(acc[:, :half], acc[:, half:])            # (bt*ho, wo2*cout)
    hpair = wmax.reshape(bt * ho2, 2, half)
    pooled = jnp.maximum(hpair[:, 0, :], hpair[:, 1, :])        # (bt*ho2, wo2*cout)
    pooled = pooled.reshape(bt, ho2, half).astype(o_ref.dtype)

    p = out_pad
    if p:
        # Emit the next conv stage's zero-padded input directly.
        o_ref[...] = jnp.zeros(o_ref.shape, o_ref.dtype)
        o_ref[:, p:p + ho2, p * cout:(p + wo2) * cout] = pooled
    else:
        o_ref[...] = pooled


def _conv_stage(x, w, b, *, kh, ho, wo, cout, out_pad):
    batch, hp, lk = x.shape
    ho2, wo2 = ho // 2, wo // 2
    out_h = ho2 + 2 * out_pad
    out_l = (wo2 + 2 * out_pad) * cout
    bt = _pick_block_batch(batch)
    kern = functools.partial(
        _conv_pool_kernel, kh=kh, ho=ho, wo=wo, cout=cout, out_pad=out_pad)
    return pl.pallas_call(
        kern,
        out_shape=jax.ShapeDtypeStruct((batch, out_h, out_l), jnp.bfloat16),
        grid=(batch // bt,),
        in_specs=[
            pl.BlockSpec((bt, hp, lk), lambda i: (i, 0, 0)),     # batch tile
            pl.BlockSpec(w.shape, lambda i: (0, 0, 0)),          # resident weights
            pl.BlockSpec(b.shape, lambda i: (0, 0)),             # resident bias
        ],
        out_specs=pl.BlockSpec((bt, out_h, out_l), lambda i: (i, 0, 0)),
        compiler_params=pltpu.CompilerParams(
            dimension_semantics=("parallel",),
            vmem_limit_bytes=_vmem_limit_bytes(),
        ),
    )(x, w, b)


# ----------------------------------------------------------------------------
# Fused fc1 + LeakyReLU + fc2 head (single launch, single grid step)
# ----------------------------------------------------------------------------
def _fc_kernel(x_ref, w1_ref, b1_ref, w2_ref, b2_ref, feat_ref, logit_ref, *, nrow):
    x = x_ref[...]                                    # (B, nrow, wo2*cout) bf16
    hidden = w1_ref.shape[2]
    acc = jnp.zeros((x.shape[0], hidden), jnp.float32)
    for r in range(nrow):                             # flatten folded into nrow dots
        acc = acc + jnp.dot(x[:, r, :], w1_ref[r],
                            preferred_element_type=jnp.float32)
    acc = acc + b1_ref[...]
    feat = jnp.where(acc > 0, acc, 0.01 * acc)        # LeakyReLU(0.01)
    feat_ref[...] = feat.astype(feat_ref.dtype)
    logits = jnp.dot(feat.astype(jnp.bfloat16), w2_ref[...],
                     preferred_element_type=jnp.float32) + b2_ref[...]
    logit_ref[...] = logits.astype(logit_ref.dtype)


def _fc_stage(x, w1, b1, w2, b2):
    batch = x.shape[0]
    hidden = w1.shape[2]
    ncls = w2.shape[1]
    return pl.pallas_call(
        functools.partial(_fc_kernel, nrow=x.shape[1]),
        out_shape=(jax.ShapeDtypeStruct((batch, hidden), jnp.float32),
                   jax.ShapeDtypeStruct((batch, ncls), jnp.float32)),
        grid=(1,),
        in_specs=[
            pl.BlockSpec(x.shape, lambda i: (0, 0, 0)),
            pl.BlockSpec(w1.shape, lambda i: (0, 0, 0)),
            pl.BlockSpec(b1.shape, lambda i: (0, 0)),
            pl.BlockSpec(w2.shape, lambda i: (0, 0)),
            pl.BlockSpec(b2.shape, lambda i: (0, 0)),
        ],
        out_specs=(pl.BlockSpec((batch, hidden), lambda i: (0, 0)),
                   pl.BlockSpec((batch, ncls), lambda i: (0, 0))),
        compiler_params=pltpu.CompilerParams(
            dimension_semantics=("arbitrary",),
            vmem_limit_bytes=_vmem_limit_bytes(),
        ),
    )(x, w1, b1, w2, b2)


# ----------------------------------------------------------------------------
# Parameters: PyTorch-style init + one-time kernel-friendly re-layout
# ----------------------------------------------------------------------------
def init_params(key, num_classes=10):
    ks = jax.random.split(key, 10)

    def uinit(k, shape, fan_in):
        bound = 1.0 / jnp.sqrt(jnp.float32(fan_in))
        return jax.random.uniform(k, shape, jnp.float32, -bound, bound)

    p = {}
    p["conv1_w"] = uinit(ks[0], (16, 3, 5, 5), 3 * 5 * 5)
    p["conv1_b"] = uinit(ks[1], (16,), 3 * 5 * 5)
    p["conv2_w"] = uinit(ks[2], (32, 16, 5, 5), 16 * 5 * 5)
    p["conv2_b"] = uinit(ks[3], (32,), 16 * 5 * 5)
    p["conv3_w"] = uinit(ks[4], (64, 32, 3, 3), 32 * 3 * 3)
    p["conv3_b"] = uinit(ks[5], (64,), 32 * 3 * 3)
    p["fc1_w"] = uinit(ks[6], (128, 64 * 3 * 3), 64 * 3 * 3)
    p["fc1_b"] = uinit(ks[7], (128,), 64 * 3 * 3)
    p["fc2_w"] = uinit(ks[8], (num_classes, 128), 128)
    p["fc2_b"] = uinit(ks[9], (num_classes,), 128)
    return p


def _conv_banded(w, *, wp, wo):
    """Expand a torch conv weight (cout, cin, kh, kw) into kh banded matrices
    of shape (wp*cin, wo*cout).  Output columns are ordered
    (w-parity, w//2, cout) so the kernel's W-pool is a max of two lane halves."""
    w = np.asarray(w, np.float32)
    cout, cin, kh, kw = w.shape
    wo2 = wo // 2
    rhs = np.zeros((kh, wp * cin, wo * cout), np.float32)
    for i in range(kh):
        for j in range(kw):
            tap = w[:, :, i, j].T                       # (cin, cout)
            for ow in range(wo):
                iw = ow + j                             # padded input column
                col = ((ow % 2) * wo2 + ow // 2) * cout
                rhs[i, iw * cin:(iw + 1) * cin, col:col + cout] = tap
    return jnp.asarray(rhs, dtype=jnp.bfloat16)


def _tile_bias(b, wo):
    b = np.asarray(b, np.float32).reshape(1, -1)
    return jnp.asarray(np.tile(b, (1, wo)), dtype=jnp.float32)


def prepare_params(p):
    """One-time re-layout (outside jit) of PyTorch-style params."""
    prep = {}
    prep["c1_w"] = _conv_banded(p["conv1_w"], wp=32, wo=28)
    prep["c1_b"] = _tile_bias(p["conv1_b"], 28)
    prep["c2_w"] = _conv_banded(p["conv2_w"], wp=16, wo=12)
    prep["c2_b"] = _tile_bias(p["conv2_b"], 12)
    prep["c3_w"] = _conv_banded(p["conv3_w"], wp=8, wo=6)
    prep["c3_b"] = _tile_bias(p["conv3_b"], 6)

    # fc1: torch columns are NCHW-flatten order (c, h, w); our features are
    # (h, w, c) with h split out as the leading dim of a (3, 192, 128) weight.
    w1 = np.asarray(p["fc1_w"], np.float32).reshape(128, 64, 3, 3)
    w1 = w1.transpose(2, 3, 1, 0).reshape(3, 3 * 64, 128)
    prep["fc1_w"] = jnp.asarray(w1, dtype=jnp.bfloat16)
    prep["fc1_b"] = jnp.asarray(np.asarray(p["fc1_b"], np.float32).reshape(1, 128))

    prep["fc2_w"] = jnp.asarray(np.asarray(p["fc2_w"], np.float32).T,
                                dtype=jnp.bfloat16)                 # (128, ncls)
    prep["fc2_b"] = jnp.asarray(np.asarray(p["fc2_b"], np.float32).reshape(1, -1))
    return prep


# ----------------------------------------------------------------------------
# Forward pass (4 pallas_calls)
# ----------------------------------------------------------------------------
def cifar_cnn_forward(prep, x):
    # x: (B, 3, 32, 32) f32 (PyTorch layout) -> lane-merged NHWC bf16.
    batch = x.shape[0]
    xm = jnp.transpose(x, (0, 2, 3, 1)).reshape(batch, 32, 32 * 3)
    xm = xm.astype(jnp.bfloat16)

    a1 = _conv_stage(xm, prep["c1_w"], prep["c1_b"],
                     kh=5, ho=28, wo=28, cout=16, out_pad=1)   # (B, 16, 16*16)
    a2 = _conv_stage(a1, prep["c2_w"], prep["c2_b"],
                     kh=5, ho=12, wo=12, cout=32, out_pad=1)   # (B,  8,  8*32)
    a3 = _conv_stage(a2, prep["c3_w"], prep["c3_b"],
                     kh=3, ho=6, wo=6, cout=64, out_pad=0)     # (B,  3,  3*64)

    feat, logits = _fc_stage(a3, prep["fc1_w"], prep["fc1_b"],
                             prep["fc2_w"], prep["fc2_b"])
    return feat, logits


if __name__ == "__main__":
    key = jax.random.PRNGKey(0)
    pkey, xkey = jax.random.split(key)
    params = init_params(pkey, num_classes=10)
    prep = prepare_params(params)          # one-time weight re-layout (outside jit)

    # CIFAR-shaped input (32x32 is required by the 64*3*3 flatten).
    x = jax.random.normal(xkey, (2, 3, 32, 32), dtype=jnp.float32)

    fwd = jax.jit(cifar_cnn_forward)
    feat, logits = fwd(prep, x)
    jax.block_until_ready((feat, logits))

    assert feat.shape == (2, 128) and logits.shape == (2, 10)
    assert bool(jnp.all(jnp.isfinite(feat))) and bool(jnp.all(jnp.isfinite(logits)))
    print("KERNEL_OK")
</pallas_src>

<mosaic_0001>
module attributes {stable_mosaic.version = 11 : i64} {
  func.func @_conv_pool_kernel(%arg0: i32, %arg1: memref<1x32x96xbf16, #tpu.memory_space<vmem>>, %arg2: memref<5x96x448xbf16, #tpu.memory_space<vmem>>, %arg3: memref<1x448xf32, #tpu.memory_space<vmem>>, %arg4: memref<1x16x256xbf16, #tpu.memory_space<vmem>>) attributes {dimension_semantics = [#tpu.dimension_semantics<parallel>], iteration_bounds = array<i64: 2>, scalar_prefetch = 0 : i64, scratch_operands = 0 : i64, tpu.core_type = #tpu.core_type<tc>, window_params = [{transform_indices = @transform_0, window_bounds = array<i64: 1, 32, 96>}, {pipeline_mode = #tpu.pipeline_mode<synchronous>, transform_indices = @transform_1, window_bounds = array<i64: 5, 96, 448>}, {pipeline_mode = #tpu.pipeline_mode<synchronous>, transform_indices = @transform_2, window_bounds = array<i64: 1, 448>}, {transform_indices = @transform_3, window_bounds = array<i64: 1, 16, 256>}]} {
    %c0 = arith.constant 0 : index
    %c0_0 = arith.constant 0 : index
    %c0_1 = arith.constant 0 : index
    %0 = vector.load %arg1[%c0, %c0_0, %c0_1] : memref<1x32x96xbf16, #tpu.memory_space<vmem>>, vector<1x32x96xbf16>
    %cst = arith.constant 0.000000e+00 : f32
    %1 = vector.broadcast %cst : f32 to vector<28x448xf32>
    %2 = vector.extract_strided_slice %0 {offsets = [0, 0, 0], sizes = [1, 28, 96], strides = [1, 1, 1]} : vector<1x32x96xbf16> to vector<1x28x96xbf16>
    %3 = vector.shape_cast %2 : vector<1x28x96xbf16> to vector<28x96xbf16>
    %c0_2 = arith.constant 0 : index
    %c0_3 = arith.constant 0 : index
    %c0_4 = arith.constant 0 : index
    %4 = vector.load %arg2[%c0_2, %c0_3, %c0_4] : memref<5x96x448xbf16, #tpu.memory_space<vmem>>, vector<1x96x448xbf16>
    %5 = vector.shape_cast %4 : vector<1x96x448xbf16> to vector<96x448xbf16>
    %cst_5 = arith.constant dense<0.000000e+00> : vector<28x448xf32>
    %6 = tpu.matmul %3, %5, %cst_5 {dimension_numbers = #tpu.dot_dimension_numbers<[1], [0], [0], [1], [0, 0, 1, 1], [], []>} : vector<28x96xbf16>, vector<96x448xbf16>, vector<28x448xf32> -> vector<28x448xf32>
    %7 = arith.addf %1, %6 : vector<28x448xf32>
    %8 = vector.extract_strided_slice %0 {offsets = [0, 1, 0], sizes = [1, 28, 96], strides = [1, 1, 1]} : vector<1x32x96xbf16> to vector<1x28x96xbf16>
    %9 = vector.shape_cast %8 : vector<1x28x96xbf16> to vector<28x96xbf16>
    %c1 = arith.constant 1 : index
    %c0_6 = arith.constant 0 : index
    %c0_7 = arith.constant 0 : index
    %10 = vector.load %arg2[%c1, %c0_6, %c0_7] : memref<5x96x448xbf16, #tpu.memory_space<vmem>>, vector<1x96x448xbf16>
    %11 = vector.shape_cast %10 : vector<1x96x448xbf16> to vector<96x448xbf16>
    %cst_8 = arith.constant dense<0.000000e+00> : vector<28x448xf32>
    %12 = tpu.matmul %9, %11, %cst_8 {dimension_numbers = #tpu.dot_dimension_numbers<[1], [0], [0], [1], [0, 0, 1, 1], [], []>} : vector<28x96xbf16>, vector<96x448xbf16>, vector<28x448xf32> -> vector<28x448xf32>
    %13 = arith.addf %7, %12 : vector<28x448xf32>
    %14 = vector.extract_strided_slice %0 {offsets = [0, 2, 0], sizes = [1, 28, 96], strides = [1, 1, 1]} : vector<1x32x96xbf16> to vector<1x28x96xbf16>
    %15 = vector.shape_cast %14 : vector<1x28x96xbf16> to vector<28x96xbf16>
    %c2 = arith.constant 2 : index
    %c0_9 = arith.constant 0 : index
    %c0_10 = arith.constant 0 : index
    %16 = vector.load %arg2[%c2, %c0_9, %c0_10] : memref<5x96x448xbf16, #tpu.memory_space<vmem>>, vector<1x96x448xbf16>
    %17 = vector.shape_cast %16 : vector<1x96x448xbf16> to vector<96x448xbf16>
    %cst_11 = arith.constant dense<0.000000e+00> : vector<28x448xf32>
    %18 = tpu.matmul %15, %17, %cst_11 {dimension_numbers = #tpu.dot_dimension_numbers<[1], [0], [0], [1], [0, 0, 1, 1], [], []>} : vector<28x96xbf16>, vector<96x448xbf16>, vector<28x448xf32> -> vector<28x448xf32>
    %19 = arith.addf %13, %18 : vector<28x448xf32>
    %20 = vector.extract_strided_slice %0 {offsets = [0, 3, 0], sizes = [1, 28, 96], strides = [1, 1, 1]} : vector<1x32x96xbf16> to vector<1x28x96xbf16>
    %21 = vector.shape_cast %20 : vector<1x28x96xbf16> to vector<28x96xbf16>
    %c3 = arith.constant 3 : index
    %c0_12 = arith.constant 0 : index
    %c0_13 = arith.constant 0 : index
    %22 = vector.load %arg2[%c3, %c0_12, %c0_13] : memref<5x96x448xbf16, #tpu.memory_space<vmem>>, vector<1x96x448xbf16>
    %23 = vector.shape_cast %22 : vector<1x96x448xbf16> to vector<96x448xbf16>
    %cst_14 = arith.constant dense<0.000000e+00> : vector<28x448xf32>
    %24 = tpu.matmul %21, %23, %cst_14 {dimension_numbers = #tpu.dot_dimension_numbers<[1], [0], [0], [1], [0, 0, 1, 1], [], []>} : vector<28x96xbf16>, vector<96x448xbf16>, vector<28x448xf32> -> vector<28x448xf32>
    %25 = arith.addf %19, %24 : vector<28x448xf32>
    %26 = vector.extract_strided_slice %0 {offsets = [0, 4, 0], sizes = [1, 28, 96], strides = [1, 1, 1]} : vector<1x32x96xbf16> to vector<1x28x96xbf16>
    %27 = vector.shape_cast %26 : vector<1x28x96xbf16> to vector<28x96xbf16>
    %c4 = arith.constant 4 : index
    %c0_15 = arith.constant 0 : index
    %c0_16 = arith.constant 0 : index
    %28 = vector.load %arg2[%c4, %c0_15, %c0_16] : memref<5x96x448xbf16, #tpu.memory_space<vmem>>, vector<1x96x448xbf16>
    %29 = vector.shape_cast %28 : vector<1x96x448xbf16> to vector<96x448xbf16>
    %cst_17 = arith.constant dense<0.000000e+00> : vector<28x448xf32>
    %30 = tpu.matmul %27, %29, %cst_17 {dimension_numbers = #tpu.dot_dimension_numbers<[1], [0], [0], [1], [0, 0, 1, 1], [], []>} : vector<28x96xbf16>, vector<96x448xbf16>, vector<28x448xf32> -> vector<28x448xf32>
    %31 = arith.addf %25, %30 : vector<28x448xf32>
    %c0_18 = arith.constant 0 : index
    %c0_19 = arith.constant 0 : index
    %32 = vector.load %arg3[%c0_18, %c0_19] : memref<1x448xf32, #tpu.memory_space<vmem>>, vector<1x448xf32>
    %33 = vector.broadcast %32 : vector<1x448xf32> to vector<28x448xf32>
    %34 = arith.addf %31, %33 : vector<28x448xf32>
    %cst_20 = arith.constant 0.000000e+00 : f32
    %35 = vector.broadcast %cst_20 : f32 to vector<28x448xf32>
    %36 = arith.cmpf ogt, %34, %35 : vector<28x448xf32>
    %cst_21 = arith.constant 0.00999999977 : f32
    %37 = vector.broadcast %cst_21 : f32 to vector<28x448xf32>
    %38 = arith.mulf %37, %34 : vector<28x448xf32>
    %39 = arith.select %36, %34, %38 : vector<28x448xi1>, vector<28x448xf32>
    %40 = vector.extract_strided_slice %39 {offsets = [0, 0], sizes = [28, 224], strides = [1, 1]} : vector<28x448xf32> to vector<28x224xf32>
    %41 = vector.extract_strided_slice %39 {offsets = [0, 224], sizes = [28, 224], strides = [1, 1]} : vector<28x448xf32> to vector<28x224xf32>
    %42 = arith.maximumf %40, %41 : vector<28x224xf32>
    %43 = vector.shape_cast %42 : vector<28x224xf32> to vector<14x2x224xf32>
    %44 = vector.extract_strided_slice %43 {offsets = [0, 0, 0], sizes = [14, 1, 224], strides = [1, 1, 1]} : vector<14x2x224xf32> to vector<14x1x224xf32>
    %45 = vector.shape_cast %44 : vector<14x1x224xf32> to vector<14x224xf32>
    %46 = vector.extract_strided_slice %43 {offsets = [0, 1, 0], sizes = [14, 1, 224], strides = [1, 1, 1]} : vector<14x2x224xf32> to vector<14x1x224xf32>
    %47 = vector.shape_cast %46 : vector<14x1x224xf32> to vector<14x224xf32>
    %48 = arith.maximumf %45, %47 : vector<14x224xf32>
    %49 = vector.shape_cast %48 : vector<14x224xf32> to vector<1x14x224xf32>
    %50 = arith.truncf %49 : vector<1x14x224xf32> to vector<1x14x224xbf16>
    %cst_22 = arith.constant 0.000000e+00 : bf16
    %51 = vector.broadcast %cst_22 : bf16 to vector<1x16x256xbf16>
    %c0_23 = arith.constant 0 : index
    %c0_24 = arith.constant 0 : index
    %c0_25 = arith.constant 0 : index
    %52 = vector.load %arg4[%c0_23, %c0_24, %c0_25] : memref<1x16x256xbf16, #tpu.memory_space<vmem>>, vector<1x16x256xbf16>
    tpu.vector_store %arg4[%c0_23, %c0_24, %c0_25], %51 {strides = array<i32>} : memref<1x16x256xbf16, #tpu.memory_space<vmem>>, vector<1x16x256xbf16>,
    %c0_26 = arith.constant 0 : index
    %c1_27 = arith.constant 1 : index
    %c16 = arith.constant 16 : index
    %53 = vector.load %arg4[%c0_26, %c1_27, %c16] : memref<1x16x256xbf16, #tpu.memory_space<vmem>>, vector<1x14x224xbf16>
    tpu.vector_store %arg4[%c0_26, %c1_27, %c16], %50 {strides = array<i32>} : memref<1x16x256xbf16, #tpu.memory_space<vmem>>, vector<1x14x224xbf16>,
    return
  }
  func.func @transform_0(%arg0: i32) -> (i32, i32, i32) {
    %c0_i32 = arith.constant 0 : i32
    %c0_i32_0 = arith.constant 0 : i32
    %c0_i32_1 = arith.constant 0 : i32
    return %arg0, %c0_i32, %c0_i32_0 : i32, i32, i32
  }
  func.func @transform_1(%arg0: i32) -> (i32, i32, i32) {
    %c0_i32 = arith.constant 0 : i32
    %c0_i32_0 = arith.constant 0 : i32
    %c0_i32_1 = arith.constant 0 : i32
    %c0_i32_2 = arith.constant 0 : i32
    return %c0_i32, %c0_i32_0, %c0_i32_1 : i32, i32, i32
  }
  func.func @transform_2(%arg0: i32) -> (i32, i32) {
    %c0_i32 = arith.constant 0 : i32
    %c0_i32_0 = arith.constant 0 : i32
    %c0_i32_1 = arith.constant 0 : i32
    return %c0_i32, %c0_i32_0 : i32, i32
  }
  func.func @transform_3(%arg0: i32) -> (i32, i32, i32) {
    %c0_i32 = arith.constant 0 : i32
    %c0_i32_0 = arith.constant 0 : i32
    %c0_i32_1 = arith.constant 0 : i32
    return %arg0, %c0_i32, %c0_i32_0 : i32, i32, i32
  }
}

module attributes {stable_mosaic.version = 11 : i64} {
  func.func @_conv_pool_kernel(%arg0: i32, %arg1: memref<1x16x256xbf16, #tpu.memory_space<vmem>>, %arg2: memref<5x256x384xbf16, #tpu.memory_space<vmem>>, %arg3: memref<1x384xf32, #tpu.memory_space<vmem>>, %arg4: memref<1x8x256xbf16, #tpu.memory_space<vmem>>) attributes {dimension_semantics = [#tpu.dimension_semantics<parallel>], iteration_bounds = array<i64: 2>, scalar_prefetch = 0 : i64, scratch_operands = 0 : i64, tpu.core_type = #tpu.core_type<tc>, window_params = [{transform_indices = @transform_0, window_bounds = array<i64: 1, 16, 256>}, {pipeline_mode = #tpu.pipeline_mode<synchronous>, transform_indices = @transform_1, window_bounds = array<i64: 5, 256, 384>}, {pipeline_mode = #tpu.pipeline_mode<synchronous>, transform_indices = @transform_2, window_bounds = array<i64: 1, 384>}, {transform_indices = @transform_3, window_bounds = array<i64: 1, 8, 256>}]} {
    %c0 = arith.constant 0 : index
    %c0_0 = arith.constant 0 : index
    %c0_1 = arith.constant 0 : index
    %0 = vector.load %arg1[%c0, %c0_0, %c0_1] : memref<1x16x256xbf16, #tpu.memory_space<vmem>>, vector<1x16x256xbf16>
    %cst = arith.constant 0.000000e+00 : f32
    %1 = vector.broadcast %cst : f32 to vector<12x384xf32>
    %2 = vector.extract_strided_slice %0 {offsets = [0, 0, 0], sizes = [1, 12, 256], strides = [1, 1, 1]} : vector<1x16x256xbf16> to vector<1x12x256xbf16>
    %3 = vector.shape_cast %2 : vector<1x12x256xbf16> to vector<12x256xbf16>
    %c0_2 = arith.constant 0 : index
    %c0_3 = arith.constant 0 : index
    %c0_4 = arith.constant 0 : index
    %4 = vector.load %arg2[%c0_2, %c0_3, %c0_4] : memref<5x256x384xbf16, #tpu.memory_space<vmem>>, vector<1x256x384xbf16>
    %5 = vector.shape_cast %4 : vector<1x256x384xbf16> to vector<256x384xbf16>
    %cst_5 = arith.constant dense<0.000000e+00> : vector<12x384xf32>
    %6 = tpu.matmul %3, %5, %cst_5 {dimension_numbers = #tpu.dot_dimension_numbers<[1], [0], [0], [1], [0, 0, 1, 1], [], []>} : vector<12x256xbf16>, vector<256x384xbf16>, vector<12x384xf32> -> vector<12x384xf32>
    %7 = arith.addf %1, %6 : vector<12x384xf32>
    %8 = vector.extract_strided_slice %0 {offsets = [0, 1, 0], sizes = [1, 12, 256], strides = [1, 1, 1]} : vector<1x16x256xbf16> to vector<1x12x256xbf16>
    %9 = vector.shape_cast %8 : vector<1x12x256xbf16> to vector<12x256xbf16>
    %c1 = arith.constant 1 : index
    %c0_6 = arith.constant 0 : index
    %c0_7 = arith.constant 0 : index
    %10 = vector.load %arg2[%c1, %c0_6, %c0_7] : memref<5x256x384xbf16, #tpu.memory_space<vmem>>, vector<1x256x384xbf16>
    %11 = vector.shape_cast %10 : vector<1x256x384xbf16> to vector<256x384xbf16>
    %cst_8 = arith.constant dense<0.000000e+00> : vector<12x384xf32>
    %12 = tpu.matmul %9, %11, %cst_8 {dimension_numbers = #tpu.dot_dimension_numbers<[1], [0], [0], [1], [0, 0, 1, 1], [], []>} : vector<12x256xbf16>, vector<256x384xbf16>, vector<12x384xf32> -> vector<12x384xf32>
    %13 = arith.addf %7, %12 : vector<12x384xf32>
    %14 = vector.extract_strided_slice %0 {offsets = [0, 2, 0], sizes = [1, 12, 256], strides = [1, 1, 1]} : vector<1x16x256xbf16> to vector<1x12x256xbf16>
    %15 = vector.shape_cast %14 : vector<1x12x256xbf16> to vector<12x256xbf16>
    %c2 = arith.constant 2 : index
    %c0_9 = arith.constant 0 : index
    %c0_10 = arith.constant 0 : index
    %16 = vector.load %arg2[%c2, %c0_9, %c0_10] : memref<5x256x384xbf16, #tpu.memory_space<vmem>>, vector<1x256x384xbf16>
    %17 = vector.shape_cast %16 : vector<1x256x384xbf16> to vector<256x384xbf16>
    %cst_11 = arith.constant dense<0.000000e+00> : vector<12x384xf32>
    %18 = tpu.matmul %15, %17, %cst_11 {dimension_numbers = #tpu.dot_dimension_numbers<[1], [0], [0], [1], [0, 0, 1, 1], [], []>} : vector<12x256xbf16>, vector<256x384xbf16>, vector<12x384xf32> -> vector<12x384xf32>
    %19 = arith.addf %13, %18 : vector<12x384xf32>
    %20 = vector.extract_strided_slice %0 {offsets = [0, 3, 0], sizes = [1, 12, 256], strides = [1, 1, 1]} : vector<1x16x256xbf16> to vector<1x12x256xbf16>
    %21 = vector.shape_cast %20 : vector<1x12x256xbf16> to vector<12x256xbf16>
    %c3 = arith.constant 3 : index
    %c0_12 = arith.constant 0 : index
    %c0_13 = arith.constant 0 : index
    %22 = vector.load %arg2[%c3, %c0_12, %c0_13] : memref<5x256x384xbf16, #tpu.memory_space<vmem>>, vector<1x256x384xbf16>
    %23 = vector.shape_cast %22 : vector<1x256x384xbf16> to vector<256x384xbf16>
    %cst_14 = arith.constant dense<0.000000e+00> : vector<12x384xf32>
    %24 = tpu.matmul %21, %23, %cst_14 {dimension_numbers = #tpu.dot_dimension_numbers<[1], [0], [0], [1], [0, 0, 1, 1], [], []>} : vector<12x256xbf16>, vector<256x384xbf16>, vector<12x384xf32> -> vector<12x384xf32>
    %25 = arith.addf %19, %24 : vector<12x384xf32>
    %26 = vector.extract_strided_slice %0 {offsets = [0, 4, 0], sizes = [1, 12, 256], strides = [1, 1, 1]} : vector<1x16x256xbf16> to vector<1x12x256xbf16>
    %27 = vector.shape_cast %26 : vector<1x12x256xbf16> to vector<12x256xbf16>
    %c4 = arith.constant 4 : index
    %c0_15 = arith.constant 0 : index
    %c0_16 = arith.constant 0 : index
    %28 = vector.load %arg2[%c4, %c0_15, %c0_16] : memref<5x256x384xbf16, #tpu.memory_space<vmem>>, vector<1x256x384xbf16>
    %29 = vector.shape_cast %28 : vector<1x256x384xbf16> to vector<256x384xbf16>
    %cst_17 = arith.constant dense<0.000000e+00> : vector<12x384xf32>
    %30 = tpu.matmul %27, %29, %cst_17 {dimension_numbers = #tpu.dot_dimension_numbers<[1], [0], [0], [1], [0, 0, 1, 1], [], []>} : vector<12x256xbf16>, vector<256x384xbf16>, vector<12x384xf32> -> vector<12x384xf32>
    %31 = arith.addf %25, %30 : vector<12x384xf32>
    %c0_18 = arith.constant 0 : index
    %c0_19 = arith.constant 0 : index
    %32 = vector.load %arg3[%c0_18, %c0_19] : memref<1x384xf32, #tpu.memory_space<vmem>>, vector<1x384xf32>
    %33 = vector.broadcast %32 : vector<1x384xf32> to vector<12x384xf32>
    %34 = arith.addf %31, %33 : vector<12x384xf32>
    %cst_20 = arith.constant 0.000000e+00 : f32
    %35 = vector.broadcast %cst_20 : f32 to vector<12x384xf32>
    %36 = arith.cmpf ogt, %34, %35 : vector<12x384xf32>
    %cst_21 = arith.constant 0.00999999977 : f32
    %37 = vector.broadcast %cst_21 : f32 to vector<12x384xf32>
    %38 = arith.mulf %37, %34 : vector<12x384xf32>
    %39 = arith.select %36, %34, %38 : vector<12x384xi1>, vector<12x384xf32>
    %40 = vector.extract_strided_slice %39 {offsets = [0, 0], sizes = [12, 192], strides = [1, 1]} : vector<12x384xf32> to vector<12x192xf32>
    %41 = vector.extract_strided_slice %39 {offsets = [0, 192], sizes = [12, 192], strides = [1, 1]} : vector<12x384xf32> to vector<12x192xf32>
    %42 = arith.maximumf %40, %41 : vector<12x192xf32>
    %43 = vector.shape_cast %42 : vector<12x192xf32> to vector<6x2x192xf32>
    %44 = vector.extract_strided_slice %43 {offsets = [0, 0, 0], sizes = [6, 1, 192], strides = [1, 1, 1]} : vector<6x2x192xf32> to vector<6x1x192xf32>
    %45 = vector.shape_cast %44 : vector<6x1x192xf32> to vector<6x192xf32>
    %46 = vector.extract_strided_slice %43 {offsets = [0, 1, 0], sizes = [6, 1, 192], strides = [1, 1, 1]} : vector<6x2x192xf32> to vector<6x1x192xf32>
    %47 = vector.shape_cast %46 : vector<6x1x192xf32> to vector<6x192xf32>
    %48 = arith.maximumf %45, %47 : vector<6x192xf32>
    %49 = vector.shape_cast %48 : vector<6x192xf32> to vector<1x6x192xf32>
    %50 = arith.truncf %49 : vector<1x6x192xf32> to vector<1x6x192xbf16>
    %cst_22 = arith.constant 0.000000e+00 : bf16
    %51 = vector.broadcast %cst_22 : bf16 to vector<1x8x256xbf16>
    %c0_23 = arith.constant 0 : index
    %c0_24 = arith.constant 0 : index
    %c0_25 = arith.constant 0 : index
    %52 = vector.load %arg4[%c0_23, %c0_24, %c0_25] : memref<1x8x256xbf16, #tpu.memory_space<vmem>>, vector<1x8x256xbf16>
    tpu.vector_store %arg4[%c0_23, %c0_24, %c0_25], %51 {strides = array<i32>} : memref<1x8x256xbf16, #tpu.memory_space<vmem>>, vector<1x8x256xbf16>,
    %c0_26 = arith.constant 0 : index
    %c1_27 = arith.constant 1 : index
    %c32 = arith.constant 32 : index
    %53 = vector.load %arg4[%c0_26, %c1_27, %c32] : memref<1x8x256xbf16, #tpu.memory_space<vmem>>, vector<1x6x192xbf16>
    tpu.vector_store %arg4[%c0_26, %c1_27, %c32], %50 {strides = array<i32>} : memref<1x8x256xbf16, #tpu.memory_space<vmem>>, vector<1x6x192xbf16>,
    return
  }
  func.func @transform_0(%arg0: i32) -> (i32, i32, i32) {
    %c0_i32 = arith.constant 0 : i32
    %c0_i32_0 = arith.constant 0 : i32
    %c0_i32_1 = arith.constant 0 : i32
    return %arg0, %c0_i32, %c0_i32_0 : i32, i32, i32
  }
  func.func @transform_1(%arg0: i32) -> (i32, i32, i32) {
    %c0_i32 = arith.constant 0 : i32
    %c0_i32_0 = arith.constant 0 : i32
    %c0_i32_1 = arith.constant 0 : i32
    %c0_i32_2 = arith.constant 0 : i32
    return %c0_i32, %c0_i32_0, %c0_i32_1 : i32, i32, i32
  }
  func.func @transform_2(%arg0: i32) -> (i32, i32) {
    %c0_i32 = arith.constant 0 : i32
    %c0_i32_0 = arith.constant 0 : i32
    %c0_i32_1 = arith.constant 0 : i32
    return %c0_i32, %c0_i32_0 : i32, i32
  }
  func.func @transform_3(%arg0: i32) -> (i32, i32, i32) {
    %c0_i32 = arith.constant 0 : i32
    %c0_i32_0 = arith.constant 0 : i32
    %c0_i32_1 = arith.constant 0 : i32
    return %arg0, %c0_i32, %c0_i32_0 : i32, i32, i32
  }
}

module attributes {stable_mosaic.version = 11 : i64} {
  func.func @_conv_pool_kernel(%arg0: i32, %arg1: memref<1x8x256xbf16, #tpu.memory_space<vmem>>, %arg2: memref<3x256x384xbf16, #tpu.memory_space<vmem>>, %arg3: memref<1x384xf32, #tpu.memory_space<vmem>>, %arg4: memref<1x3x192xbf16, #tpu.memory_space<vmem>>) attributes {dimension_semantics = [#tpu.dimension_semantics<parallel>], iteration_bounds = array<i64: 2>, scalar_prefetch = 0 : i64, scratch_operands = 0 : i64, tpu.core_type = #tpu.core_type<tc>, window_params = [{transform_indices = @transform_0, window_bounds = array<i64: 1, 8, 256>}, {pipeline_mode = #tpu.pipeline_mode<synchronous>, transform_indices = @transform_1, window_bounds = array<i64: 3, 256, 384>}, {pipeline_mode = #tpu.pipeline_mode<synchronous>, transform_indices = @transform_2, window_bounds = array<i64: 1, 384>}, {transform_indices = @transform_3, window_bounds = array<i64: 1, 3, 192>}]} {
    %c0 = arith.constant 0 : index
    %c0_0 = arith.constant 0 : index
    %c0_1 = arith.constant 0 : index
    %0 = vector.load %arg1[%c0, %c0_0, %c0_1] : memref<1x8x256xbf16, #tpu.memory_space<vmem>>, vector<1x8x256xbf16>
    %cst = arith.constant 0.000000e+00 : f32
    %1 = vector.broadcast %cst : f32 to vector<6x384xf32>
    %2 = vector.extract_strided_slice %0 {offsets = [0, 0, 0], sizes = [1, 6, 256], strides = [1, 1, 1]} : vector<1x8x256xbf16> to vector<1x6x256xbf16>
    %3 = vector.shape_cast %2 : vector<1x6x256xbf16> to vector<6x256xbf16>
    %c0_2 = arith.constant 0 : index
    %c0_3 = arith.constant 0 : index
    %c0_4 = arith.constant 0 : index
    %4 = vector.load %arg2[%c0_2, %c0_3, %c0_4] : memref<3x256x384xbf16, #tpu.memory_space<vmem>>, vector<1x256x384xbf16>
    %5 = vector.shape_cast %4 : vector<1x256x384xbf16> to vector<256x384xbf16>
    %cst_5 = arith.constant dense<0.000000e+00> : vector<6x384xf32>
    %6 = tpu.matmul %3, %5, %cst_5 {dimension_numbers = #tpu.dot_dimension_numbers<[1], [0], [0], [1], [0, 0, 1, 1], [], []>} : vector<6x256xbf16>, vector<256x384xbf16>, vector<6x384xf32> -> vector<6x384xf32>
    %7 = arith.addf %1, %6 : vector<6x384xf32>
    %8 = vector.extract_strided_slice %0 {offsets = [0, 1, 0], sizes = [1, 6, 256], strides = [1, 1, 1]} : vector<1x8x256xbf16> to vector<1x6x256xbf16>
    %9 = vector.shape_cast %8 : vector<1x6x256xbf16> to vector<6x256xbf16>
    %c1 = arith.constant 1 : index
    %c0_6 = arith.constant 0 : index
    %c0_7 = arith.constant 0 : index
    %10 = vector.load %arg2[%c1, %c0_6, %c0_7] : memref<3x256x384xbf16, #tpu.memory_space<vmem>>, vector<1x256x384xbf16>
    %11 = vector.shape_cast %10 : vector<1x256x384xbf16> to vector<256x384xbf16>
    %cst_8 = arith.constant dense<0.000000e+00> : vector<6x384xf32>
    %12 = tpu.matmul %9, %11, %cst_8 {dimension_numbers = #tpu.dot_dimension_numbers<[1], [0], [0], [1], [0, 0, 1, 1], [], []>} : vector<6x256xbf16>, vector<256x384xbf16>, vector<6x384xf32> -> vector<6x384xf32>
    %13 = arith.addf %7, %12 : vector<6x384xf32>
    %14 = vector.extract_strided_slice %0 {offsets = [0, 2, 0], sizes = [1, 6, 256], strides = [1, 1, 1]} : vector<1x8x256xbf16> to vector<1x6x256xbf16>
    %15 = vector.shape_cast %14 : vector<1x6x256xbf16> to vector<6x256xbf16>
    %c2 = arith.constant 2 : index
    %c0_9 = arith.constant 0 : index
    %c0_10 = arith.constant 0 : index
    %16 = vector.load %arg2[%c2, %c0_9, %c0_10] : memref<3x256x384xbf16, #tpu.memory_space<vmem>>, vector<1x256x384xbf16>
    %17 = vector.shape_cast %16 : vector<1x256x384xbf16> to vector<256x384xbf16>
    %cst_11 = arith.constant dense<0.000000e+00> : vector<6x384xf32>
    %18 = tpu.matmul %15, %17, %cst_11 {dimension_numbers = #tpu.dot_dimension_numbers<[1], [0], [0], [1], [0, 0, 1, 1], [], []>} : vector<6x256xbf16>, vector<256x384xbf16>, vector<6x384xf32> -> vector<6x384xf32>
    %19 = arith.addf %13, %18 : vector<6x384xf32>
    %c0_12 = arith.constant 0 : index
    %c0_13 = arith.constant 0 : index
    %20 = vector.load %arg3[%c0_12, %c0_13] : memref<1x384xf32, #tpu.memory_space<vmem>>, vector<1x384xf32>
    %21 = vector.broadcast %20 : vector<1x384xf32> to vector<6x384xf32>
    %22 = arith.addf %19, %21 : vector<6x384xf32>
    %cst_14 = arith.constant 0.000000e+00 : f32
    %23 = vector.broadcast %cst_14 : f32 to vector<6x384xf32>
    %24 = arith.cmpf ogt, %22, %23 : vector<6x384xf32>
    %cst_15 = arith.constant 0.00999999977 : f32
    %25 = vector.broadcast %cst_15 : f32 to vector<6x384xf32>
    %26 = arith.mulf %25, %22 : vector<6x384xf32>
    %27 = arith.select %24, %22, %26 : vector<6x384xi1>, vector<6x384xf32>
    %28 = vector.extract_strided_slice %27 {offsets = [0, 0], sizes = [6, 192], strides = [1, 1]} : vector<6x384xf32> to vector<6x192xf32>
    %29 = vector.extract_strided_slice %27 {offsets = [0, 192], sizes = [6, 192], strides = [1, 1]} : vector<6x384xf32> to vector<6x192xf32>
    %30 = arith.maximumf %28, %29 : vector<6x192xf32>
    %31 = vector.shape_cast %30 : vector<6x192xf32> to vector<3x2x192xf32>
    %32 = vector.extract_strided_slice %31 {offsets = [0, 0, 0], sizes = [3, 1, 192], strides = [1, 1, 1]} : vector<3x2x192xf32> to vector<3x1x192xf32>
    %33 = vector.shape_cast %32 : vector<3x1x192xf32> to vector<3x192xf32>
    %34 = vector.extract_strided_slice %31 {offsets = [0, 1, 0], sizes = [3, 1, 192], strides = [1, 1, 1]} : vector<3x2x192xf32> to vector<3x1x192xf32>
    %35 = vector.shape_cast %34 : vector<3x1x192xf32> to vector<3x192xf32>
    %36 = arith.maximumf %33, %35 : vector<3x192xf32>
    %37 = vector.shape_cast %36 : vector<3x192xf32> to vector<1x3x192xf32>
    %38 = arith.truncf %37 : vector<1x3x192xf32> to vector<1x3x192xbf16>
    %c0_16 = arith.constant 0 : index
    %c0_17 = arith.constant 0 : index
    %c0_18 = arith.constant 0 : index
    %39 = vector.load %arg4[%c0_16, %c0_17, %c0_18] : memref<1x3x192xbf16, #tpu.memory_space<vmem>>, vector<1x3x192xbf16>
    tpu.vector_store %arg4[%c0_16, %c0_17, %c0_18], %38 {strides = array<i32>} : memref<1x3x192xbf16, #tpu.memory_space<vmem>>, vector<1x3x192xbf16>,
    return
  }
  func.func @transform_0(%arg0: i32) -> (i32, i32, i32) {
    %c0_i32 = arith.constant 0 : i32
    %c0_i32_0 = arith.constant 0 : i32
    %c0_i32_1 = arith.constant 0 : i32
    return %arg0, %c0_i32, %c0_i32_0 : i32, i32, i32
  }
  func.func @transform_1(%arg0: i32) -> (i32, i32, i32) {
    %c0_i32 = arith.constant 0 : i32
    %c0_i32_0 = arith.constant 0 : i32
    %c0_i32_1 = arith.constant 0 : i32
    %c0_i32_2 = arith.constant 0 : i32
    return %c0_i32, %c0_i32_0, %c0_i32_1 : i32, i32, i32
  }
  func.func @transform_2(%arg0: i32) -> (i32, i32) {
    %c0_i32 = arith.constant 0 : i32
    %c0_i32_0 = arith.constant 0 : i32
    %c0_i32_1 = arith.constant 0 : i32
    return %c0_i32, %c0_i32_0 : i32, i32
  }
  func.func @transform_3(%arg0: i32) -> (i32, i32, i32) {
    %c0_i32 = arith.constant 0 : i32
    %c0_i32_0 = arith.constant 0 : i32
    %c0_i32_1 = arith.constant 0 : i32
    return %arg0, %c0_i32, %c0_i32_0 : i32, i32, i32
  }
}

module attributes {stable_mosaic.version = 11 : i64} {
  func.func @_fc_kernel(%arg0: i32, %arg1: memref<2x3x192xbf16, #tpu.memory_space<vmem>>, %arg2: memref<3x192x128xbf16, #tpu.memory_space<vmem>>, %arg3: memref<1x128xf32, #tpu.memory_space<vmem>>, %arg4: memref<128x10xbf16, #tpu.memory_space<vmem>>, %arg5: memref<1x10xf32, #tpu.memory_space<vmem>>, %arg6: memref<2x128xf32, #tpu.memory_space<vmem>>, %arg7: memref<2x10xf32, #tpu.memory_space<vmem>>) attributes {dimension_semantics = [#tpu.dimension_semantics<arbitrary>], iteration_bounds = array<i64: 1>, scalar_prefetch = 0 : i64, scratch_operands = 0 : i64, tpu.core_type = #tpu.core_type<tc>, window_params = [{pipeline_mode = #tpu.pipeline_mode<synchronous>, transform_indices = @transform_0, window_bounds = array<i64: 2, 3, 192>}, {pipeline_mode = #tpu.pipeline_mode<synchronous>, transform_indices = @transform_1, window_bounds = array<i64: 3, 192, 128>}, {pipeline_mode = #tpu.pipeline_mode<synchronous>, transform_indices = @transform_2, window_bounds = array<i64: 1, 128>}, {pipeline_mode = #tpu.pipeline_mode<synchronous>, transform_indices = @transform_3, window_bounds = array<i64: 128, 10>}, {pipeline_mode = #tpu.pipeline_mode<synchronous>, transform_indices = @transform_4, window_bounds = array<i64: 1, 10>}, {pipeline_mode = #tpu.pipeline_mode<synchronous>, transform_indices = @transform_5, window_bounds = array<i64: 2, 128>}, {pipeline_mode = #tpu.pipeline_mode<synchronous>, transform_indices = @transform_6, window_bounds = array<i64: 2, 10>}]} {
    %c0 = arith.constant 0 : index
    %c0_0 = arith.constant 0 : index
    %c0_1 = arith.constant 0 : index
    %0 = vector.load %arg1[%c0, %c0_0, %c0_1] : memref<2x3x192xbf16, #tpu.memory_space<vmem>>, vector<2x3x192xbf16>
    %cst = arith.constant 0.000000e+00 : f32
    %1 = vector.broadcast %cst : f32 to vector<2x128xf32>
    %2 = vector.extract_strided_slice %0 {offsets = [0, 0, 0], sizes = [2, 1, 192], strides = [1, 1, 1]} : vector<2x3x192xbf16> to vector<2x1x192xbf16>
    %3 = vector.shape_cast %2 : vector<2x1x192xbf16> to vector<2x192xbf16>
    %c0_2 = arith.constant 0 : index
    %c0_3 = arith.constant 0 : index
    %c0_4 = arith.constant 0 : index
    %4 = vector.load %arg2[%c0_2, %c0_3, %c0_4] : memref<3x192x128xbf16, #tpu.memory_space<vmem>>, vector<1x192x128xbf16>
    %5 = vector.shape_cast %4 : vector<1x192x128xbf16> to vector<192x128xbf16>
    %cst_5 = arith.constant dense<0.000000e+00> : vector<2x128xf32>
    %6 = tpu.matmul %3, %5, %cst_5 {dimension_numbers = #tpu.dot_dimension_numbers<[1], [0], [0], [1], [0, 0, 1, 1], [], []>} : vector<2x192xbf16>, vector<192x128xbf16>, vector<2x128xf32> -> vector<2x128xf32>
    %7 = arith.addf %1, %6 : vector<2x128xf32>
    %8 = vector.extract_strided_slice %0 {offsets = [0, 1, 0], sizes = [2, 1, 192], strides = [1, 1, 1]} : vector<2x3x192xbf16> to vector<2x1x192xbf16>
    %9 = vector.shape_cast %8 : vector<2x1x192xbf16> to vector<2x192xbf16>
    %c1 = arith.constant 1 : index
    %c0_6 = arith.constant 0 : index
    %c0_7 = arith.constant 0 : index
    %10 = vector.load %arg2[%c1, %c0_6, %c0_7] : memref<3x192x128xbf16, #tpu.memory_space<vmem>>, vector<1x192x128xbf16>
    %11 = vector.shape_cast %10 : vector<1x192x128xbf16> to vector<192x128xbf16>
    %cst_8 = arith.constant dense<0.000000e+00> : vector<2x128xf32>
    %12 = tpu.matmul %9, %11, %cst_8 {dimension_numbers = #tpu.dot_dimension_numbers<[1], [0], [0], [1], [0, 0, 1, 1], [], []>} : vector<2x192xbf16>, vector<192x128xbf16>, vector<2x128xf32> -> vector<2x128xf32>
    %13 = arith.addf %7, %12 : vector<2x128xf32>
    %14 = vector.extract_strided_slice %0 {offsets = [0, 2, 0], sizes = [2, 1, 192], strides = [1, 1, 1]} : vector<2x3x192xbf16> to vector<2x1x192xbf16>
    %15 = vector.shape_cast %14 : vector<2x1x192xbf16> to vector<2x192xbf16>
    %c2 = arith.constant 2 : index
    %c0_9 = arith.constant 0 : index
    %c0_10 = arith.constant 0 : index
    %16 = vector.load %arg2[%c2, %c0_9, %c0_10] : memref<3x192x128xbf16, #tpu.memory_space<vmem>>, vector<1x192x128xbf16>
    %17 = vector.shape_cast %16 : vector<1x192x128xbf16> to vector<192x128xbf16>
    %cst_11 = arith.constant dense<0.000000e+00> : vector<2x128xf32>
    %18 = tpu.matmul %15, %17, %cst_11 {dimension_numbers = #tpu.dot_dimension_numbers<[1], [0], [0], [1], [0, 0, 1, 1], [], []>} : vector<2x192xbf16>, vector<192x128xbf16>, vector<2x128xf32> -> vector<2x128xf32>
    %19 = arith.addf %13, %18 : vector<2x128xf32>
    %c0_12 = arith.constant 0 : index
    %c0_13 = arith.constant 0 : index
    %20 = vector.load %arg3[%c0_12, %c0_13] : memref<1x128xf32, #tpu.memory_space<vmem>>, vector<1x128xf32>
    %21 = vector.broadcast %20 : vector<1x128xf32> to vector<2x128xf32>
    %22 = arith.addf %19, %21 : vector<2x128xf32>
    %cst_14 = arith.constant 0.000000e+00 : f32
    %23 = vector.broadcast %cst_14 : f32 to vector<2x128xf32>
    %24 = arith.cmpf ogt, %22, %23 : vector<2x128xf32>
    %cst_15 = arith.constant 0.00999999977 : f32
    %25 = vector.broadcast %cst_15 : f32 to vector<2x128xf32>
    %26 = arith.mulf %25, %22 : vector<2x128xf32>
    %27 = arith.select %24, %22, %26 : vector<2x128xi1>, vector<2x128xf32>
    %c0_16 = arith.constant 0 : index
    %c0_17 = arith.constant 0 : index
    %28 = vector.load %arg6[%c0_16, %c0_17] : memref<2x128xf32, #tpu.memory_space<vmem>>, vector<2x128xf32>
    tpu.vector_store %arg6[%c0_16, %c0_17], %27 {strides = array<i32>} : memref<2x128xf32, #tpu.memory_space<vmem>>, vector<2x128xf32>,
    %29 = arith.truncf %27 : vector<2x128xf32> to vector<2x128xbf16>
    %c0_18 = arith.constant 0 : index
    %c0_19 = arith.constant 0 : index
    %30 = vector.load %arg4[%c0_18, %c0_19] : memref<128x10xbf16, #tpu.memory_space<vmem>>, vector<128x10xbf16>
    %cst_20 = arith.constant dense<0.000000e+00> : vector<2x10xf32>
    %31 = tpu.matmul %29, %30, %cst_20 {dimension_numbers = #tpu.dot_dimension_numbers<[1], [0], [0], [1], [0, 0, 1, 1], [], []>} : vector<2x128xbf16>, vector<128x10xbf16>, vector<2x10xf32> -> vector<2x10xf32>
    %c0_21 = arith.constant 0 : index
    %c0_22 = arith.constant 0 : index
    %32 = vector.load %arg5[%c0_21, %c0_22] : memref<1x10xf32, #tpu.memory_space<vmem>>, vector<1x10xf32>
    %33 = vector.broadcast %32 : vector<1x10xf32> to vector<2x10xf32>
    %34 = arith.addf %31, %33 : vector<2x10xf32>
    %c0_23 = arith.constant 0 : index
    %c0_24 = arith.constant 0 : index
    %35 = vector.load %arg7[%c0_23, %c0_24] : memref<2x10xf32, #tpu.memory_space<vmem>>, vector<2x10xf32>
    tpu.vector_store %arg7[%c0_23, %c0_24], %34 {strides = array<i32>} : memref<2x10xf32, #tpu.memory_space<vmem>>, vector<2x10xf32>,
    return
  }
  func.func @transform_0(%arg0: i32) -> (i32, i32, i32) {
    %c0_i32 = arith.constant 0 : i32
    %c0_i32_0 = arith.constant 0 : i32
    %c0_i32_1 = arith.constant 0 : i32
    %c0_i32_2 = arith.constant 0 : i32
    return %c0_i32, %c0_i32_0, %c0_i32_1 : i32, i32, i32
  }
  func.func @transform_1(%arg0: i32) -> (i32, i32, i32) {
    %c0_i32 = arith.constant 0 : i32
    %c0_i32_0 = arith.constant 0 : i32
    %c0_i32_1 = arith.constant 0 : i32
    %c0_i32_2 = arith.constant 0 : i32
    return %c0_i32, %c0_i32_0, %c0_i32_1 : i32, i32, i32
  }
  func.func @transform_2(%arg0: i32) -> (i32, i32) {
    %c0_i32 = arith.constant 0 : i32
    %c0_i32_0 = arith.constant 0 : i32
    %c0_i32_1 = arith.constant 0 : i32
    return %c0_i32, %c0_i32_0 : i32, i32
  }
  func.func @transform_3(%arg0: i32) -> (i32, i32) {
    %c0_i32 = arith.constant 0 : i32
    %c0_i32_0 = arith.constant 0 : i32
    %c0_i32_1 = arith.constant 0 : i32
    return %c0_i32, %c0_i32_0 : i32, i32
  }
  func.func @transform_4(%arg0: i32) -> (i32, i32) {
    %c0_i32 = arith.constant 0 : i32
    %c0_i32_0 = arith.constant 0 : i32
    %c0_i32_1 = arith.constant 0 : i32
    return %c0_i32, %c0_i32_0 : i32, i32
  }
  func.func @transform_5(%arg0: i32) -> (i32, i32) {
    %c0_i32 = arith.constant 0 : i32
    %c0_i32_0 = arith.constant 0 : i32
    %c0_i32_1 = arith.constant 0 : i32
    return %c0_i32, %c0_i32_0 : i32, i32
  }
  func.func @transform_6(%arg0: i32) -> (i32, i32) {
    %c0_i32 = arith.constant 0 : i32
    %c0_i32_0 = arith.constant 0 : i32
    %c0_i32_1 = arith.constant 0 : i32
    return %c0_i32, %c0_i32_0 : i32, i32
  }
}

</mosaic_0001>

<bundles_post_ra>
// kernel: cifar_cnn_forward.7
= control target key start
LH: loop header
LB: loop body
LE: loop exit
PB: predicated region body
PF: predicated region fallthrough
CT: control target
= control target key end

     0   :  { %12 = vsyncpa [#allocation3], 0  ;;  %v873_v1 = vmov 0   ;;  %vm99_vm0 = vcmask 1041409   ;;  %vm178_vm1 = vcmask 523264   ;;  %s1136_s0 = inlined_call_operand.vmem [shape: bf16[2,3,192], index: 0, kind: input, shape index: {}]   ;;  %s1137_s1 = inlined_call_operand.vmem [shape: bf16[3,192,128], index: 1, kind: input, shape index: {}]   ;;  %s1138_s2 = inlined_call_operand.vmem [shape: f32[1,128], index: 2, kind: input, shape index: {}]   ;;  %s1139_s3 = inlined_call_operand.vmem [shape: bf16[128,10], index: 3, kind: input, shape index: {}]   ;;  %s1140_s4 = inlined_call_operand.vmem [shape: f32[1,10], index: 4, kind: input, shape index: {}]   ;;  %s1141_s5 = inlined_call_operand.hbm [shape: f32[2,128], index: 5, kind: output, shape index: {0}]   ;;  %s1142_s6 = inlined_call_operand.hbm [shape: f32[2,10], index: 6, kind: output, shape index: {1}]  }
   0x1   :  { %v781_v0 = vld [vmem:[%s1137_s1 + $0x60] sm:$0xff]   ;;  %182 = vmatprep.subr.bf16.mxu0 %v873_v1  ;;  %304 = vmatprep.subr.bf16.mxu1 %v873_v1  ;;  %v783_v3 = vld [vmem:[%s1137_s1 + $0x68] sm:$0xff]   ;;  %v785_v5 = vld [vmem:[%s1137_s1 + $0x70] sm:$0xff]  }
   0x2   :  { %v782_v2 = vld [vmem:[%s1137_s1] sm:$0xff]   ;;  %183 = vmatpush1.bf16.msra.mxu0 %v781_v0  ;;  %v784_v4 = vld [vmem:[%s1137_s1 + $0x8] sm:$0xff]   ;;  %v786_v6 = vld [vmem:[%s1137_s1 + $0x10] sm:$0xff]  }
   0x3   :  { %305 = vmatpush1.bf16.msra.mxu1 %v782_v2  ;;  %184 = vmatprep.subr.bf16.mxu0 %v873_v1  ;;  %v787_v7 = vld [vmem:[%s1137_s1 + $0x78] sm:$0xff]   ;;  %v789_v9 = vld [vmem:[%s1137_s1 + $0x80] sm:$0xff]   ;;  %v791_v11 = vld [vmem:[%s1137_s1 + $0x88] sm:$0xff]  }
   0x4   :  { %306 = vmatprep.subr.bf16.mxu1 %v873_v1  ;;  %v788_v8 = vld [vmem:[%s1137_s1 + $0x18] sm:$0xff]   ;;  %v790_v10 = vld [vmem:[%s1137_s1 + $0x20] sm:$0xff]   ;;  %v792_v12 = vld [vmem:[%s1137_s1 + $0x28] sm:$0xff]  }
   0x5   :  { %v793_v13 = vld [vmem:[%s1137_s1 + $0x90] sm:$0xff]   ;;  %v672_v15 = vld.sshfl [vmem:[%s1136_s0] sm:$0x33 pattern:$0x76325410]  ;;  %v795_v18 = vld [vmem:[%s1137_s1 + $0x98] sm:$0xff]  }
   0x6   :  { %185 = vmatpush1.bf16.msra.mxu0 %v783_v3  ;;  %v794_v14 = vld [vmem:[%s1137_s1 + $0x30] sm:$0xff]   ;;  %v673_v16 = vld.sshfl [vmem:[%s1136_s0 + $0x4] sm:$0x33 pattern:$0x76325410]  ;;  %v85_v17 = vcombine.high %v672_v15, %v672_v15  ;;  %v796_v20 = vld [vmem:[%s1137_s1 + $0x38] sm:$0xff]   ;;  %v992_v29 = vunpack.c.l.b16 %v672_v15 }
   0x7   :  { %307 = vmatpush1.bf16.msra.mxu1 %v784_v4  ;;  %186 = vmatprep.subr.bf16.mxu0 %v873_v1  ;;  %v93_v19 = vcombine.high %v673_v16, %v673_v16  ;;  %v797_v24 = vld [vmem:[%s1137_s1 + $0xa0] sm:$0xff]   ;;  %v994_v30 = vunpack.c.l.b16 %v673_v16  ;;  %v799_v33 = vld [vmem:[%s1137_s1 + $0xa8] sm:$0xff]   ;;  %v801_v35 = vld [vmem:[%s1137_s1 + $0xb0] sm:$0xff]  }
   0x8   :  { %308 = vmatprep.subr.bf16.mxu1 %v873_v1  ;;  %v95_v21 = vunpack.c.l.b16 %v85_v17  ;;  %v798_v25 = vld [vmem:[%s1137_s1 + $0x40] sm:$0xff]   ;;  %v800_v34 = vld [vmem:[%s1137_s1 + $0x48] sm:$0xff]   ;;  %v98_v36 = vrot.slane %v992_v29, 1  ;;  %v802_v38 = vld [vmem:[%s1137_s1 + $0x50] sm:$0xff]  }
   0x9   :  { %v97_v22 = vunpack.c.l.b16 %v93_v19  ;;  %v222_v37 = vrot.slane %v994_v30, 7  ;;  %v803_v41 = vld [vmem:[%s1137_s1 + $0xb8] sm:$0xff]  }
   0xa   :  { %187 = vmatpush1.bf16.msra.mxu0 %v785_v5  ;;  %v101_v23 = vrot.slane %v95_v21, 1  ;;  %v372_v40 = vrot.slane %v95_v21, 2  ;;  %v100_v42 = vsel %vm99_vm0, %v994_v30, %v98_v36 }
   0xb   :  { %309 = vmatpush1.bf16.msra.mxu1 %v786_v6  ;;  %188 = vmatprep.subr.bf16.mxu0 %v873_v1  ;;  %v224_v26 = vrot.slane %v97_v22, 7  ;;  %v373_v39 = vrot.slane %v97_v22, 1 }
   0xc   :  { %310 = vmatprep.subr.bf16.mxu1 %v873_v1  ;;  %v102_v27 = vsel %vm99_vm0, %v97_v22, %v101_v23 }
   0xd   :  { %v104_v28 = vpack.c.b16 %v102_v27, %v102_v27  ;;  %v225_v31 = vsel %vm99_vm0, %v224_v26, %v95_v21 }
   0xe   :  { %189 = vmatpush1.bf16.msra.mxu0 %v787_v7  ;;  %v227_v32 = vpack.c.b16 %v225_v31, %v225_v31 }
   0xf   :  { %311 = vmatpush1.bf16.msra.mxu1 %v788_v8  ;;  %190 = vmatprep.subr.bf16.mxu0 %v873_v1 }
  0x10   :  { %312 = vmatprep.subr.bf16.mxu1 %v873_v1  ;;  %686 = vmatprep.mubr.msk.bf16.mxu0 %vm178_vm1, %v104_v28 }
  0x11   :  { %699 = vmatprep.mubr.msk.bf16.mxu1 %vm178_vm1, %v227_v32 }
  0x12   :  { %191 = vmatpush1.bf16.msra.mxu0 %v789_v9 }
  0x13   :  { %313 = vmatpush1.bf16.msra.mxu1 %v790_v10  ;;  %192 = vmatprep.subr.bf16.mxu0 %v873_v1 }
  0x14   :  { %314 = vmatprep.subr.bf16.mxu1 %v873_v1 }
  0x16   :  { %193 = vmatpush1.bf16.msra.mxu0 %v791_v11 }
  0x17   :  { %315 = vmatpush1.bf16.msra.mxu1 %v792_v12  ;;  %194 = vmatprep.subr.bf16.mxu0 %v873_v1 }
  0x18   :  { %316 = vmatprep.subr.bf16.mxu1 %v873_v1 }
  0x1a   :  { %195 = vmatpush1.bf16.msra.mxu0 %v793_v13 }
  0x1b   :  { %317 = vmatpush1.bf16.msra.mxu1 %v794_v14  ;;  %196 = vmatprep.subr.bf16.mxu0 %v873_v1 }
  0x1c   :  { %318 = vmatprep.subr.bf16.mxu1 %v873_v1 }
  0x1e   :  { %197 = vmatpush1.bf16.msra.mxu0 %v795_v18 }
  0x1f   :  { %319 = vmatpush1.bf16.msra.mxu1 %v796_v20  ;;  %198 = vmatprep.subr.bf16.mxu0 %v873_v1 }
  0x20   :  { %320 = vmatprep.subr.bf16.mxu1 %v873_v1 }
  0x22   :  { %199 = vmatpush1.bf16.msra.mxu0 %v797_v24 }
  0x23   :  { %321 = vmatpush1.bf16.msra.mxu1 %v798_v25  ;;  %200 = vmatprep.subr.bf16.mxu0 %v873_v1 }
  0x24   :  { %322 = vmatprep.subr.bf16.mxu1 %v873_v1 }
  0x26   :  { %201 = vmatpush1.bf16.msra.mxu0 %v799_v33 }
  0x27   :  { %323 = vmatpush1.bf16.msra.mxu1 %v800_v34  ;;  %202 = vmatprep.subr.bf16.mxu0 %v873_v1 }
  0x28   :  { %324 = vmatprep.subr.bf16.mxu1 %v873_v1 }
  0x2a   :  { %203 = vmatpush1.bf16.msra.mxu0 %v801_v35 }
  0x2b   :  { %13 = vsyncpa [#allocation5], 0  ;;  %325 = vmatpush1.bf16.msra.mxu1 %v802_v38  ;;  %204 = vmatprep.subr.bf16.mxu0 %v873_v1  ;;  %v804_v43 = vld [vmem:[%s1137_s1 + $0x58] sm:$0xff]   ;;  %v223_v44 = vsel %vm99_vm0, %v222_v37, %v992_v29  ;;  %v374_v45 = vsel %vm99_vm0, %v373_v39, %v372_v40  ;;  %v103_v46 = vpack.c.b16 %v100_v42, %v100_v42  ;;  %v805_v48 = vld [vmem:[%s1137_s1 + $0xc0] sm:$0xff]   ;;  %v369_v60 = vrot.slane %v992_v29, 2 }
  0x2c   :  { %326 = vmatprep.subr.bf16.mxu1 %v873_v1  ;;  %v226_v47 = vpack.c.b16 %v223_v44, %v223_v44  ;;  %v376_v49 = vpack.c.b16 %v374_v45, %v374_v45  ;;  %v806_v50 = vld [vmem:[%s1137_s1 + $0xc8] sm:$0xff]   ;;  %v807_v51 = vld [vmem:[%s1137_s1 + $0xd0] sm:$0xff]   ;;  %v808_v52 = vld [vmem:[%s1137_s1 + $0xd8] sm:$0xff]   ;;  %v370_v61 = vrot.slane %v994_v30, 1  ;;  %v874_v3 = vmov 0.0  }
  0x2d   :  { %v809_v53 = vld [vmem:[%s1137_s1 + $0xe0] sm:$0xff]   ;;  %v810_v54 = vld [vmem:[%s1137_s1 + $0xe8] sm:$0xff]   ;;  %v811_v55 = vld [vmem:[%s1137_s1 + $0xf0] sm:$0xff]   ;;  %vm875_vm2 = vmmov 0  }
  0x2e   :  { %205 = vmatpush1.bf16.msra.mxu0 %v803_v41  ;;  %v812_v56 = vld [vmem:[%s1137_s1 + $0xf8] sm:$0xff]   ;;  %v813_v57 = vld [vmem:[%s1137_s1 + $0x100] sm:$0xff]   ;;  %v814_v58 = vld [vmem:[%s1137_s1 + $0x108] sm:$0xff]   ;;  %v371_v63 = vsel %vm99_vm0, %v370_v61, %v369_v60 }
  0x2f   :  { %327 = vmatpush1.bf16.msra.mxu1 %v804_v43  ;;  %453 = vmatprep.subr.bf16.mxu0 %v873_v1  ;;  %v815_v59 = vld [vmem:[%s1137_s1 + $0x110] sm:$0xff]   ;;  %v816_v62 = vld [vmem:[%s1137_s1 + $0x118] sm:$0xff]   ;;  %v375_v0 = vpack.c.b16 %v371_v63, %v371_v63  ;;  %v817_v2 = vld [vmem:[%s1139_s3] sm:$0xff]  }
  0x30   :  { %756 = vmatprep.subr.bf16.mxu1 %v874_v3  ;;  %v818_v4 = vld [vmem:[%s1139_s3 + $0x8] sm:$0xff]   ;;  %v820_v5 = vld [vmem:[%s1139_s3 + $0x18] sm:$0xff]   ;;  %v821_v6 = vld [vmem:[%s1139_s3 + $0x20] sm:$0xff]  }
  0x31   :  { %215 = vmatmul.mubr.bf16.vlgmr.msra.gmra.mrb[0].mxu0 %v103_v46  ;;  %v822_v7 = vld [vmem:[%s1139_s3 + $0x28] sm:$0xff]   ;;  %v823_v8 = vld [vmem:[%s1139_s3 + $0x30] sm:$0xff]   ;;  %v824_v9 = vld [vmem:[%s1139_s3 + $0x38] sm:$0xff]  }
  0x32   :  { %337 = vmatmul.mubr.bf16.vlgmr.msra.gmra.mrb[0].mxu1 %v226_v47  ;;  %454 = vmatpush1.bf16.msra.mxu0 %v805_v48  ;;  %v737_v20 = vld [vmem:[%s1138_s2] ss:$0 sm:$0xff] }
  0x33   :  { %455 = vmatprep.subr.bf16.mxu0 %v873_v1  ;;  %736 = vmatprep.mubr.msk.bf16.mxu0 %vm178_vm1, %v376_v49 }
  0x34   :  { %757 = vmatpush3.bf16.msra.mxu1 %v817_v2  ;;  %772 = vmatprep.mubr.msk.bf16.mxu1 %vm875_vm2, %v874_v3 }
  0x35   :  { %758 = vmatprep.subr.bf16.mxu1 %v874_v3 }
  0x36   :  { %456 = vmatpush1.bf16.msra.mxu0 %v806_v50 }
  0x37   :  { %457 = vmatprep.subr.bf16.mxu0 %v873_v1 }
  0x38   :  { %759 = vmatpush3.bf16.msra.mxu1 %v818_v4 }
  0x39   :  { %760 = vmatprep.subr.bf16.mxu1 %v874_v3 }
  0x3a   :  { %458 = vmatpush1.bf16.msra.mxu0 %v807_v51 }
  0x3b   :  { %459 = vmatprep.subr.bf16.mxu0 %v873_v1 }
  0x3e   :  { %460 = vmatpush1.bf16.msra.mxu0 %v808_v52 }
  0x3f   :  { %461 = vmatprep.subr.bf16.mxu0 %v873_v1 }
  0x42   :  { %462 = vmatpush1.bf16.msra.mxu0 %v809_v53 }
  0x43   :  { %463 = vmatprep.subr.bf16.mxu0 %v873_v1 }
  0x46   :  { %464 = vmatpush1.bf16.msra.mxu0 %v810_v54 }
  0x47   :  { %465 = vmatprep.subr.bf16.mxu0 %v873_v1 }
  0x4a   :  { %466 = vmatpush1.bf16.msra.mxu0 %v811_v55 }
  0x4b   :  { %467 = vmatprep.subr.bf16.mxu0 %v873_v1 }
  0x4e   :  { %468 = vmatpush1.bf16.msra.mxu0 %v812_v56 }
  0x4f   :  { %469 = vmatprep.subr.bf16.mxu0 %v873_v1 }
  0x52   :  { %470 = vmatpush1.bf16.msra.mxu0 %v813_v57 }
  0x53   :  { %471 = vmatprep.subr.bf16.mxu0 %v873_v1 }
  0x56   :  { %472 = vmatpush1.bf16.msra.mxu0 %v814_v58 }
  0x57   :  { %473 = vmatprep.subr.bf16.mxu0 %v873_v1 }
  0x5a   :  { %474 = vmatpush1.bf16.msra.mxu0 %v815_v59 }
  0x5b   :  { %475 = vmatprep.subr.bf16.mxu0 %v873_v1  ;;  %v819_v1 = vld [vmem:[%s1139_s3 + $0x10] sm:$0xff]   ;;  %s876_s3 = smov [#allocation2]  }
  0x5c   :  { %761 = vmatpush3.bf16.msra.mxu1 %v819_v1  ;;  %s626_s15 = sshll.u32 %s876_s3, 4  ;;  %s627_s15 = int_to_ptr.vmem [resolvable:$true] %s626_s15 }
  0x5d   :  { %762 = vmatprep.subr.bf16.mxu1 %v874_v3  ;;  %s825_s16 = scalar_lea.vmem %s627_s15, 32  ;;  %p830_p1 = scmp.lt.s32.totalorder %s627_s15, %s627_s15 }
  0x5e   :  { %476 = vmatpush1.bf16.msra.mxu0 %v816_v62  ;;  %p826_p0 = scmp.ne.s32.totalorder %s627_s15, %s825_s16  ;;  %p831_p2 = scmp.lt.s32.totalorder %s825_s16, %s825_s16 }
  0x60   :  { %763 = vmatpush3.bf16.msra.mxu1 %v820_v5  ;;  %p832_p3 = por %p831_p2, %p830_p1 }
  0x61   :  { %486 = vmatmul.mubr.bf16.vlgmr.msra.gmra.mrb[4].mxu0 %v375_v0  ;;  %764 = vmatprep.subr.bf16.mxu1 %v874_v3 }
  0x62   :  { %p833_p4 = pnand %p832_p3, %p826_p0 }
  0x64   :  { %765 = vmatpush3.bf16.msra.mxu1 %v821_v6 }
  0x65   :  { %766 = vmatprep.subr.bf16.mxu1 %v874_v3 }
  0x68   :  { %767 = vmatpush3.bf16.msra.mxu1 %v822_v7 }
  0x69   :  { %768 = vmatprep.subr.bf16.mxu1 %v874_v3 }
  0x6c   :  { %769 = vmatpush3.bf16.msra.mxu1 %v823_v8 }
  0x6d   :  { %770 = vmatprep.subr.bf16.mxu1 %v874_v3 }
  0x70   :  { %771 = vmatpush3.bf16.msra.mxu1 %v824_v9 }
 0x104   :  { %v216_v10 = vpop.f32.mrb[0].mxu0 }
 0x105   :  { %v218_v11 = vpop.f32.mrb[1].mxu0  ;;  %v338_v12 = vpop.f32.mrb[0].mxu1 }
 0x106   :  { %v339_v13 = vadd.f32 %v338_v12, %v216_v10  ;;  %v219_v14 = vpop.f32.mrb[2].mxu0  ;;  %v340_v15 = vpop.f32.mrb[1].mxu1 }
 0x107   :  { %v220_v16 = vpop.f32.mrb[3].mxu0  ;;  %v341_v17 = vpop.f32.mrb[2].mxu1 }
 0x108   :  { %v342_v18 = vpop.f32.mrb[3].mxu1 }
 0x134   :  { %v487_v19 = vpop.f32.mrb[4].mxu0 }
 0x135   :  { %v493_v21 = vadd.f32 %v487_v19, %v339_v13  ;;  %v489_v22 = vpop.f32.mrb[5].mxu0 }
 0x136   :  { %v490_v23 = vpop.f32.mrb[6].mxu0 }
 0x137   :  { %v501_v24 = vadd.f32 %v737_v20, %v493_v21  ;;  %v491_v25 = vpop.f32.mrb[7].mxu0 }
 0x139   :  { %vm502_vm3 = vcmp.gt.f32.partialorder %v501_v24, 0.0  ;;  %v503_v26 = vmul.f32 0.01, %v501_v24 }
 0x13b   :  { %v504_v27 = vsel %vm502_vm3, %v501_v24, %v503_v26 }
 0x13c   :  { %505 = vst [vmem:[#allocation2] sm:$0x3] %v504_v27  ;;  %v506_v28 = vpack.c.bf16 %v504_v27, %v504_v27 }
 0x13e   :  { %773 = vmatmul.mubr.bf16.vlgmr.msra.gmra.mrb[4].mxu1 %v506_v28 }
 0x13f   :  { %836 = shalt.err (!%p833_p4)
}
 0x140   :  { %s837_s18 = scalar_lea.hbm %s1141_s5, 32 }
 0x141   :  { %p838_p5 = scmp.ne.s32.totalorder %s1141_s5, %s837_s18  ;;  %p841_p6 = scmp.lt.u32.totalorder %s837_s18, %s1141_s5 }
 0x143   :  { %p843_p7 = pnand %p841_p6, %p838_p5 }
 0x145   :  { %846 = shalt.err (!%p843_p7)
}
 0x146   :  { %629 = dma.vmem_to_hbm [thread:$0]  %s627_s15, 32, %s1141_s5, [#allocation3]   ;;  %v738_v29 = vld [vmem:[%s1140_s4] ss:$0 sm:$0xff]  ;;  %vm618_vm4 = vcmask 74752  }
 0x147   :  { %s877_s1 = smov [#allocation4]  }
 0x148   :  { %s636_s27 = sshll.u32 %s877_s1, 4  ;;  %s637_s27 = int_to_ptr.vmem [resolvable:$true] %s636_s27 }
 0x149   :  { %s847_s28 = scalar_lea.vmem %s637_s27, 32  ;;  %p852_p9 = scmp.lt.s32.totalorder %s637_s27, %s637_s27 }
 0x14a   :  { %p848_p8 = scmp.ne.s32.totalorder %s637_s27, %s847_s28  ;;  %p853_p10 = scmp.lt.s32.totalorder %s847_s28, %s847_s28 }
 0x14c   :  { %p854_p11 = por %p853_p10, %p852_p9 }
 0x14e   :  { %p855_p12 = pnand %p854_p11, %p848_p8 }
 0x211   :  { %v612_v30 = vpop.f32.mrb[4].mxu1 }
 0x212   :  { %v613_v31 = vadd.f32 %v738_v29, %v612_v30  ;;  %v774_v32 = vpop.f32.mrb[5].mxu1 }
 0x213   :  { %v615_v33 = vpop.f32.mrb[6].mxu1 }
 0x214   :  { %v775_v34 = vpop.f32.mrb[7].mxu1  ;;  %619 = vst.msk [vmem:[#allocation4] sm:$0x3] %vm618_vm4, %v613_v31 }
 0x215   :  { %858 = shalt.err (!%p855_p12)
}
 0x216   :  { %s859_s4 = scalar_lea.hbm %s1142_s6, 32 }
 0x217   :  { %p860_p13 = scmp.ne.s32.totalorder %s1142_s6, %s859_s4  ;;  %p863_p0 = scmp.lt.u32.totalorder %s859_s4, %s1142_s6 }
 0x219   :  { %p865_p1 = pnand %p863_p0, %p860_p13 }
 0x21b   :  { %868 = shalt.err (!%p865_p1)
}
 0x21c   :  { %639 = dma.vmem_to_hbm [thread:$0]  %s637_s27, 32, %s1142_s6, [#allocation5]  }
 0x21d   :  { %869 = dma.done.wait [#allocation3], 32  }
 0x21e   :  { %870 = vsyncadd [#allocation3], 4294967264 }
 0x21f   :  { %871 = dma.done.wait [#allocation5], 32  }
 0x220   :  { %872 = vsyncadd [#allocation5], 4294967264 }
 0x221   :  { %646 = vsyncpa [#allocation3], 1 }
 0x222   :  { %647 = vsyncpa [#allocation5], 1 }

// kernel: cifar_cnn_forward.4
= control target key start
LH: loop header
LB: loop body
LE: loop exit
PB: predicated region body
PF: predicated region fallthrough
CT: control target
= control target key end

     0   :  { %8 = vsyncpa [#allocation3], 0  ;;  %s2825_s12 = smov 0   ;;  %s3160_s0 = inlined_call_operand.vmem [shape: bf16[2,32,96], index: 0, kind: input, shape index: {}]   ;;  %s3161_s1 = inlined_call_operand.hbm [shape: bf16[5,96,448], index: 1, kind: input, shape index: {}]   ;;  %s3162_s2 = inlined_call_operand.vmem [shape: f32[1,448], index: 2, kind: input, shape index: {}]   ;;  %s3163_s3 = inlined_call_operand.vmem [shape: bf16[2,16,256], index: 3, kind: output, shape index: {}]  }
   0x1 LB: > { %s2831_s13 = sadd.s32 4294967295, %s2796_s12   ;;  %p2290_p0 = scmp.ge.s32.totalorder %s2796_s12, 1  ;;  %s2796_s12 = sphi %s2825_s12, %s14_s12  }
   0x2   : > { %p113_p1 = scmp.lt.s32.totalorder %s2796_s12, 3  ;;  %s2798_s14 = smov [#allocation2]  }
   0x3   : > { %s125_s15 = sshll.u32 %s2798_s14, 4  ;;  %p3164_p3 = scmp.eq.s32.totalorder %s2831_s13, 0  ;;  %s126_s15 = int_to_ptr.vmem [resolvable:$true] %s125_s15 }
   0x4   : > { %p2835_p2 = pnand %p2290_p0, %p113_p1  ;;  %s2758_s20 = scalar_lea.hbm %s3161_s1, 15360 }
   0x5   : > { %p2759_p6 = scmp.ne.s32.totalorder %s3161_s1, %s2758_s20  ;;  %p2765_p10 = scmp.lt.u32.totalorder %s2758_s20, %s3161_s1 }
   0x6   : > { %s3166_s16 = scalar_select %p2835_p2, 1, 0 }
   0x7   : > { %p2555_p4 = pneg %p2835_p2 }
   0x9   : > { %p2844_p5 = pnand %p3164_p3, %p2555_p4 }
   0xb   : > { %p2760_p7 = pneg %p2844_p5 }
   0xd   : > { %p2761_p8 = pnand %p2760_p7, %p2759_p6 }
   0xf   : > { %p2762_p9 = pneg %p2761_p8 }
  0x11   : > { %p2767_p11 = pnand %p2765_p10, %p2762_p9 }
  0x13   : > { %2770 = shalt.err (!%p2767_p11)
}
  0x14   : > { %s2771_s25 = scalar_lea.vmem %s126_s15, 15360  ;;  %p2779_p1 = scmp.lt.s32.totalorder %s126_s15, %s126_s15 }
  0x15   : > { %p2772_p12 = scmp.ne.s32.totalorder %s126_s15, %s2771_s25  ;;  %p2780_p4 = scmp.lt.s32.totalorder %s2771_s25, %s2771_s25 }
  0x17   : > { %p2774_p13 = pnand %p2772_p12, %p2760_p7  ;;  %p2781_p3 = por %p2780_p4, %p2779_p1 }
  0x19   : > { %p2775_p0 = pneg %p2774_p13 }
  0x1b   : > { %p2782_p2 = pnand %p2781_p3, %p2775_p0 }
  0x1d   : > { %2785 = shalt.err (!%p2782_p2)
}
  0x1e   : > { %s2799_s26 = smov 256   ;;  %s2800_s27 = smov 16  }
  0x1f   : > { %2558 = dma.hbm_to_vmem [thread:$0]  (!%p2844_p5), %s3161_s1, 15360, %s126_s15, [#allocation3], %s2799_s26, %s2799_s26, %s2800_s27  }
  0x20   : > { %p3168_p6 = scmp.ne.s32.totalorder %s3166_s16, 0 }
  0x21   : > { %p3169_p8 = scmp.eq.s32.totalorder (!%p3168_p6), %s2831_s13, 0 }
  0x22   : > { %152 = sbr.rel (%p3168_p6) target bundleno = 677 (0x2a5), region = 32 }
  0x29   : > { %2791 = dma.done.wait (%p3169_p8), [#allocation3], 15360   ;;  %p3170_p7 = pmov %p3169_p8 }
  0x2a   : > { %v2801_v0 = vmov 0   ;;  %v2576_v1 = vld [vmem:[#allocation2 + $0xc4] ss:$16 sps:$4 sm:$0xff]   ;;  %v2578_v2 = vld [vmem:[#allocation2 + $0xcc] ss:$16 sps:$4 sm:$0xff]   ;;  %p176_p2 = scmp.lt.s32.totalorder %s2831_s13, 1 }
  0x2b   : > { %2793 = vsyncadd (%p3170_p7), [#allocation3], 4294951936  ;;  %425 = vmatprep.mubr.bf16.mxu0 %v2801_v0  ;;  %478 = vmatprep.mubr.bf16.mxu1 %v2801_v0  ;;  %v2580_v3 = vld [vmem:[#allocation2 + $0xc0] ss:$16 sps:$4 sm:$0xff]   ;;  %v2581_v4 = vld [vmem:[#allocation2 + $0xc8] ss:$16 sps:$4 sm:$0xff]  }
  0x2c   : > { %393 = vmatprep.subr.bf16.mxu0 %v2576_v1  ;;  %446 = vmatprep.subr.bf16.mxu1 %v2578_v2  ;;  %v2582_v5 = vld [vmem:[#allocation2 + $0xe4] ss:$16 sps:$4 sm:$0xff]   ;;  %v2584_v6 = vld [vmem:[#allocation2 + $0xec] ss:$16 sps:$4 sm:$0xff]   ;;  %v2586_v7 = vld [vmem:[#allocation2 + $0xe0] ss:$16 sps:$4 sm:$0xff]  }
  0x2d   : > { %394 = vmatpush1.bf16.msra.mxu0 %v2580_v3  ;;  %447 = vmatpush1.bf16.msra.mxu1 %v2581_v4  ;;  %v2587_v8 = vld [vmem:[#allocation2 + $0xe8] ss:$16 sps:$4 sm:$0xff]   ;;  %v2588_v9 = vld [vmem:[#allocation2 + $0x104] ss:$16 sps:$4 sm:$0xff]   ;;  %v2590_v10 = vld [vmem:[#allocation2 + $0x10c] ss:$16 sps:$4 sm:$0xff]  }
  0x2e   : > { %395 = vmatprep.subr.bf16.mxu0 %v2582_v5  ;;  %448 = vmatprep.subr.bf16.mxu1 %v2584_v6  ;;  %v2592_v11 = vld [vmem:[#allocation2 + $0x100] ss:$16 sps:$4 sm:$0xff]   ;;  %v2593_v12 = vld [vmem:[#allocation2 + $0x108] ss:$16 sps:$4 sm:$0xff]   ;;  %v2594_v13 = vld [vmem:[#allocation2 + $0x124] ss:$16 sps:$4 sm:$0xff]  }
  0x2f   : > { %v2596_v14 = vld [vmem:[#allocation2 + $0x12c] ss:$16 sps:$4 sm:$0xff]   ;;  %s3172_s13 = smov (!%p176_p2, %s2831_s13), 1  ;;  %v2598_v15 = vld [vmem:[#allocation2 + $0x120] ss:$16 sps:$4 sm:$0xff]   ;;  %vm386_vm2 = vcmask 785408  }
  0x30   : > { %v2599_v16 = vld [vmem:[#allocation2 + $0x128] ss:$16 sps:$4 sm:$0xff]   ;;  %v2600_v17 = vld [vmem:[#allocation2 + $0x144] ss:$16 sps:$4 sm:$0xff]   ;;  %v2602_v18 = vld [vmem:[#allocation2 + $0x14c] ss:$16 sps:$4 sm:$0xff]  }
  0x31   : > { %396 = vmatpush1.bf16.msra.mxu0 %v2586_v7  ;;  %449 = vmatpush1.bf16.msra.mxu1 %v2587_v8  ;;  %s2471_s30 = sshll.u32 %s3172_s13, 4  ;;  %v2604_v19 = vld [vmem:[#allocation2 + $0x140] ss:$16 sps:$4 sm:$0xff]   ;;  %v2605_v20 = vld [vmem:[#allocation2 + $0x148] ss:$16 sps:$4 sm:$0xff]   ;;  %vm1312_vm3 = vcmask 1045504  }
  0x32   : > { %397 = vmatprep.subr.bf16.mxu0 %v2588_v9  ;;  %450 = vmatprep.subr.bf16.mxu1 %v2590_v10  ;;  %v2606_v21 = vld [vmem:[#allocation2 + $0x164] ss:$16 sps:$4 sm:$0xff]   ;;  %v2608_v22 = vld [vmem:[#allocation2 + $0x16c] ss:$16 sps:$4 sm:$0xff]   ;;  %s180_s6 = scalar_lea.vmem %s3160_s0, %s2471_s30  ;;  %v2610_v23 = vld [vmem:[#allocation2 + $0x160] ss:$16 sps:$4 sm:$0xff]   ;;  %s185_s15 = scalar_lea.vmem %s3163_s3, %s2471_s30 }
  0x33   : > { %v2611_v24 = vld [vmem:[#allocation2 + $0x168] ss:$16 sps:$4 sm:$0xff]   ;;  %v2882_v25 = vld [vmem:[%s180_s6] sm:$0xff]   ;;  %v2617_v28 = vld [vmem:[#allocation2 + $0xc] ss:$16 sps:$4 sm:$0xff]   ;;  %vm754_vm4 = vcmask 1046528  }
  0x34   : > { %v2884_v26 = vld [vmem:[%s180_s6 + $0x8] sm:$0xff]   ;;  %v2614_v27 = vld [vmem:[#allocation2 + $0x4] ss:$16 sps:$4 sm:$0xff]   ;;  %v252_v29 = vshrl.u32 %v2882_v25, 16  ;;  %v254_v30 = vshll.u32 %v2882_v25, 16  ;;  %v1313_v47 = vrot.slane %v2882_v25, 2 }
  0x35   : > { %398 = vmatpush1.bf16.msra.mxu0 %v2592_v11  ;;  %451 = vmatpush1.bf16.msra.mxu1 %v2593_v12  ;;  %v259_v31 = vshll.u32 %v2884_v26, 16  ;;  %vm250_vm0 = vsmask.f32 7424  ;;  %v263_v32 = vshrl.u32 %v2884_v26, 16  ;;  %vm1031_vm1 = vsmask.f32 6400 }
  0x36   : > { %399 = vmatprep.subr.bf16.mxu0 %v2594_v13  ;;  %452 = vmatprep.subr.bf16.mxu1 %v2596_v14  ;;  %v256_v33 = vrot.slane %v254_v30, 1  ;;  %v1032_v35 = vrot.slane %v252_v29, 1  ;;  %v1033_v36 = vrot.slane %v254_v30, 2  ;;  %v2612_v39 = vld [vmem:[#allocation2] ss:$16 sps:$4 sm:$0xff]   ;;  %v2895_v48 = vrot.slane %v2884_v26, 2 }
  0x37   : > { %v261_v34 = vrot.slane %v259_v31, 1  ;;  %v1036_v37 = vrot.slane %v259_v31, 2  ;;  %v1035_v38 = vrot.slane %v263_v32, 1  ;;  %v2615_v40 = vld [vmem:[#allocation2 + $0x8] ss:$16 sps:$4 sm:$0xff]   ;;  %v755_v31 = vrot.slane %v2882_v25, 1 }
  0x38   : > { %v257_v41 = vor.u32 %v256_v33, %v252_v29  ;;  %v1034_v42 = vor.u32 %v1033_v36, %v1032_v35  ;;  %v2622_v43 = vld [vmem:[#allocation2 + $0x24] ss:$16 sps:$4 sm:$0xff]   ;;  %v2625_v44 = vld [vmem:[#allocation2 + $0x2c] ss:$16 sps:$4 sm:$0xff]   ;;  %v2620_v50 = vld [vmem:[#allocation2 + $0x20] ss:$16 sps:$4 sm:$0xff]   ;;  %v2903_v52 = vsel %vm1312_vm3, %v1313_v47, %v2895_v48 }
  0x39   : > { %400 = vmatpush1.bf16.msra.mxu0 %v2598_v15  ;;  %453 = vmatpush1.bf16.msra.mxu1 %v2599_v16  ;;  %v2890_v45 = vor.u32 %v1036_v37, %v1035_v38  ;;  %v2623_v51 = vld [vmem:[#allocation2 + $0x28] ss:$16 sps:$4 sm:$0xff]   ;;  %v2628_v53 = vld [vmem:[#allocation2 + $0x44] ss:$16 sps:$4 sm:$0xff]   ;;  %v2631_v54 = vld [vmem:[#allocation2 + $0x4c] ss:$16 sps:$4 sm:$0xff]   ;;  %v265_v55 = vor.u32 %v263_v32, %v261_v34 }
  0x3a   : > { %401 = vmatprep.subr.bf16.mxu0 %v2600_v17  ;;  %454 = vmatprep.subr.bf16.mxu1 %v2602_v18  ;;  %v262_v46 = vsel %vm250_vm0, %v257_v41, %v261_v34  ;;  %v2626_v56 = vld [vmem:[#allocation2 + $0x40] ss:$16 sps:$4 sm:$0xff]   ;;  %v2629_v57 = vld [vmem:[#allocation2 + $0x48] ss:$16 sps:$4 sm:$0xff]   ;;  %v2634_v58 = vld [vmem:[#allocation2 + $0x64] ss:$16 sps:$4 sm:$0xff]  }
  0x3b   : > { %v2900_v49 = vsel %vm1031_vm1, %v1034_v42, %v2890_v45  ;;  %v2637_v59 = vld [vmem:[#allocation2 + $0x6c] ss:$16 sps:$4 sm:$0xff]   ;;  %v2632_v60 = vld [vmem:[#allocation2 + $0x60] ss:$16 sps:$4 sm:$0xff]   ;;  %v2635_v61 = vld [vmem:[#allocation2 + $0x68] ss:$16 sps:$4 sm:$0xff]  }
  0x3c   : > { %v2640_v62 = vld [vmem:[#allocation2 + $0x84] ss:$16 sps:$4 sm:$0xff]   ;;  %v2643_v63 = vld [vmem:[#allocation2 + $0x8c] ss:$16 sps:$4 sm:$0xff]   ;;  %v2638_v1 = vld [vmem:[#allocation2 + $0x80] ss:$16 sps:$4 sm:$0xff]  }
  0x3d   : > { %402 = vmatpush1.bf16.msra.mxu0 %v2604_v19  ;;  %455 = vmatpush1.bf16.msra.mxu1 %v2605_v20  ;;  %v2641_v2 = vld [vmem:[#allocation2 + $0x88] ss:$16 sps:$4 sm:$0xff]   ;;  %v2646_v3 = vld [vmem:[#allocation2 + $0xa4] ss:$16 sps:$4 sm:$0xff]   ;;  %v2649_v4 = vld [vmem:[#allocation2 + $0xac] ss:$16 sps:$4 sm:$0xff]  }
  0x3e   : > { %403 = vmatprep.subr.bf16.mxu0 %v2606_v21  ;;  %456 = vmatprep.subr.bf16.mxu1 %v2608_v22  ;;  %v2644_v5 = vld [vmem:[#allocation2 + $0xa0] ss:$16 sps:$4 sm:$0xff]   ;;  %v2647_v6 = vld [vmem:[#allocation2 + $0xa8] ss:$16 sps:$4 sm:$0xff]   ;;  %v2652_v7 = vld [vmem:[#allocation2 + $0x184] ss:$16 sps:$4 sm:$0xff]  }
  0x3f   : > { %v2655_v8 = vld [vmem:[#allocation2 + $0x18c] ss:$16 sps:$4 sm:$0xff]   ;;  %v2650_v9 = vld [vmem:[#allocation2 + $0x180] ss:$16 sps:$4 sm:$0xff]   ;;  %v2653_v10 = vld [vmem:[#allocation2 + $0x188] ss:$16 sps:$4 sm:$0xff]  }
  0x40   : > { %v2658_v11 = vld [vmem:[#allocation2 + $0x1a4] ss:$16 sps:$4 sm:$0xff]   ;;  %v2661_v12 = vld [vmem:[#allocation2 + $0x1ac] ss:$16 sps:$4 sm:$0xff]   ;;  %v2656_v13 = vld [vmem:[#allocation2 + $0x1a0] ss:$16 sps:$4 sm:$0xff]  }
  0x41   : > { %404 = vmatpush1.bf16.msra.mxu0 %v2610_v23  ;;  %457 = vmatpush1.bf16.msra.mxu1 %v2611_v24  ;;  %v2659_v14 = vld [vmem:[#allocation2 + $0x1a8] ss:$16 sps:$4 sm:$0xff]   ;;  %v2664_v15 = vld [vmem:[#allocation2 + $0x1c4] ss:$16 sps:$4 sm:$0xff]   ;;  %v2667_v16 = vld [vmem:[#allocation2 + $0x1cc] ss:$16 sps:$4 sm:$0xff]  }
  0x42   : > { %623 = vmatprep.subr.bf16.mxu0 %v2614_v27  ;;  %676 = vmatprep.subr.bf16.mxu1 %v2617_v28  ;;  %v2662_v17 = vld [vmem:[#allocation2 + $0x1c0] ss:$16 sps:$4 sm:$0xff]   ;;  %v2665_v18 = vld [vmem:[#allocation2 + $0x1c8] ss:$16 sps:$4 sm:$0xff]   ;;  %v2670_v19 = vld [vmem:[#allocation2 + $0x1e4] ss:$16 sps:$4 sm:$0xff]  }
  0x43   : > { %v2673_v20 = vld [vmem:[#allocation2 + $0x1ec] ss:$16 sps:$4 sm:$0xff]   ;;  %v2668_v21 = vld [vmem:[#allocation2 + $0x1e0] ss:$16 sps:$4 sm:$0xff]   ;;  %v2671_v22 = vld [vmem:[#allocation2 + $0x1e8] ss:$16 sps:$4 sm:$0xff]  }
  0x44   : > { %2325 = vmatmul.mubr.msk.bf16.vlgmr.msra.gmra.mrb[0].mxu0 %vm386_vm2, %v262_v46  ;;  %2327 = vmatmul.mubr.msk.bf16.vlgmr.msra.gmra.mrb[0].mxu1 %vm386_vm2, %v262_v46  ;;  %v2676_v23 = vld [vmem:[#allocation2 + $0x204] ss:$16 sps:$4 sm:$0xff]   ;;  %v2679_v24 = vld [vmem:[#allocation2 + $0x20c] ss:$16 sps:$4 sm:$0xff]   ;;  %v2674_v27 = vld [vmem:[#allocation2 + $0x200] ss:$16 sps:$4 sm:$0xff]  }
  0x45   : > { %624 = vmatpush1.bf16.msra.mxu0 %v2612_v39  ;;  %677 = vmatpush1.bf16.msra.mxu1 %v2615_v40  ;;  %v2677_v28 = vld [vmem:[#allocation2 + $0x208] ss:$16 sps:$4 sm:$0xff]   ;;  %v2682_v29 = vld [vmem:[#allocation2 + $0x224] ss:$16 sps:$4 sm:$0xff]   ;;  %v2685_v30 = vld [vmem:[#allocation2 + $0x22c] ss:$16 sps:$4 sm:$0xff]  }
  0x46   : > { %625 = vmatprep.subr.bf16.mxu0 %v2622_v43  ;;  %678 = vmatprep.subr.bf16.mxu1 %v2625_v44  ;;  %v2680_v32 = vld [vmem:[#allocation2 + $0x220] ss:$16 sps:$4 sm:$0xff]   ;;  %v2683_v33 = vld [vmem:[#allocation2 + $0x228] ss:$16 sps:$4 sm:$0xff]   ;;  %v756_v34 = vrot.slane %v2884_v26, 1  ;;  %s2802_s9 = smov 32  }
  0x47   : > { %435 = vmatprep.mubr.bf16.mxu0 %v2801_v0  ;;  %488 = vmatprep.mubr.bf16.mxu1 %v2801_v0  ;;  %v2688_v35 = vld [vmem:[#allocation2 + $0x244] ss:$16 sps:$4 sm:$0xff]   ;;  %v2691_v36 = vld [vmem:[#allocation2 + $0x24c] ss:$16 sps:$4 sm:$0xff]   ;;  %v2686_v37 = vld [vmem:[#allocation2 + $0x240] ss:$16 sps:$4 sm:$0xff]  }
  0x48   : > { %v2689_v38 = vld [vmem:[#allocation2 + $0x248] ss:$16 sps:$4 sm:$0xff]   ;;  %v757_v39 = vsel %vm754_vm4, %v755_v31, %v756_v34  ;;  %v2694_v40 = vld [vmem:[#allocation2 + $0x264] ss:$16 sps:$4 sm:$0xff]   ;;  %v2703_v43 = vld [vmem:[#allocation2 + $0x28c] ss:$16 sps:$4 sm:$0xff]  }
  0x49   : > { %626 = vmatpush1.bf16.msra.mxu0 %v2620_v50  ;;  %679 = vmatpush1.bf16.msra.mxu1 %v2623_v51  ;;  %v2695_v41 = vld [vmem:[#allocation2 + $0x268] ss:$16 sps:$4 sm:$0xff]   ;;  %v2700_v42 = vld [vmem:[#allocation2 + $0x284] ss:$16 sps:$4 sm:$0xff]   ;;  %v2698_v44 = vld [vmem:[#allocation2 + $0x280] ss:$16 sps:$4 sm:$0xff]  }
  0x4a   : > { %627 = vmatprep.subr.bf16.mxu0 %v2628_v53  ;;  %680 = vmatprep.subr.bf16.mxu1 %v2631_v54  ;;  %v2701_v46 = vld [vmem:[#allocation2 + $0x288] ss:$16 sps:$4 sm:$0xff]   ;;  %v2706_v47 = vld [vmem:[#allocation2 + $0x2a4] ss:$16 sps:$4 sm:$0xff]   ;;  %v2709_v50 = vld [vmem:[#allocation2 + $0x2ac] ss:$16 sps:$4 sm:$0xff]  }
  0x4b   : > { %v2704_v51 = vld [vmem:[#allocation2 + $0x2a0] ss:$16 sps:$4 sm:$0xff]   ;;  %v2707_v53 = vld [vmem:[#allocation2 + $0x2a8] ss:$16 sps:$4 sm:$0xff]   ;;  %v2712_v54 = vld [vmem:[#allocation2 + $0x2c4] ss:$16 sps:$4 sm:$0xff]  }
  0x4c   : > { %2326 = vmatmul.mubr.msk.bf16.gmra.mrb[4].mxu0 %vm386_vm2, %v265_v55  ;;  %2328 = vmatmul.mubr.msk.bf16.gmra.mrb[4].mxu1 %vm386_vm2, %v265_v55  ;;  %v2715_v55 = vld [vmem:[#allocation2 + $0x2cc] ss:$16 sps:$4 sm:$0xff]   ;;  %s2804_s10 = smov 16  }
  0x4d   : > { %628 = vmatpush1.bf16.msra.mxu0 %v2626_v56  ;;  %681 = vmatpush1.bf16.msra.mxu1 %v2629_v57  ;;  %v2710_v56 = vld [vmem:[#allocation2 + $0x2c0] ss:$16 sps:$4 sm:$0xff]   ;;  %v2713_v57 = vld [vmem:[#allocation2 + $0x2c8] ss:$16 sps:$4 sm:$0xff]  }
  0x4e   : > { %629 = vmatprep.subr.bf16.mxu0 %v2634_v58  ;;  %682 = vmatprep.subr.bf16.mxu1 %v2637_v59  ;;  %v2718_v58 = vld [vmem:[#allocation2 + $0x2e4] ss:$16 sps:$4 sm:$0xff]   ;;  %v2721_v59 = vld [vmem:[#allocation2 + $0x2ec] ss:$16 sps:$4 sm:$0xff]  }
  0x4f   : > { %655 = vmatprep.mubr.bf16.mxu0 %v2801_v0  ;;  %708 = vmatprep.mubr.bf16.mxu1 %v2801_v0 }
  0x51   : > { %630 = vmatpush1.bf16.msra.mxu0 %v2632_v60  ;;  %683 = vmatpush1.bf16.msra.mxu1 %v2635_v61  ;;  %v2716_v60 = vld [vmem:[#allocation2 + $0x2e0] ss:$16 sps:$4 sm:$0xff]   ;;  %v2719_v61 = vld [vmem:[#allocation2 + $0x2e8] ss:$16 sps:$4 sm:$0xff]  }
  0x52   : > { %631 = vmatprep.subr.bf16.mxu0 %v2640_v62  ;;  %684 = vmatprep.subr.bf16.mxu1 %v2643_v63  ;;  %v2724_v62 = vld [vmem:[#allocation2 + $0x304] ss:$16 sps:$4 sm:$0xff]   ;;  %v2727_v63 = vld [vmem:[#allocation2 + $0x30c] ss:$16 sps:$4 sm:$0xff]  }
  0x55   : > { %632 = vmatpush1.bf16.msra.mxu0 %v2638_v1  ;;  %685 = vmatpush1.bf16.msra.mxu1 %v2641_v2  ;;  %v2722_v1 = vld [vmem:[#allocation2 + $0x300] ss:$16 sps:$4 sm:$0xff]   ;;  %v2725_v2 = vld [vmem:[#allocation2 + $0x308] ss:$16 sps:$4 sm:$0xff]  }
  0x56   : > { %633 = vmatprep.subr.bf16.mxu0 %v2646_v3  ;;  %686 = vmatprep.subr.bf16.mxu1 %v2649_v4  ;;  %v2730_v3 = vld [vmem:[#allocation2 + $0x324] ss:$16 sps:$4 sm:$0xff]   ;;  %v2733_v4 = vld [vmem:[#allocation2 + $0x32c] ss:$16 sps:$4 sm:$0xff]  }
  0x59   : > { %634 = vmatpush1.bf16.msra.mxu0 %v2644_v5  ;;  %687 = vmatpush1.bf16.msra.mxu1 %v2647_v6  ;;  %v2728_v5 = vld [vmem:[#allocation2 + $0x320] ss:$16 sps:$4 sm:$0xff]   ;;  %v2731_v6 = vld [vmem:[#allocation2 + $0x328] ss:$16 sps:$4 sm:$0xff]  }
  0x5a   : > { %884 = vmatprep.subr.bf16.mxu0 %v2652_v7  ;;  %937 = vmatprep.subr.bf16.mxu1 %v2655_v8  ;;  %v2736_v7 = vld [vmem:[#allocation2 + $0x344] ss:$16 sps:$4 sm:$0xff]   ;;  %v2739_v8 = vld [vmem:[#allocation2 + $0x34c] ss:$16 sps:$4 sm:$0xff]  }
  0x5c   : > { %2353 = vmatmul.mubr.msk.bf16.vlgmr.msra.gmra.mrb[0].mxu0 %vm386_vm2, %v2882_v25  ;;  %2355 = vmatmul.mubr.msk.bf16.vlgmr.msra.gmra.mrb[0].mxu1 %vm386_vm2, %v2882_v25  ;;  %v2697_v25 = vld [vmem:[#allocation2 + $0x26c] ss:$16 sps:$4 sm:$0xff]  }
  0x5d   : > { %885 = vmatpush1.bf16.msra.mxu0 %v2650_v9  ;;  %938 = vmatpush1.bf16.msra.mxu1 %v2653_v10  ;;  %v2734_v9 = vld [vmem:[#allocation2 + $0x340] ss:$16 sps:$4 sm:$0xff]   ;;  %v2737_v10 = vld [vmem:[#allocation2 + $0x348] ss:$16 sps:$4 sm:$0xff]  }
  0x5e   : > { %886 = vmatprep.subr.bf16.mxu0 %v2658_v11  ;;  %939 = vmatprep.subr.bf16.mxu1 %v2661_v12  ;;  %v2742_v11 = vld [vmem:[#allocation2 + $0x364] ss:$16 sps:$4 sm:$0xff]   ;;  %v2740_v12 = vld [vmem:[#allocation2 + $0x360] ss:$16 sps:$4 sm:$0xff]  }
  0x5f   : > { %665 = vmatprep.mubr.bf16.mxu0 %v2801_v0  ;;  %718 = vmatprep.mubr.bf16.mxu1 %v2801_v0 }
  0x61   : > { %887 = vmatpush1.bf16.msra.mxu0 %v2656_v13  ;;  %940 = vmatpush1.bf16.msra.mxu1 %v2659_v14  ;;  %v2743_v13 = vld [vmem:[#allocation2 + $0x368] ss:$16 sps:$4 sm:$0xff]   ;;  %v2748_v14 = vld [vmem:[#allocation2 + $0x384] ss:$16 sps:$4 sm:$0xff]  }
  0x62   : > { %888 = vmatprep.subr.bf16.mxu0 %v2664_v15  ;;  %941 = vmatprep.subr.bf16.mxu1 %v2667_v16  ;;  %v2751_v15 = vld [vmem:[#allocation2 + $0x38c] ss:$16 sps:$4 sm:$0xff]   ;;  %v2746_v16 = vld [vmem:[#allocation2 + $0x380] ss:$16 sps:$4 sm:$0xff]  }
  0x64   : > { %2354 = vmatmul.mubr.msk.bf16.gmra.mrb[4].mxu0 %vm386_vm2, %v2884_v26  ;;  %2356 = vmatmul.mubr.msk.bf16.gmra.mrb[4].mxu1 %vm386_vm2, %v2884_v26  ;;  %v2692_v26 = vld [vmem:[#allocation2 + $0x260] ss:$16 sps:$4 sm:$0xff]  }
  0x65   : > { %889 = vmatpush1.bf16.msra.mxu0 %v2662_v17  ;;  %942 = vmatpush1.bf16.msra.mxu1 %v2665_v18  ;;  %v2749_v17 = vld [vmem:[#allocation2 + $0x388] ss:$16 sps:$4 sm:$0xff]   ;;  %v2754_v18 = vld [vmem:[#allocation2 + $0x3a4] ss:$16 sps:$4 sm:$0xff]  }
  0x66   : > { %890 = vmatprep.subr.bf16.mxu0 %v2670_v19  ;;  %943 = vmatprep.subr.bf16.mxu1 %v2673_v20  ;;  %v2752_v19 = vld [vmem:[#allocation2 + $0x3a0] ss:$16 sps:$4 sm:$0xff]   ;;  %v2755_v20 = vld [vmem:[#allocation2 + $0x3a8] ss:$16 sps:$4 sm:$0xff]  }
  0x67   : > { %916 = vmatprep.mubr.bf16.mxu0 %v2801_v0  ;;  %969 = vmatprep.mubr.bf16.mxu1 %v2801_v0 }
  0x69   : > { %891 = vmatpush1.bf16.msra.mxu0 %v2668_v21  ;;  %944 = vmatpush1.bf16.msra.mxu1 %v2671_v22  ;;  %v1566_v21 = vlaneseq }
  0x6a   : > { %892 = vmatprep.subr.bf16.mxu0 %v2676_v23  ;;  %945 = vmatprep.subr.bf16.mxu1 %v2679_v24 }
  0x6b   : > { %v2955_v22 = vshrl.u32 %v1566_v21, 7 }
  0x6d   : > { %893 = vmatpush1.bf16.msra.mxu0 %v2674_v27  ;;  %946 = vmatpush1.bf16.msra.mxu1 %v2677_v28  ;;  %v2958_v23 = vsub.s32 0, %v2955_v22  ;;  %v2961_v24 = vsub.s32 2, %v2955_v22  ;;  %v1572_v27 = vsub.s32 1, %v2955_v22 }
  0x6e   : > { %894 = vmatprep.subr.bf16.mxu0 %v2682_v29  ;;  %947 = vmatprep.subr.bf16.mxu1 %v2685_v30 }
  0x71   : > { %895 = vmatpush1.bf16.msra.mxu0 %v2680_v32  ;;  %948 = vmatpush1.bf16.msra.mxu1 %v2683_v33 }
  0x72   : > { %1165 = vmatprep.subr.bf16.mxu0 %v2688_v35  ;;  %1218 = vmatprep.subr.bf16.mxu1 %v2691_v36 }
  0x74   : > { %2381 = vmatmul.mubr.msk.bf16.vlgmr.msra.gmra.mrb[0].mxu0 %vm386_vm2, %v757_v39  ;;  %2383 = vmatmul.mubr.msk.bf16.vlgmr.msra.gmra.mrb[0].mxu1 %vm386_vm2, %v757_v39 }
  0x75   : > { %1166 = vmatpush1.bf16.msra.mxu0 %v2686_v37  ;;  %1219 = vmatpush1.bf16.msra.mxu1 %v2689_v38 }
  0x76   : > { %1167 = vmatprep.subr.bf16.mxu0 %v2694_v40  ;;  %1220 = vmatprep.subr.bf16.mxu1 %v2697_v25 }
  0x77   : > { %926 = vmatprep.mubr.bf16.mxu0 %v2801_v0  ;;  %979 = vmatprep.mubr.bf16.mxu1 %v2801_v0 }
  0x79   : > { %1168 = vmatpush1.bf16.msra.mxu0 %v2692_v26  ;;  %1221 = vmatpush1.bf16.msra.mxu1 %v2695_v41 }
  0x7a   : > { %1169 = vmatprep.subr.bf16.mxu0 %v2700_v42  ;;  %1222 = vmatprep.subr.bf16.mxu1 %v2703_v43 }
  0x7c   : > { %2382 = vmatmul.mubr.msk.bf16.gmra.mrb[4].mxu0 %vm386_vm2, %v756_v34  ;;  %2384 = vmatmul.mubr.msk.bf16.gmra.mrb[4].mxu1 %vm386_vm2, %v756_v34 }
  0x7d   : > { %1170 = vmatpush1.bf16.msra.mxu0 %v2698_v44  ;;  %1223 = vmatpush1.bf16.msra.mxu1 %v2701_v46 }
  0x7e   : > { %1171 = vmatprep.subr.bf16.mxu0 %v2706_v47  ;;  %1224 = vmatprep.subr.bf16.mxu1 %v2709_v50 }
  0x7f   : > { %1197 = vmatprep.mubr.bf16.mxu0 %v2801_v0  ;;  %1250 = vmatprep.mubr.bf16.mxu1 %v2801_v0 }
  0x81   : > { %1172 = vmatpush1.bf16.msra.mxu0 %v2704_v51  ;;  %1225 = vmatpush1.bf16.msra.mxu1 %v2707_v53 }
  0x82   : > { %1173 = vmatprep.subr.bf16.mxu0 %v2712_v54  ;;  %1226 = vmatprep.subr.bf16.mxu1 %v2715_v55 }
  0x85   : > { %1174 = vmatpush1.bf16.msra.mxu0 %v2710_v56  ;;  %1227 = vmatpush1.bf16.msra.mxu1 %v2713_v57 }
  0x86   : > { %1175 = vmatprep.subr.bf16.mxu0 %v2718_v58  ;;  %1228 = vmatprep.subr.bf16.mxu1 %v2721_v59 }
  0x89   : > { %1176 = vmatpush1.bf16.msra.mxu0 %v2716_v60  ;;  %1229 = vmatpush1.bf16.msra.mxu1 %v2719_v61 }
  0x8a   : > { %1442 = vmatprep.subr.bf16.mxu0 %v2724_v62  ;;  %1495 = vmatprep.subr.bf16.mxu1 %v2727_v63 }
  0x8c   : > { %2409 = vmatmul.mubr.msk.bf16.vlgmr.msra.gmra.mrb[0].mxu0 %vm386_vm2, %v2900_v49  ;;  %2411 = vmatmul.mubr.msk.bf16.vlgmr.msra.gmra.mrb[0].mxu1 %vm386_vm2, %v2900_v49  ;;  %v2745_v49 = vld [vmem:[#allocation2 + $0x36c] ss:$16 sps:$4 sm:$0xff]  }
  0x8d   : > { %1443 = vmatpush1.bf16.msra.mxu0 %v2722_v1  ;;  %1496 = vmatpush1.bf16.msra.mxu1 %v2725_v2 }
  0x8e   : > { %1444 = vmatprep.subr.bf16.mxu0 %v2730_v3  ;;  %1497 = vmatprep.subr.bf16.mxu1 %v2733_v4 }
  0x8f   : > { %1207 = vmatprep.mubr.bf16.mxu0 %v2801_v0  ;;  %1260 = vmatprep.mubr.bf16.mxu1 %v2801_v0 }
  0x91   : > { %1445 = vmatpush1.bf16.msra.mxu0 %v2728_v5  ;;  %1498 = vmatpush1.bf16.msra.mxu1 %v2731_v6 }
  0x92   : > { %1446 = vmatprep.subr.bf16.mxu0 %v2736_v7  ;;  %1499 = vmatprep.subr.bf16.mxu1 %v2739_v8 }
  0x94   : > { %2410 = vmatmul.mubr.msk.bf16.gmra.mrb[4].mxu0 %vm386_vm2, %v2890_v45  ;;  %2412 = vmatmul.mubr.msk.bf16.gmra.mrb[4].mxu1 %vm386_vm2, %v2890_v45  ;;  %v2757_v45 = vld [vmem:[#allocation2 + $0x3ac] ss:$16 sps:$4 sm:$0xff]  }
  0x95   : > { %1447 = vmatpush1.bf16.msra.mxu0 %v2734_v9  ;;  %1500 = vmatpush1.bf16.msra.mxu1 %v2737_v10 }
  0x96   : > { %1448 = vmatprep.subr.bf16.mxu0 %v2742_v11  ;;  %1501 = vmatprep.subr.bf16.mxu1 %v2745_v49 }
  0x97   : > { %1474 = vmatprep.mubr.bf16.mxu0 %v2801_v0  ;;  %1527 = vmatprep.mubr.bf16.mxu1 %v2801_v0 }
  0x99   : > { %1449 = vmatpush1.bf16.msra.mxu0 %v2740_v12  ;;  %1502 = vmatpush1.bf16.msra.mxu1 %v2743_v13 }
  0x9a   : > { %1450 = vmatprep.subr.bf16.mxu0 %v2748_v14  ;;  %1503 = vmatprep.subr.bf16.mxu1 %v2751_v15 }
  0x9d   : > { %1451 = vmatpush1.bf16.msra.mxu0 %v2746_v16  ;;  %1504 = vmatpush1.bf16.msra.mxu1 %v2749_v17 }
  0x9e   : > { %1452 = vmatprep.subr.bf16.mxu0 %v2754_v18  ;;  %1505 = vmatprep.subr.bf16.mxu1 %v2757_v45 }
  0xa1   : > { %1453 = vmatpush1.bf16.msra.mxu0 %v2752_v19  ;;  %1506 = vmatpush1.bf16.msra.mxu1 %v2755_v20 }
  0xa4   : > { %2437 = vmatmul.mubr.msk.bf16.vlgmr.msra.gmra.mrb[0].mxu0 %vm386_vm2, %v2903_v52  ;;  %2439 = vmatmul.mubr.msk.bf16.vlgmr.msra.gmra.mrb[0].mxu1 %vm386_vm2, %v2903_v52  ;;  %v1564_v52 = vld [vmem:[%s3162_s2] sm:$0xf] }
  0xa5   : > { %1484 = vmatprep.mubr.bf16.mxu0 %v2801_v0  ;;  %1537 = vmatprep.mubr.bf16.mxu1 %v2801_v0  ;;  %v1580_v0 = vsub.s32 3, %v2955_v22  ;;  %v1569_v28 = vrot.slane %v1564_v52, %v2958_v23  ;;  %v1573_v32 = vrot.slane %v1564_v52, %v1572_v27  ;;  %v2803_v27 = vmov 1983009808  }
  0xa7   : > { %v2972_v29 = vrot.slane %v1564_v52, %v1580_v0 }
  0xac   : > { %2438 = vmatmul.mubr.msk.bf16.gmra.mrb[4].mxu0 %vm386_vm2, %v2895_v48  ;;  %2440 = vmatmul.mubr.msk.bf16.gmra.mrb[4].mxu1 %vm386_vm2, %v2895_v48  ;;  %v2970_v48 = vrot.slane %v1564_v52, %v2961_v24  ;;  %vm1686_vm2 = vcmask 261120  }
 0x177   : > { %v1476_v30 = vpop.f32.mrb[0].mxu0  ;;  %v1529_v31 = vpop.f32.mrb[0].mxu1 }
 0x178   : > { %v2974_v33 = vadd.f32 %v1569_v28, %v1476_v30  ;;  %v1588_v34 = vadd.f32 %v2970_v48, %v1529_v31  ;;  %v1478_v35 = vpop.f32.mrb[1].mxu0  ;;  %v1531_v36 = vpop.f32.mrb[1].mxu1 }
 0x179   : > { %v1589_v37 = vadd.f32 %v2972_v29, %v1531_v36  ;;  %v1480_v38 = vpop.f32.mrb[2].mxu0  ;;  %v1533_v39 = vpop.f32.mrb[2].mxu1  ;;  %v1587_v41 = vadd.f32 %v1573_v32, %v1478_v35 }
 0x17a   : > { %v2978_v40 = vadd.f32 %v1569_v28, %v1480_v38  ;;  %v1482_v25 = vpop.f32.mrb[3].mxu0  ;;  %v1535_v26 = vpop.f32.mrb[3].mxu1  ;;  %v1592_v42 = vadd.f32 %v2970_v48, %v1533_v39  ;;  %vm1604_vm5 = vcmp.gt.f32.partialorder %v1588_v34, 0.0  ;;  %v1620_v43 = vmul.f32 0.01, %v1588_v34 }
 0x17b   : > { %vm1605_vm6 = vcmp.gt.f32.partialorder %v1589_v37, 0.0  ;;  %v1621_v44 = vmul.f32 0.01, %v1589_v37  ;;  %v1619_v46 = vmul.f32 0.01, %v1587_v41  ;;  %v1591_v47 = vadd.f32 %v1573_v32, %v1482_v25 }
 0x17c   : > { %v1636_v50 = vsel %vm1604_vm5, %v1588_v34, %v1620_v43  ;;  %v1624_v54 = vmul.f32 0.01, %v1592_v42  ;;  %vm1603_vm7 = vcmp.gt.f32.partialorder %v1587_v41, 0.0  ;;  %vm1608_vm8 = vcmp.gt.f32.partialorder %v1592_v42, 0.0 }
 0x17d   : > { %1664 = vrot.lane.b32.xlu0 %v1636_v50, %s2802_s9  ;;  %v1637_v55 = vsel %vm1605_vm6, %v1589_v37, %v1621_v44  ;;  %v1593_v62 = vadd.f32 %v2972_v29, %v1535_v26  ;;  %v1623_v1 = vmul.f32 0.01, %v1591_v47  ;;  %v1635_v3 = vsel %vm1603_vm7, %v1587_v41, %v1619_v46 }
 0x17e   : > { %1666 = vrot.lane.b32.xlu1 %v1637_v55, %s2802_s9  ;;  %v1640_v7 = vsel %vm1608_vm8, %v1592_v42, %v1624_v54  ;;  %vm1607_vm9 = vcmp.gt.f32.partialorder %v1591_v47, 0.0  ;;  %vm1602_vm3 = vcmp.gt.f32.partialorder %v2974_v33, 0.0  ;;  %v1622_v43 = vmul.f32 0.01, %v2978_v40 }
 0x17f   : > { %v1486_v51 = vpop.f32.mrb[4].mxu0  ;;  %v1539_v53 = vpop.f32.mrb[4].mxu1  ;;  %v1625_v9 = vmul.f32 0.01, %v1593_v62  ;;  %v2994_v11 = vsel %vm1607_vm9, %v1591_v47, %v1623_v1  ;;  %vm1609_vm11 = vcmp.gt.f32.partialorder %v1593_v62, 0.0  ;;  %vm1606_vm4 = vcmp.gt.f32.partialorder %v2978_v40, 0.0 }
 0x180   : > { %v2982_v56 = vadd.f32 %v1569_v28, %v1486_v51  ;;  %v1488_v57 = vpop.f32.mrb[5].mxu0  ;;  %v1541_v58 = vpop.f32.mrb[5].mxu1  ;;  %v1596_v10 = vadd.f32 %v2970_v48, %v1539_v53  ;;  %vm2136_vm7 = vcmask 1042434   ;;  %vm2139_vm8 = vcmask 1043459  }
 0x181   : > { %v1595_v59 = vadd.f32 %v1573_v32, %v1488_v57  ;;  %v1543_v60 = vpop.f32.mrb[6].mxu1  ;;  %v1490_v61 = vpop.f32.mrb[6].mxu0  ;;  %v1597_v6 = vadd.f32 %v2972_v29, %v1541_v58  ;;  %1662 = vrot.lane.b32.xlu0 %v1635_v3, %s2802_s9  ;;  %v1641_v15 = vsel %vm1609_vm11, %v1593_v62, %v1625_v9  ;;  %v1638_v58 = vsel %vm1606_vm4, %v2978_v40, %v1622_v43 }
 0x182   : > { %v1492_v63 = vpop.f32.mrb[7].mxu0  ;;  %v2986_v4 = vadd.f32 %v1569_v28, %v1490_v61  ;;  %v1545_v5 = vpop.f32.mrb[7].mxu1  ;;  %1670 = vrot.lane.b32.xlu1 %v1640_v7, %s2802_s9  ;;  %v1628_v13 = vmul.f32 0.01, %v1596_v10  ;;  %v1600_v14 = vadd.f32 %v2970_v48, %v1543_v60  ;;  %vm1612_vm13 = vcmp.gt.f32.partialorder %v1596_v10, 0.0 }
 0x183   : > { %v1627_v2 = vmul.f32 0.01, %v1595_v59  ;;  %vm1611_vm10 = vcmp.gt.f32.partialorder %v1595_v59, 0.0  ;;  %v1629_v49 = vmul.f32 0.01, %v1597_v6  ;;  %v1599_v12 = vadd.f32 %v1573_v32, %v1492_v63 }
 0x184   : > { %vm1613_vm12 = vcmp.gt.f32.partialorder %v1597_v6, 0.0  ;;  %v1601_v17 = vadd.f32 %v2972_v29, %v1545_v5  ;;  %v1632_v45 = vmul.f32 0.01, %v1600_v14  ;;  %v1644_v19 = vsel %vm1612_vm13, %v1596_v10, %v1628_v13 }
 0x185   : > { %v2991_v8 = vsel %vm1611_vm10, %v1595_v59, %v1627_v2  ;;  %1668 = vrot.lane.b32.xlu0 %v2994_v11, %s2802_s9  ;;  %v1631_v16 = vmul.f32 0.01, %v1599_v12  ;;  %v1645_v18 = vsel %vm1613_vm12, %v1597_v6, %v1629_v49  ;;  %vm1615_vm14 = vcmp.gt.f32.partialorder %v1599_v12, 0.0 }
 0x186   : > { %1674 = vrot.lane.b32.xlu1 %v2991_v8, %s2802_s9  ;;  %v1633_v20 = vmul.f32 0.01, %v1601_v17  ;;  %vm1616_vm15 = vcmp.gt.f32.partialorder %v1600_v14, 0.0  ;;  %vm1617_vm1 = vcmp.gt.f32.partialorder %v1601_v17, 0.0  ;;  %v1722_v28 = vunpack.c.l.s4 %v2803_v27 }
 0x187   : > { %v3005_v21 = vsel %vm1615_vm14, %v1599_v12, %v1631_v16  ;;  %v1648_v52 = vsel %vm1616_vm15, %v1600_v14, %v1632_v45  ;;  %v1618_v29 = vmul.f32 0.01, %v2974_v33  ;;  %vm1610_vm5 = vcmp.gt.f32.partialorder %v2982_v56, 0.0 }
 0x188   : > { %v1649_v0 = vsel %vm1617_vm1, %v1601_v17, %v1633_v20  ;;  %v1723_v31 = vunpack.c.0.s8 %v1722_v28  ;;  %v1626_v47 = vmul.f32 0.01, %v2982_v56  ;;  %vm1614_vm6 = vcmp.gt.f32.partialorder %v2986_v4, 0.0 }
 0x189   : > { %1672 = vrot.lane.b32.xlu0 %v1641_v15, %s2802_s9  ;;  %v1634_v35 = vsel %vm1602_vm3, %v2974_v33, %v1618_v29  ;;  %vm2142_vm9 = vcmask 1044484   ;;  %vm2145_vm10 = vcmask 1045509   ;;  %vm2148_vm11 = vcmask 1046534  }
 0x18a   : > { %1678 = vrot.lane.b32.xlu1 %v1645_v18, %s2802_s9  ;;  %v3017_v39 = vsub.s32 %v1723_v31, %v2955_v22  ;;  %v1630_v22 = vmul.f32 0.01, %v2986_v4  ;;  %v1642_v5 = vsel %vm1610_vm5, %v2982_v56, %v1626_v47  ;;  %vm2151_vm12 = vcmask 1047559  }
 0x18b   : > { %vm2167_vm13 = vcmask 1041409   ;;  %vm2204_vm14 = vcmask 1043584   ;;  %vm2205_vm15 = vsmask.f32 7938  ;;  %vm2207_vm1 = vcmask 916484  }
 0x18c   : > { %v3037_v6 = vsel %vm1614_vm6, %v2986_v4, %v1630_v22  ;;  %vm2206_vm3 = vmand %vm2204_vm14, %vm2205_vm15  ;;  %vm2199_vm5 = vcmask 130048  }
 0x18d   : > { %1676 = vrot.lane.b32.xlu0 %v1644_v19, %s2802_s9 }
 0x18e   : > { %1680 = vrot.lane.b32.xlu1 %v3005_v21, %s2802_s9 }
 0x191   : > { %1682 = vrot.lane.b32.xlu0 %v1648_v52, %s2802_s9 }
 0x192   : > { %1684 = vrot.lane.b32.xlu1 %v1649_v0, %s2802_s9 }
 0x1ef   : > { %v1665_v48 = vpop.permute.xlu0 %1664 }
 0x1f0   : > { %v1667_v30 = vpop.permute.xlu1 %1666 }
 0x1f1   : > { %v1688_v32 = vsel %vm1686_vm2, %v1665_v48, %v1667_v30 }
 0x1f2   : > { %v1704_v38 = vmax.f32 %v1635_v3, %v1688_v32 }
 0x1f3   : > { %v1663_v34 = vpop.permute.xlu0 %1662 }
 0x1f4   : > { %v1687_v36 = vsel %vm1686_vm2, %v1663_v34, %v1665_v48  ;;  %v1671_v37 = vpop.permute.xlu1 %1670 }
 0x1f5   : > { %v1703_v25 = vmax.f32 %v1634_v35, %v1687_v36 }
 0x1f7   : > { %v1719_v26 = vcombine.low %v1703_v25, %v1704_v38  ;;  %v1720_v41 = vcombine.high %v1703_v25, %v1704_v38  ;;  %v1669_v42 = vpop.permute.xlu0 %1668 }
 0x1f8   : > { %v1675_v44 = vpop.permute.xlu1 %1674  ;;  %v1689_v50 = vsel %vm1686_vm2, %v1669_v42, %v1671_v37 }
 0x1f9   : > { %v1727_v33 = vrot.slane %v1719_v26, %v3017_v39  ;;  %v1734_v46 = vrot.slane %v1720_v41, %v3017_v39  ;;  %v1705_v2 = vmax.f32 %v1638_v58, %v1689_v50 }
 0x1fb   : > { %v1735_v51 = vcombine.high %v1727_v33, %v1727_v33  ;;  %v1736_v53 = vcombine.high %v1734_v46, %v1734_v46  ;;  %v2441_v54 = vrot.slane %v1727_v33, 9  ;;  %v2443_v55 = vrot.slane %v1734_v46, 9  ;;  %v1673_v57 = vpop.permute.xlu0 %1672 }
 0x1fc   : > { %v1690_v59 = vsel %vm1686_vm2, %v1671_v37, %v1673_v57  ;;  %v1679_v60 = vpop.permute.xlu1 %1678 }
 0x1fd   : > { %v2442_v61 = vrot.slane %v1735_v51, 9  ;;  %v2444_v62 = vrot.slane %v1736_v53, 9  ;;  %v1838_v63 = vmax.f32 %v1727_v33, %v2441_v54  ;;  %v1840_v1 = vmax.f32 %v1734_v46, %v2443_v55 }
 0x1fe   : > { %v1706_v3 = vmax.f32 %v2994_v11, %v1690_v59 }
 0x1ff   : > { %v1839_v40 = vmax.f32 %v1735_v51, %v2442_v61  ;;  %v1841_v7 = vmax.f32 %v1736_v53, %v2444_v62  ;;  %v1869_v9 = vrot.slane %v1838_v63, %v2958_v23  ;;  %v1873_v10 = vrot.slane %v1838_v63, %v2961_v24  ;;  %v1677_v14 = vpop.permute.xlu0 %1676 }
 0x200   : > { %v1885_v49 = vrot.slane %v1840_v1, %v2958_v23  ;;  %v1889_v12 = vrot.slane %v1840_v1, %v2961_v24  ;;  %v1737_v11 = vcombine.low %v1705_v2, %v1706_v3  ;;  %v1738_v13 = vcombine.high %v1705_v2, %v1706_v3  ;;  %v1681_v15 = vpop.permute.xlu1 %1680 }
 0x201   : > { %v1877_v56 = vrot.slane %v1839_v40, %v2958_v23  ;;  %v1881_v16 = vrot.slane %v1839_v40, %v2961_v24  ;;  %v1893_v4 = vrot.slane %v1841_v7, %v2958_v23  ;;  %v1897_v17 = vrot.slane %v1841_v7, %v2961_v24 }
 0x202   : > { %v2473_v18 = vpack.c.bf16 %v1873_v10, %v1869_v9  ;;  %v2475_v45 = vpack.c.bf16 %v1889_v12, %v1885_v49  ;;  %v1745_v19 = vrot.slane %v1737_v11, %v3017_v39  ;;  %v1752_v20 = vrot.slane %v1738_v13, %v3017_v39 }
 0x203   : > { %v2474_v52 = vpack.c.bf16 %v1881_v16, %v1877_v56  ;;  %v3049_v0 = vpack.c.bf16 %v1897_v17, %v1893_v4  ;;  %v1691_v27 = vsel %vm1686_vm2, %v1675_v44, %v1677_v14  ;;  %v1692_v28 = vsel %vm1686_vm2, %v1677_v14, %v1679_v60  ;;  %v1683_v41 = vpop.permute.xlu0 %1682 }
 0x204   : > { %v2106_v48 = vunpack.c.l.b16 %v2473_v18  ;;  %v2107_v29 = vunpack.c.h.b16 %v2473_v18  ;;  %v2110_v30 = vunpack.c.l.b16 %v2475_v45  ;;  %v2111_v31 = vunpack.c.h.b16 %v2475_v45  ;;  %v1685_v42 = vpop.permute.xlu1 %1684 }
 0x205   : > { %v2108_v32 = vunpack.c.l.b16 %v2474_v52  ;;  %v2109_v34 = vunpack.c.h.b16 %v2474_v52  ;;  %v1753_v35 = vcombine.high %v1745_v19, %v1745_v19  ;;  %v1754_v36 = vcombine.high %v1752_v20, %v1752_v20 }
 0x206   : > { %v3053_v37 = vrot.slane %v2106_v48, 7  ;;  %v3055_v38 = vrot.slane %v2110_v30, 5  ;;  %v3057_v25 = vrot.slane %v2107_v29, 7  ;;  %v3059_v26 = vrot.slane %v2111_v31, 5 }
 0x207   : > { %v3061_v43 = vrot.slane %v2108_v32, 6  ;;  %v3063_v44 = vrot.slane %v2109_v34, 6  ;;  %v2445_v33 = vrot.slane %v1745_v19, 9  ;;  %v2446_v46 = vrot.slane %v1753_v35, 9 }
 0x208   : > { %v2447_v47 = vrot.slane %v1752_v20, 9  ;;  %v2448_v22 = vrot.slane %v1754_v36, 9  ;;  %v1707_v50 = vmax.f32 %v1642_v5, %v1691_v27  ;;  %v1708_v51 = vmax.f32 %v2991_v8, %v1692_v28 }
 0x209   : > { %v1842_v53 = vmax.f32 %v1745_v19, %v2445_v33  ;;  %v1843_v54 = vmax.f32 %v1753_v35, %v2446_v46  ;;  %v1693_v55 = vsel %vm1686_vm2, %v1681_v15, %v1683_v41  ;;  %v1694_v57 = vsel %vm1686_vm2, %v1683_v41, %v1685_v42 }
 0x20a   : > { %v1844_v58 = vmax.f32 %v1752_v20, %v2447_v47  ;;  %v1845_v59 = vmax.f32 %v1754_v36, %v2448_v22  ;;  %v1755_v60 = vcombine.low %v1707_v50, %v1708_v51  ;;  %v1756_v61 = vcombine.high %v1707_v50, %v1708_v51 }
 0x20b   : > { %v1901_v62 = vrot.slane %v1842_v53, %v2958_v23  ;;  %v1905_v63 = vrot.slane %v1842_v53, %v2961_v24  ;;  %v1909_v1 = vrot.slane %v1843_v54, %v2958_v23  ;;  %v1913_v2 = vrot.slane %v1843_v54, %v2961_v24 }
 0x20c   : > { %v1917_v8 = vrot.slane %v1844_v58, %v2958_v23  ;;  %v1921_v3 = vrot.slane %v1844_v58, %v2961_v24  ;;  %v1925_v5 = vrot.slane %v1845_v59, %v2958_v23  ;;  %v1929_v40 = vrot.slane %v1845_v59, %v2961_v24 }
 0x20d   : > { %v3076_v7 = vpack.c.bf16 %v1905_v63, %v1901_v62  ;;  %v1763_v9 = vrot.slane %v1755_v60, %v3017_v39  ;;  %v1770_v10 = vrot.slane %v1756_v61, %v3017_v39  ;;  %v1709_v49 = vmax.f32 %v3037_v6, %v1693_v55 }
 0x20e   : > { %v3081_v12 = vpack.c.bf16 %v1929_v40, %v1925_v5  ;;  %v1710_v11 = vmax.f32 %v3005_v21, %v1694_v57  ;;  %v3084_v13 = vpack.c.bf16 %v1913_v2, %v1909_v1  ;;  %v3086_v14 = vpack.c.bf16 %v1921_v3, %v1917_v8 }
 0x20f   : > { %v1771_v15 = vcombine.high %v1763_v9, %v1763_v9  ;;  %v1772_v56 = vcombine.high %v1770_v10, %v1770_v10  ;;  %v2449_v16 = vrot.slane %v1763_v9, 9  ;;  %v2451_v4 = vrot.slane %v1770_v10, 9 }
 0x210   : > { %v2120_v17 = vunpack.c.l.b16 %v3081_v12  ;;  %v2121_v18 = vunpack.c.h.b16 %v3081_v12  ;;  %v1773_v45 = vcombine.low %v1709_v49, %v1710_v11  ;;  %v2112_v6 = vunpack.c.l.b16 %v3049_v0 }
 0x211   : > { %v2450_v19 = vrot.slane %v1771_v15, 9  ;;  %v2452_v21 = vrot.slane %v1772_v56, 9  ;;  %v1846_v20 = vmax.f32 %v1763_v9, %v2449_v16  ;;  %v1848_v52 = vmax.f32 %v1770_v10, %v2451_v4 }
 0x212   : > { %v1780_v27 = vrot.slane %v1773_v45, %v3017_v39  ;;  %v2113_v28 = vunpack.c.h.b16 %v3049_v0  ;;  %v2114_v48 = vunpack.c.l.b16 %v3076_v7  ;;  %v2115_v29 = vunpack.c.h.b16 %v3076_v7 }
 0x213   : > { %v1847_v30 = vmax.f32 %v1771_v15, %v2450_v19  ;;  %v1849_v31 = vmax.f32 %v1772_v56, %v2452_v21  ;;  %v1933_v32 = vrot.slane %v1846_v20, %v2958_v23  ;;  %v1937_v34 = vrot.slane %v1846_v20, %v2961_v24 }
 0x214   : > { %v1949_v35 = vrot.slane %v1848_v52, %v2958_v23  ;;  %v1953_v36 = vrot.slane %v1848_v52, %v2961_v24  ;;  %v1781_v41 = vcombine.high %v1780_v27, %v1780_v27  ;;  %v2453_v39 = vrot.slane %v1780_v27, 9 }
 0x215   : > { %v1941_v0 = vrot.slane %v1847_v30, %v2958_v23  ;;  %v1945_v42 = vrot.slane %v1847_v30, %v2961_v24  ;;  %v1957_v33 = vrot.slane %v1849_v31, %v2958_v23  ;;  %v1961_v46 = vrot.slane %v1849_v31, %v2961_v24 }
 0x216   : > { %v2481_v47 = vpack.c.bf16 %v1937_v34, %v1933_v32  ;;  %v3103_v22 = vpack.c.bf16 %v1953_v36, %v1949_v35  ;;  %v2454_v50 = vrot.slane %v1781_v41, 9  ;;  %v1850_v51 = vmax.f32 %v1780_v27, %v2453_v39 }
 0x217   : > { %v2482_v53 = vpack.c.bf16 %v1945_v42, %v1941_v0  ;;  %v2116_v54 = vunpack.c.l.b16 %v3084_v13  ;;  %v2117_v55 = vunpack.c.h.b16 %v3084_v13  ;;  %v2118_v57 = vunpack.c.l.b16 %v3086_v14 }
 0x218   : > { %v2122_v58 = vunpack.c.l.b16 %v2481_v47  ;;  %v2123_v59 = vunpack.c.h.b16 %v2481_v47  ;;  %v1851_v60 = vmax.f32 %v1781_v41, %v2454_v50  ;;  %v1965_v61 = vrot.slane %v1850_v51, %v2958_v23 }
 0x219   : > { %v1969_v62 = vrot.slane %v1850_v51, %v2961_v24  ;;  %v2119_v63 = vunpack.c.h.b16 %v3086_v14  ;;  %v2137_v1 = vsel %vm2136_vm7, %v3061_v43, %v3053_v37  ;;  %v2141_v2 = vrot.slane %v2112_v6, 4 }
 0x21a   : > { %v2166_v8 = vrot.slane %v2122_v58, 7  ;;  %v2179_v3 = vrot.slane %v2123_v59, 7  ;;  %v2140_v5 = vsel %vm2139_vm8, %v3055_v38, %v2137_v1  ;;  %v2144_v40 = vrot.slane %v2114_v48, 3 }
 0x21b   : > { %v2143_v7 = vsel %vm2142_vm9, %v2141_v2, %v2140_v5  ;;  %v2147_v9 = vrot.slane %v2116_v54, 2  ;;  %v2150_v10 = vrot.slane %v2118_v57, 1  ;;  %v2155_v49 = vsel %vm2136_vm7, %v3063_v44, %v3057_v25 }
 0x21c   : > { %v2146_v11 = vsel %vm2145_vm10, %v2144_v40, %v2143_v7  ;;  %v2157_v37 = vsel %vm2139_vm8, %v3059_v26, %v2155_v49  ;;  %v2158_v43 = vrot.slane %v2113_v28, 4  ;;  %v2160_v13 = vrot.slane %v2115_v29, 3 }
 0x21d   : > { %v2149_v14 = vsel %vm2148_vm11, %v2147_v9, %v2146_v11  ;;  %v2162_v15 = vrot.slane %v2117_v55, 2  ;;  %v2164_v38 = vrot.slane %v2119_v63, 1  ;;  %v1973_v56 = vrot.slane %v1851_v60, %v2958_v23 }
 0x21e   : > { %v2152_v16 = vsel %vm2151_vm12, %v2150_v10, %v2149_v14  ;;  %v2159_v4 = vsel %vm2142_vm9, %v2158_v43, %v2157_v37  ;;  %v1977_v45 = vrot.slane %v1851_v60, %v2961_v24  ;;  %v2484_v25 = vpack.c.bf16 %v1961_v46, %v1957_v33 }
 0x21f   : > { %v2161_v44 = vsel %vm2145_vm10, %v2160_v13, %v2159_v4  ;;  %v2485_v6 = vpack.c.bf16 %v1969_v62, %v1965_v61  ;;  %v2124_v19 = vunpack.c.l.b16 %v2482_v53  ;;  %v2125_v26 = vunpack.c.h.b16 %v2482_v53 }
 0x220   : > { %v2163_v21 = vsel %vm2148_vm11, %v2162_v15, %v2161_v44  ;;  %v2486_v20 = vpack.c.bf16 %v1977_v45, %v1973_v56  ;;  %v2126_v52 = vunpack.c.l.b16 %v3103_v22  ;;  %v2127_v27 = vunpack.c.h.b16 %v3103_v22 }
 0x221   : > { %v2165_v23 = vsel %vm2151_vm12, %v2164_v38, %v2163_v21  ;;  %v2128_v28 = vunpack.c.l.b16 %v2484_v25  ;;  %v2129_v48 = vunpack.c.h.b16 %v2484_v25  ;;  %v2130_v29 = vunpack.c.l.b16 %v2485_v6 }
 0x222   : > { %v2191_v30 = vpack.c.b16 %v2165_v23, %v2152_v16  ;;  %v2131_v24 = vunpack.c.h.b16 %v2485_v6  ;;  %v2132_v31 = vunpack.c.l.b16 %v2486_v20  ;;  %v2133_v32 = vunpack.c.h.b16 %v2486_v20 }
 0x223   : > { %v2168_v34 = vsel %vm2167_vm13, %v2166_v8, %v2120_v17  ;;  %v2169_v35 = vrot.slane %v2124_v19, 6  ;;  %v2171_v36 = vrot.slane %v2126_v52, 5  ;;  %v2173_v41 = vrot.slane %v2128_v28, 4 }
 0x224   : > { %2193 = vrot.lane.b32.xlu0 %v2191_v30, %s2804_s10  ;;  %v2175_v39 = vrot.slane %v2130_v29, 3  ;;  %v2180_v0 = vsel %vm2167_vm13, %v2179_v3, %v2121_v18  ;;  %v2181_v42 = vrot.slane %v2125_v26, 6  ;;  %v2177_v46 = vrot.slane %v2132_v31, 2 }
 0x225   : > { %v2170_v33 = vsel %vm2136_vm7, %v2169_v35, %v2168_v34  ;;  %v2183_v47 = vrot.slane %v2127_v27, 5  ;;  %v2187_v22 = vrot.slane %v2131_v24, 3  ;;  %v2185_v51 = vrot.slane %v2129_v48, 4 }
 0x226   : > { %v2172_v50 = vsel %vm2139_vm8, %v2171_v36, %v2170_v33  ;;  %v2182_v17 = vsel %vm2136_vm7, %v2181_v42, %v2180_v0  ;;  %v2189_v53 = vrot.slane %v2133_v32, 2  ;;  %vm2208_vm2 = vsmask.f32 7954 }
 0x227   : > { %v2174_v54 = vsel %vm2142_vm9, %v2173_v41, %v2172_v50  ;;  %v2184_v55 = vsel %vm2139_vm8, %v2183_v47, %v2182_v17  ;;  %vm2209_vm4 = vmand %vm2207_vm1, %vm2208_vm2  ;;  %vm2214_vm7 = vsmask.f32 3328 }
 0x228   : > { %v2176_v12 = vsel %vm2145_vm10, %v2175_v39, %v2174_v54  ;;  %v2186_v18 = vsel %vm2142_vm9, %v2185_v51, %v2184_v55  ;;  %vm2210_vm6 = vmor %vm2209_vm4, %vm2206_vm3 }
 0x229   : > { %v2178_v57 = vsel %vm2148_vm11, %v2177_v46, %v2176_v12  ;;  %v2188_v58 = vsel %vm2145_vm10, %v2187_v22, %v2186_v18  ;;  %vm2216_vm8 = vmand %vm2207_vm1, %vm250_vm0 }
 0x22a   : > { %v2190_v59 = vsel %vm2148_vm11, %v2189_v53, %v2188_v58  ;;  %vm2215_vm9 = vmand %vm2204_vm14, %vm2214_vm7 }
 0x22b   : > { %v2192_v60 = vpack.c.b16 %v2190_v59, %v2178_v57  ;;  %vm2217_vm10 = vmor %vm2216_vm8, %vm2215_vm9 }
 0x22d   : > { %2195 = vrot.lane.b32.xlu1 %v2192_v60, %s2804_s10 }
 0x296   : > { %v2194_v61 = vpop.permute.xlu0 %2193 }
 0x297   : > { %v2197_v62 = vrot.slane %v2194_v61, 4 }
 0x299   : > { %v2200_v63 = vsel %vm2199_vm5, %v2197_v62, %v2194_v61 }
 0x29a   : > { %v2212_v1 = vsel %vm2210_vm6, %v2200_v63, 0 }
 0x29b   : > { %2213 = vst [vmem:[%s185_s15] sm:$0xff] %v2212_v1 }
 0x29f   : > { %v2196_v2 = vpop.permute.xlu1 %2195 }
 0x2a0   : > { %v2198_v8 = vrot.slane %v2196_v2, 4 }
 0x2a2   : > { %v2201_v3 = vsel %vm2199_vm5, %v2198_v8, %v2196_v2 }
 0x2a3   : > { %v2219_v5 = vsel %vm2217_vm10, %v2201_v3, 0 }
 0x2a4   : > { %2220 = vst [vmem:[%s185_s15 + $0x8] sm:$0xff] %v2219_v5 }
 0x2a5 PF: > { %s14_s12 = sadd.s32 1, %s2796_s12  }
 0x2a6   : > { %p11_p3 = scmp.ge.s32.totalorder %s14_s12, 4  }
 0x2a8   :  { %13 = sbr.rel (!%p11_p3) target bundleno = 1 (0x1), region = 71 }
 0x2af   :  { %2242 = vsyncpa [#allocation3], 1 }
 0x2b0   :  { %2244 = vsyncpa [#allocation3 + $0x1], 1 }

// kernel: cifar_cnn_forward.6
= control target key start
LH: loop header
LB: loop body
LE: loop exit
PB: predicated region body
PF: predicated region fallthrough
CT: control target
= control target key end

     0   :  { %s2256_s12 = smov 0   ;;  %s2746_s0 = inlined_call_operand.vmem [shape: bf16[2,8,256], index: 0, kind: input, shape index: {}]   ;;  %s2747_s1 = inlined_call_operand.vmem [shape: bf16[3,256,384], index: 1, kind: input, shape index: {}]   ;;  %s2748_s2 = inlined_call_operand.vmem [shape: f32[1,384], index: 2, kind: input, shape index: {}]   ;;  %s2749_s3 = inlined_call_operand.vmem [shape: bf16[2,3,192], index: 3, kind: output, shape index: {}]  }
   0x1 LB: > { %s1663_s13 = sadd.s32 4294967295, %s2232_s12   ;;  %p1667_p0 = scmp.ge.s32.totalorder %s2232_s12, 1  ;;  %s2232_s12 = sphi %s2256_s12, %s13_s12  }
   0x2   : > { %p137_p1 = scmp.lt.s32.totalorder %s2232_s12, 3 }
   0x4   : > { %p138_p2 = pnand %p1667_p0, %p137_p1 }
   0x5   : > { %v2032_v0 = vld [vmem:[%s2747_s1 + $0x184] ss:$12 sps:$4 sm:$0xff] (!%p138_p2)   ;;  %v2034_v1 = vld [vmem:[%s2747_s1 + $0x248] ss:$12 sps:$4 sm:$0xff] (!%p138_p2)   ;;  %v2035_v2 = vld [vmem:[%s2747_s1 + $0x180] ss:$12 sps:$4 sm:$0xff] (!%p138_p2)  }
   0x6   : > { %141 = sbr.rel (%p138_p2) target bundleno = 538 (0x21a), region = 32  ;;  %579 = vmatprep.subr.bf16.mxu0 (!%p138_p2), %v2032_v0  ;;  %1956 = vmatprep.subr.bf16.mxu1 (!%p138_p2), %v2034_v1  ;;  %v2036_v3 = vld [vmem:[%s2747_s1 + $0x188] ss:$12 sps:$4 sm:$0xff] (!%p138_p2)   ;;  %v2039_v5 = vld [vmem:[%s2747_s1 + $0x260] ss:$12 sps:$4 sm:$0xff] (!%p138_p2)   ;;  %p161_p3 = scmp.lt.s32.totalorder (!%p138_p2), %s1663_s13, 1 }
   0x7   : > { %580 = vmatpush1.bf16.msra.mxu0 (!%p138_p2), %v2035_v2  ;;  %v2037_v4 = vld [vmem:[%s2747_s1 + $0x19c] ss:$12 sps:$4 sm:$0xff] (!%p138_p2)   ;;  %1957 = vmatpush3.bf16.msra.mxu1 (!%p138_p2), %v2036_v3  ;;  %v2040_v6 = vld [vmem:[%s2747_s1 + $0x198] ss:$12 sps:$4 sm:$0xff] (!%p138_p2)   ;;  %v2041_v7 = vld [vmem:[%s2747_s1 + $0x1a0] ss:$12 sps:$4 sm:$0xff] (!%p138_p2)  }
   0x8   : > { %581 = vmatprep.subr.bf16.mxu0 (!%p138_p2), %v2037_v4  ;;  %1958 = vmatprep.subr.bf16.mxu1 (!%p138_p2), %v2039_v5  ;;  %v2042_v8 = vld [vmem:[%s2747_s1 + $0x1b4] ss:$12 sps:$4 sm:$0xff] (!%p138_p2)   ;;  %v2044_v9 = vld [vmem:[%s2747_s1 + $0x278] ss:$12 sps:$4 sm:$0xff] (!%p138_p2)   ;;  %v2045_v10 = vld [vmem:[%s2747_s1 + $0x1b0] ss:$12 sps:$4 sm:$0xff] (!%p138_p2)  }
   0x9   : > { %v2046_v11 = vld [vmem:[%s2747_s1 + $0x1b8] ss:$12 sps:$4 sm:$0xff] (!%p138_p2)   ;;  %v2049_v13 = vld [vmem:[%s2747_s1 + $0x290] ss:$12 sps:$4 sm:$0xff] (!%p138_p2)   ;;  %v2050_v14 = vld [vmem:[%s2747_s1 + $0x1c8] ss:$12 sps:$4 sm:$0xff] (!%p138_p2)  }
   0xa   : > { %v2047_v12 = vld [vmem:[%s2747_s1 + $0x1cc] ss:$12 sps:$4 sm:$0xff] (!%p138_p2)   ;;  %v2051_v15 = vld [vmem:[%s2747_s1 + $0x1d0] ss:$12 sps:$4 sm:$0xff] (!%p138_p2)   ;;  %v2054_v17 = vld [vmem:[%s2747_s1 + $0x2a8] ss:$12 sps:$4 sm:$0xff] (!%p138_p2)  }
   0xb   : > { %582 = vmatpush1.bf16.msra.mxu0 (!%p138_p2), %v2040_v6  ;;  %1959 = vmatpush3.bf16.msra.mxu1 (!%p138_p2), %v2041_v7  ;;  %v2052_v16 = vld [vmem:[%s2747_s1 + $0x1e4] ss:$12 sps:$4 sm:$0xff] (!%p138_p2)   ;;  %v2055_v18 = vld [vmem:[%s2747_s1 + $0x1e0] ss:$12 sps:$4 sm:$0xff] (!%p138_p2)   ;;  %v2056_v19 = vld [vmem:[%s2747_s1 + $0x1e8] ss:$12 sps:$4 sm:$0xff] (!%p138_p2)  }
   0xc   : > { %583 = vmatprep.subr.bf16.mxu0 (!%p138_p2), %v2042_v8  ;;  %1960 = vmatprep.subr.bf16.mxu1 (!%p138_p2), %v2044_v9  ;;  %v2057_v20 = vld [vmem:[%s2747_s1 + $0x1fc] ss:$12 sps:$4 sm:$0xff] (!%p138_p2)   ;;  %v2059_v21 = vld [vmem:[%s2747_s1 + $0x2c0] ss:$12 sps:$4 sm:$0xff] (!%p138_p2)   ;;  %v2060_v22 = vld [vmem:[%s2747_s1 + $0x1f8] ss:$12 sps:$4 sm:$0xff] (!%p138_p2)  }
   0xd   : > { %s2751_s13 = smov (!%p161_p3, %s1663_s13), 1  ;;  %v2061_v23 = vld [vmem:[%s2747_s1 + $0x200] ss:$12 sps:$4 sm:$0xff]   ;;  %v2064_v25 = vld [vmem:[%s2747_s1 + $0x2d8] ss:$12 sps:$4 sm:$0xff]   ;;  %s2234_s6 = smov 64  }
   0xe   : > { %s1954_s10 = sshll.u32 %s2751_s13, 3  ;;  %v2062_v24 = vld [vmem:[%s2747_s1 + $0x214] ss:$12 sps:$4 sm:$0xff]   ;;  %v2065_v26 = vld [vmem:[%s2747_s1 + $0x210] ss:$12 sps:$4 sm:$0xff]   ;;  %vm1443_vm3 = vcmask 523264  }
   0xf   : > { %584 = vmatpush1.bf16.msra.mxu0 %v2045_v10  ;;  %1961 = vmatpush3.bf16.msra.mxu1 %v2046_v11  ;;  %s165_s21 = scalar_lea.vmem %s2746_s0, %s1954_s10  ;;  %v2066_v27 = vld [vmem:[%s2747_s1 + $0x218] ss:$12 sps:$4 sm:$0xff]   ;;  %v2069_v29 = vld [vmem:[%s2747_s1 + $0x2f0] ss:$12 sps:$4 sm:$0xff]   ;;  %v2070_v31 = vld [vmem:[%s2747_s1 + $0x228] ss:$12 sps:$4 sm:$0xff]  }
  0x10   : > { %585 = vmatprep.subr.bf16.mxu0 %v2047_v12  ;;  %1962 = vmatprep.subr.bf16.mxu1 %v2049_v13  ;;  %v2067_v28 = vld [vmem:[%s2747_s1 + $0x22c] ss:$12 sps:$4 sm:$0xff]   ;;  %v172_v30 = vld [vmem:[%s165_s21] sm:$0xff]  ;;  %v2071_v34 = vld [vmem:[%s2747_s1 + $0x230] ss:$12 sps:$4 sm:$0xff]   ;;  %vm1598_vm4 = vcmask 1041408  }
  0x11   : > { %v2367_v32 = vcombine.low %v172_v30, %v172_v30  ;;  %v2369_v33 = vcombine.high %v172_v30, %v172_v30  ;;  %v2072_v35 = vld [vmem:[%s2747_s1 + $0x244] ss:$12 sps:$4 sm:$0xff]   ;;  %v2079_v42 = vld [vmem:[%s2747_s1 + $0x240] ss:$12 sps:$4 sm:$0xff]   ;;  %v2080_v44 = vld [vmem:[%s2747_s1 + $0x25c] ss:$12 sps:$4 sm:$0xff]  }
  0x12   : > { %v2078_v36 = vld [vmem:[%s2747_s1 + $0x4] ss:$12 sps:$4 sm:$0xff]   ;;  %v2076_v46 = vld [vmem:[%s2747_s1] ss:$12 sps:$4 sm:$0xff]   ;;  %v2084_v48 = vld [vmem:[%s2747_s1 + $0x1c] ss:$12 sps:$4 sm:$0xff]  }
  0x13   : > { %586 = vmatpush1.bf16.msra.mxu0 %v2050_v14  ;;  %1963 = vmatpush3.bf16.msra.mxu1 %v2051_v15  ;;  %v315_v37 = vshrl.u32 %v2369_v33, 16  ;;  %v317_v38 = vshll.u32 %v2369_v33, 16  ;;  %v308_v39 = vshrl.u32 %v2367_v32, 16  ;;  %v310_v40 = vshll.u32 %v2367_v32, 16  ;;  %v2085_v49 = vld [vmem:[%s2747_s1 + $0x258] ss:$12 sps:$4 sm:$0xff]  }
  0x14   : > { %587 = vmatprep.subr.bf16.mxu0 %v2052_v16  ;;  %1964 = vmatprep.subr.bf16.mxu1 %v2054_v17  ;;  %v2086_v50 = vld [vmem:[%s2747_s1 + $0x274] ss:$12 sps:$4 sm:$0xff]   ;;  %v2082_v51 = vld [vmem:[%s2747_s1 + $0x18] ss:$12 sps:$4 sm:$0xff]   ;;  %v2091_v53 = vld [vmem:[%s2747_s1 + $0x270] ss:$12 sps:$4 sm:$0xff]  }
  0x15   : > { %v319_v41 = vrot.slane %v317_v38, 1  ;;  %v312_v43 = vrot.slane %v310_v40, 1  ;;  %v2090_v52 = vld [vmem:[%s2747_s1 + $0x34] ss:$12 sps:$4 sm:$0xff]   ;;  %v2092_v54 = vld [vmem:[%s2747_s1 + $0x28c] ss:$12 sps:$4 sm:$0xff]  }
  0x16   : > { %v2088_v55 = vld [vmem:[%s2747_s1 + $0x30] ss:$12 sps:$4 sm:$0xff]   ;;  %v2096_v56 = vld [vmem:[%s2747_s1 + $0x4c] ss:$12 sps:$4 sm:$0xff]   ;;  %v2097_v57 = vld [vmem:[%s2747_s1 + $0x288] ss:$12 sps:$4 sm:$0xff]  }
  0x17   : > { %588 = vmatpush1.bf16.msra.mxu0 %v2055_v18  ;;  %1965 = vmatpush3.bf16.msra.mxu1 %v2056_v19  ;;  %v320_v45 = vor.u32 %v319_v41, %v315_v37  ;;  %v2393_v47 = vor.u32 %v312_v43, %v308_v39  ;;  %v2098_v58 = vld [vmem:[%s2747_s1 + $0x2a4] ss:$12 sps:$4 sm:$0xff]   ;;  %v2094_v59 = vld [vmem:[%s2747_s1 + $0x48] ss:$12 sps:$4 sm:$0xff]   ;;  %v2103_v61 = vld [vmem:[%s2747_s1 + $0x2a0] ss:$12 sps:$4 sm:$0xff]  }
  0x18   : > { %589 = vmatprep.subr.bf16.mxu0 %v2057_v20  ;;  %1966 = vmatprep.subr.bf16.mxu1 %v2059_v21  ;;  %v2102_v60 = vld [vmem:[%s2747_s1 + $0x64] ss:$12 sps:$4 sm:$0xff]   ;;  %v2104_v62 = vld [vmem:[%s2747_s1 + $0x2bc] ss:$12 sps:$4 sm:$0xff]   ;;  %v2100_v63 = vld [vmem:[%s2747_s1 + $0x60] ss:$12 sps:$4 sm:$0xff]  }
  0x19   : > { %652 = vmatprep.mubr.bf16.mxu1 %v320_v45  ;;  %611 = vmatprep.mubr.bf16.mxu0 %v320_v45  ;;  %v2108_v0 = vld [vmem:[%s2747_s1 + $0x7c] ss:$12 sps:$4 sm:$0xff]   ;;  %v2109_v1 = vld [vmem:[%s2747_s1 + $0x2b8] ss:$12 sps:$4 sm:$0xff]   ;;  %v2110_v2 = vld [vmem:[%s2747_s1 + $0x2d4] ss:$12 sps:$4 sm:$0xff]  }
  0x1a   : > { %v2106_v3 = vld [vmem:[%s2747_s1 + $0x78] ss:$12 sps:$4 sm:$0xff]   ;;  %v2114_v4 = vld [vmem:[%s2747_s1 + $0x94] ss:$12 sps:$4 sm:$0xff]   ;;  %v2115_v5 = vld [vmem:[%s2747_s1 + $0x2d0] ss:$12 sps:$4 sm:$0xff]  }
  0x1b   : > { %590 = vmatpush1.bf16.msra.mxu0 %v2060_v22  ;;  %1967 = vmatpush3.bf16.msra.mxu1 %v2061_v23  ;;  %v2116_v6 = vld [vmem:[%s2747_s1 + $0x2ec] ss:$12 sps:$4 sm:$0xff]   ;;  %v2112_v7 = vld [vmem:[%s2747_s1 + $0x90] ss:$12 sps:$4 sm:$0xff]   ;;  %v2121_v9 = vld [vmem:[%s2747_s1 + $0x2e8] ss:$12 sps:$4 sm:$0xff]  }
  0x1c   : > { %591 = vmatprep.subr.bf16.mxu0 %v2062_v24  ;;  %1968 = vmatprep.subr.bf16.mxu1 %v2064_v25  ;;  %v2120_v8 = vld [vmem:[%s2747_s1 + $0xac] ss:$12 sps:$4 sm:$0xff]   ;;  %v2125_v10 = vld [vmem:[%s2747_s1 + $0xc8] ss:$12 sps:$4 sm:$0xff]   ;;  %v2124_v12 = vld [vmem:[%s2747_s1 + $0xc4] ss:$12 sps:$4 sm:$0xff]  }
  0x1d   : > { %v2118_v11 = vld [vmem:[%s2747_s1 + $0xa8] ss:$12 sps:$4 sm:$0xff]   ;;  %v2130_v14 = vld [vmem:[%s2747_s1 + $0xe0] ss:$12 sps:$4 sm:$0xff]   ;;  %v2135_v18 = vld [vmem:[%s2747_s1 + $0xf8] ss:$12 sps:$4 sm:$0xff]  }
  0x1e   : > { %v2126_v13 = vld [vmem:[%s2747_s1 + $0x8] ss:$12 sps:$4 sm:$0xff]   ;;  %v2122_v15 = vld [vmem:[%s2747_s1 + $0xc0] ss:$12 sps:$4 sm:$0xff]   ;;  %v2127_v19 = vld [vmem:[%s2747_s1 + $0xd8] ss:$12 sps:$4 sm:$0xff]  }
  0x1f   : > { %592 = vmatpush1.bf16.msra.mxu0 %v2065_v26  ;;  %1969 = vmatpush3.bf16.msra.mxu1 %v2066_v27  ;;  %v2129_v16 = vld [vmem:[%s2747_s1 + $0xdc] ss:$12 sps:$4 sm:$0xff]   ;;  %v2131_v17 = vld [vmem:[%s2747_s1 + $0x20] ss:$12 sps:$4 sm:$0xff]   ;;  %v2136_v21 = vld [vmem:[%s2747_s1 + $0x38] ss:$12 sps:$4 sm:$0xff]  }
  0x20   : > { %593 = vmatprep.subr.bf16.mxu0 %v2067_v28  ;;  %1970 = vmatprep.subr.bf16.mxu1 %v2069_v29  ;;  %v2134_v20 = vld [vmem:[%s2747_s1 + $0xf4] ss:$12 sps:$4 sm:$0xff]   ;;  %v2140_v22 = vld [vmem:[%s2747_s1 + $0x110] ss:$12 sps:$4 sm:$0xff]   ;;  %v2139_v24 = vld [vmem:[%s2747_s1 + $0x10c] ss:$12 sps:$4 sm:$0xff]  }
  0x21   : > { %v2132_v23 = vld [vmem:[%s2747_s1 + $0xf0] ss:$12 sps:$4 sm:$0xff]   ;;  %v2145_v26 = vld [vmem:[%s2747_s1 + $0x128] ss:$12 sps:$4 sm:$0xff]   ;;  %v2150_v30 = vld [vmem:[%s2747_s1 + $0x140] ss:$12 sps:$4 sm:$0xff]  }
  0x22   : > { %v2141_v25 = vld [vmem:[%s2747_s1 + $0x50] ss:$12 sps:$4 sm:$0xff]   ;;  %v2137_v27 = vld [vmem:[%s2747_s1 + $0x108] ss:$12 sps:$4 sm:$0xff]   ;;  %v2147_v37 = vld [vmem:[%s2747_s1 + $0x138] ss:$12 sps:$4 sm:$0xff]  }
  0x23   : > { %594 = vmatpush1.bf16.msra.mxu0 %v2070_v31  ;;  %1971 = vmatpush3.bf16.msra.mxu1 %v2071_v34  ;;  %v2144_v28 = vld [vmem:[%s2747_s1 + $0x124] ss:$12 sps:$4 sm:$0xff]   ;;  %v2146_v29 = vld [vmem:[%s2747_s1 + $0x68] ss:$12 sps:$4 sm:$0xff]   ;;  %v2142_v31 = vld [vmem:[%s2747_s1 + $0x120] ss:$12 sps:$4 sm:$0xff]  }
  0x24   : > { %595 = vmatprep.subr.bf16.mxu0 %v2072_v35  ;;  %918 = vmatprep.subr.bf16.mxu1 %v2078_v36  ;;  %v2149_v34 = vld [vmem:[%s2747_s1 + $0x13c] ss:$12 sps:$4 sm:$0xff]   ;;  %v2151_v35 = vld [vmem:[%s2747_s1 + $0x80] ss:$12 sps:$4 sm:$0xff]   ;;  %v2155_v36 = vld [vmem:[%s2747_s1 + $0x158] ss:$12 sps:$4 sm:$0xff]  }
  0x25   : > { %v2154_v38 = vld [vmem:[%s2747_s1 + $0x154] ss:$12 sps:$4 sm:$0xff]   ;;  %v2156_v39 = vld [vmem:[%s2747_s1 + $0x98] ss:$12 sps:$4 sm:$0xff]   ;;  %v2160_v40 = vld [vmem:[%s2747_s1 + $0x170] ss:$12 sps:$4 sm:$0xff]  }
  0x26   : > { %653 = vmatmul.mubr.bf16.vlgmr.msra.gmra.mrb[0].mxu1 %v2393_v47  ;;  %v2152_v41 = vld [vmem:[%s2747_s1 + $0x150] ss:$12 sps:$4 sm:$0xff]   ;;  %v2157_v45 = vld [vmem:[%s2747_s1 + $0x168] ss:$12 sps:$4 sm:$0xff]   ;;  %vm1599_vm5 = vsmask.f32 1280 }
  0x27   : > { %596 = vmatpush1.bf16.msra.mxu0 %v2079_v42  ;;  %919 = vmatpush1.bf16.msra.mxu1 %v2076_v46  ;;  %v2159_v42 = vld [vmem:[%s2747_s1 + $0x16c] ss:$12 sps:$4 sm:$0xff]   ;;  %v2161_v43 = vld [vmem:[%s2747_s1 + $0xb0] ss:$12 sps:$4 sm:$0xff]   ;;  %v2165_v46 = vld [vmem:[%s2747_s1 + $0x3c8] ss:$12 sps:$4 sm:$0xff]  }
  0x28   : > { %597 = vmatprep.subr.bf16.mxu0 %v2080_v44  ;;  %920 = vmatprep.subr.bf16.mxu1 %v2084_v48  ;;  %v2164_v44 = vld [vmem:[%s2747_s1 + $0x304] ss:$12 sps:$4 sm:$0xff]   ;;  %v1065_v48 = vrot.slane %v2369_v33, 1  ;;  %s1955_s7 = sshll.u32 %s2751_s13, 2  ;;  %vm1580_vm6 = vcmask 1041409   ;;  %vm1583_vm7 = vcmask 1042434   ;;  %vm1600_vm10 = vmand %vm1598_vm4, %vm1599_vm5 }
  0x29   : > { %950 = vmatprep.mubr.bf16.mxu1 %v2369_v33  ;;  %vm1601_vm8 = vcmask 519170   ;;  %vm1602_vm9 = vsmask.f32 3328  ;;  %s170_s10 = scalar_lea.vmem %s2749_s3, %s1955_s7 }
  0x2a   : > { %vm1603_vm11 = vmand %vm1601_vm8, %vm1602_vm9 }
  0x2b   : > { %598 = vmatpush1.bf16.msra.mxu0 %v2085_v49  ;;  %921 = vmatpush1.bf16.msra.mxu1 %v2082_v51  ;;  %v2169_v49 = vld [vmem:[%s2747_s1 + $0x31c] ss:$12 sps:$4 sm:$0xff]   ;;  %v2170_v51 = vld [vmem:[%s2747_s1 + $0x3e0] ss:$12 sps:$4 sm:$0xff]   ;;  %vm1604_vm12 = vmor %vm1603_vm11, %vm1600_vm10 }
  0x2c   : > { %599 = vmatprep.subr.bf16.mxu0 %v2086_v50  ;;  %922 = vmatprep.subr.bf16.mxu1 %v2090_v52  ;;  %v2166_v50 = vld [vmem:[%s2747_s1 + $0x308] ss:$12 sps:$4 sm:$0xff]  }
  0x2d   : > { %v2174_v52 = vld [vmem:[%s2747_s1 + $0x334] ss:$12 sps:$4 sm:$0xff]  }
  0x2f   : > { %600 = vmatpush1.bf16.msra.mxu0 %v2091_v53  ;;  %923 = vmatpush1.bf16.msra.mxu1 %v2088_v55  ;;  %v2171_v53 = vld [vmem:[%s2747_s1 + $0x320] ss:$12 sps:$4 sm:$0xff]   ;;  %v2172_v55 = vld [vmem:[%s2747_s1 + $0x330] ss:$12 sps:$4 sm:$0xff]  }
  0x30   : > { %601 = vmatprep.subr.bf16.mxu0 %v2092_v54  ;;  %924 = vmatprep.subr.bf16.mxu1 %v2096_v56  ;;  %v2175_v54 = vld [vmem:[%s2747_s1 + $0x3f8] ss:$12 sps:$4 sm:$0xff]  }
  0x31   : > { %v2179_v56 = vld [vmem:[%s2747_s1 + $0x34c] ss:$12 sps:$4 sm:$0xff]  }
  0x33   : > { %602 = vmatpush1.bf16.msra.mxu0 %v2097_v57  ;;  %925 = vmatpush1.bf16.msra.mxu1 %v2094_v59  ;;  %v2176_v57 = vld [vmem:[%s2747_s1 + $0x338] ss:$12 sps:$4 sm:$0xff]   ;;  %v2177_v59 = vld [vmem:[%s2747_s1 + $0x348] ss:$12 sps:$4 sm:$0xff]  }
  0x34   : > { %603 = vmatprep.subr.bf16.mxu0 %v2098_v58  ;;  %926 = vmatprep.subr.bf16.mxu1 %v2102_v60  ;;  %v2180_v58 = vld [vmem:[%s2747_s1 + $0x410] ss:$12 sps:$4 sm:$0xff]  }
  0x35   : > { %v2184_v60 = vld [vmem:[%s2747_s1 + $0x364] ss:$12 sps:$4 sm:$0xff]  }
  0x37   : > { %604 = vmatpush1.bf16.msra.mxu0 %v2103_v61  ;;  %927 = vmatpush1.bf16.msra.mxu1 %v2100_v63  ;;  %v2181_v61 = vld [vmem:[%s2747_s1 + $0x350] ss:$12 sps:$4 sm:$0xff]   ;;  %v2182_v63 = vld [vmem:[%s2747_s1 + $0x360] ss:$12 sps:$4 sm:$0xff]  }
  0x38   : > { %605 = vmatprep.subr.bf16.mxu0 %v2104_v62  ;;  %928 = vmatprep.subr.bf16.mxu1 %v2108_v0  ;;  %v2185_v62 = vld [vmem:[%s2747_s1 + $0x428] ss:$12 sps:$4 sm:$0xff]  }
  0x39   : > { %v2189_v0 = vld [vmem:[%s2747_s1 + $0x37c] ss:$12 sps:$4 sm:$0xff]  }
  0x3b   : > { %606 = vmatpush1.bf16.msra.mxu0 %v2109_v1  ;;  %929 = vmatpush1.bf16.msra.mxu1 %v2106_v3  ;;  %v2186_v1 = vld [vmem:[%s2747_s1 + $0x368] ss:$12 sps:$4 sm:$0xff]   ;;  %v2187_v3 = vld [vmem:[%s2747_s1 + $0x378] ss:$12 sps:$4 sm:$0xff]  }
  0x3c   : > { %607 = vmatprep.subr.bf16.mxu0 %v2110_v2  ;;  %930 = vmatprep.subr.bf16.mxu1 %v2114_v4  ;;  %v2190_v2 = vld [vmem:[%s2747_s1 + $0x440] ss:$12 sps:$4 sm:$0xff]  }
  0x3d   : > { %v2194_v4 = vld [vmem:[%s2747_s1 + $0x394] ss:$12 sps:$4 sm:$0xff]  }
  0x3f   : > { %608 = vmatpush1.bf16.msra.mxu0 %v2115_v5  ;;  %931 = vmatpush1.bf16.msra.mxu1 %v2112_v7  ;;  %v2191_v5 = vld [vmem:[%s2747_s1 + $0x380] ss:$12 sps:$4 sm:$0xff]   ;;  %v2192_v7 = vld [vmem:[%s2747_s1 + $0x390] ss:$12 sps:$4 sm:$0xff]  }
  0x40   : > { %609 = vmatprep.subr.bf16.mxu0 %v2116_v6  ;;  %932 = vmatprep.subr.bf16.mxu1 %v2120_v8  ;;  %v2195_v6 = vld [vmem:[%s2747_s1 + $0x458] ss:$12 sps:$4 sm:$0xff]  }
  0x41   : > { %v2199_v8 = vld [vmem:[%s2747_s1 + $0x3ac] ss:$12 sps:$4 sm:$0xff]  }
  0x43   : > { %610 = vmatpush1.bf16.msra.mxu0 %v2121_v9  ;;  %933 = vmatpush1.bf16.msra.mxu1 %v2118_v11  ;;  %v2196_v9 = vld [vmem:[%s2747_s1 + $0x398] ss:$12 sps:$4 sm:$0xff]   ;;  %v2197_v11 = vld [vmem:[%s2747_s1 + $0x3a8] ss:$12 sps:$4 sm:$0xff]  }
  0x44   : > { %1978 = vmatprep.subr.bf16.mxu0 %v2125_v10  ;;  %934 = vmatprep.subr.bf16.mxu1 %v2124_v12  ;;  %v2200_v10 = vld [vmem:[%s2747_s1 + $0x470] ss:$12 sps:$4 sm:$0xff]  }
  0x45   : > { %v2204_v12 = vld [vmem:[%s2747_s1 + $0x3c4] ss:$12 sps:$4 sm:$0xff]  }
  0x46   : > { %612 = vmatmul.mubr.bf16.vlgmr.msra.gmra.mrb[0].mxu0 %v2393_v47  ;;  %v2162_v47 = vld [vmem:[%s2747_s1 + $0x300] ss:$12 sps:$4 sm:$0xff]  }
  0x47   : > { %1979 = vmatpush3.bf16.msra.mxu0 %v2126_v13  ;;  %991 = vmatprep.mubr.bf16.mxu0 %v2369_v33  ;;  %v2167_v33 = vld [vmem:[%s2747_s1 + $0x318] ss:$12 sps:$4 sm:$0xff]   ;;  %v2201_v13 = vld [vmem:[%s2747_s1 + $0x3b0] ss:$12 sps:$4 sm:$0xff]  }
  0x48   : > { %1980 = vmatprep.subr.bf16.mxu0 %v2130_v14  ;;  %935 = vmatpush1.bf16.msra.mxu1 %v2122_v15  ;;  %v2202_v14 = vld [vmem:[%s2747_s1 + $0x3c0] ss:$12 sps:$4 sm:$0xff]   ;;  %v1064_v15 = vrot.slane %v2367_v32, 1 }
  0x49   : > { %936 = vmatprep.subr.bf16.mxu1 %v2129_v16  ;;  %v2207_v16 = vld [vmem:[%s2747_s1 + $0x3dc] ss:$12 sps:$4 sm:$0xff]  }
  0x4b   : > { %1981 = vmatpush3.bf16.msra.mxu0 %v2131_v17  ;;  %v2205_v17 = vld [vmem:[%s2747_s1 + $0x3d8] ss:$12 sps:$4 sm:$0xff]  }
  0x4c   : > { %1982 = vmatprep.subr.bf16.mxu0 %v2135_v18  ;;  %937 = vmatpush1.bf16.msra.mxu1 %v2127_v19  ;;  %v2210_v18 = vld [vmem:[%s2747_s1 + $0x3f4] ss:$12 sps:$4 sm:$0xff]   ;;  %v2213_v19 = vld [vmem:[%s2747_s1 + $0x40c] ss:$12 sps:$4 sm:$0xff]  }
  0x4d   : > { %938 = vmatprep.subr.bf16.mxu1 %v2134_v20  ;;  %v2211_v20 = vld [vmem:[%s2747_s1 + $0x408] ss:$12 sps:$4 sm:$0xff]  }
  0x4f   : > { %1983 = vmatpush3.bf16.msra.mxu0 %v2136_v21  ;;  %v2216_v21 = vld [vmem:[%s2747_s1 + $0x424] ss:$12 sps:$4 sm:$0xff]  }
  0x50   : > { %1984 = vmatprep.subr.bf16.mxu0 %v2140_v22  ;;  %939 = vmatpush1.bf16.msra.mxu1 %v2132_v23  ;;  %v2214_v22 = vld [vmem:[%s2747_s1 + $0x420] ss:$12 sps:$4 sm:$0xff]   ;;  %v2219_v23 = vld [vmem:[%s2747_s1 + $0x43c] ss:$12 sps:$4 sm:$0xff]  }
  0x51   : > { %940 = vmatprep.subr.bf16.mxu1 %v2139_v24  ;;  %v2217_v24 = vld [vmem:[%s2747_s1 + $0x438] ss:$12 sps:$4 sm:$0xff]  }
  0x53   : > { %1985 = vmatpush3.bf16.msra.mxu0 %v2141_v25  ;;  %v2222_v25 = vld [vmem:[%s2747_s1 + $0x454] ss:$12 sps:$4 sm:$0xff]  }
  0x54   : > { %1986 = vmatprep.subr.bf16.mxu0 %v2145_v26  ;;  %941 = vmatpush1.bf16.msra.mxu1 %v2137_v27  ;;  %v2220_v26 = vld [vmem:[%s2747_s1 + $0x450] ss:$12 sps:$4 sm:$0xff]   ;;  %v2225_v27 = vld [vmem:[%s2747_s1 + $0x46c] ss:$12 sps:$4 sm:$0xff]  }
  0x55   : > { %942 = vmatprep.subr.bf16.mxu1 %v2144_v28  ;;  %v2223_v28 = vld [vmem:[%s2747_s1 + $0x468] ss:$12 sps:$4 sm:$0xff]  }
  0x57   : > { %1987 = vmatpush3.bf16.msra.mxu0 %v2146_v29  ;;  %v1410_v29 = vlaneseq }
  0x58   : > { %1988 = vmatprep.subr.bf16.mxu0 %v2150_v30  ;;  %943 = vmatpush1.bf16.msra.mxu1 %v2142_v31 }
  0x59   : > { %944 = vmatprep.subr.bf16.mxu1 %v2149_v34  ;;  %v2724_v30 = vshrl.u32 %v1410_v29, 7 }
  0x5b   : > { %1989 = vmatpush3.bf16.msra.mxu0 %v2151_v35  ;;  %v2727_v31 = vsub.s32 0, %v2724_v30  ;;  %v1408_v35 = vld [vmem:[%s2748_s2] sm:$0x7] }
  0x5c   : > { %1990 = vmatprep.subr.bf16.mxu0 %v2155_v36  ;;  %945 = vmatpush1.bf16.msra.mxu1 %v2147_v37 }
  0x5d   : > { %946 = vmatprep.subr.bf16.mxu1 %v2154_v38  ;;  %v1413_v37 = vrot.slane %v1408_v35, %v2727_v31 }
  0x5f   : > { %1991 = vmatpush3.bf16.msra.mxu0 %v2156_v39 }
  0x60   : > { %1992 = vmatprep.subr.bf16.mxu0 %v2160_v40  ;;  %947 = vmatpush1.bf16.msra.mxu1 %v2152_v41 }
  0x61   : > { %948 = vmatprep.subr.bf16.mxu1 %v2159_v42 }
  0x63   : > { %1993 = vmatpush3.bf16.msra.mxu0 %v2161_v43 }
  0x64   : > { %1324 = vmatprep.subr.bf16.mxu0 %v2164_v44  ;;  %949 = vmatpush1.bf16.msra.mxu1 %v2157_v45 }
  0x65   : > { %2000 = vmatprep.subr.bf16.mxu1 %v2165_v46 }
  0x66   : > { %992 = vmatmul.mubr.bf16.vlgmr.msra.gmra.mrb[4].mxu0 %v2367_v32 }
  0x67   : > { %1325 = vmatpush1.bf16.msra.mxu0 %v2162_v47  ;;  %1356 = vmatprep.mubr.bf16.mxu0 %v1065_v48 }
  0x68   : > { %951 = vmatmul.mubr.bf16.vlgmr.msra.gmra.mrb[4].mxu1 %v2367_v32  ;;  %1326 = vmatprep.subr.bf16.mxu0 %v2169_v49  ;;  %v2208_v32 = vld [vmem:[%s2747_s1 + $0x3f0] ss:$12 sps:$4 sm:$0xff]  }
  0x69   : > { %2001 = vmatpush3.bf16.msra.mxu1 %v2166_v50  ;;  %1397 = vmatprep.mubr.bf16.mxu1 %v1065_v48 }
  0x6a   : > { %2002 = vmatprep.subr.bf16.mxu1 %v2170_v51 }
  0x6b   : > { %1327 = vmatpush1.bf16.msra.mxu0 %v2167_v33 }
  0x6c   : > { %1328 = vmatprep.subr.bf16.mxu0 %v2174_v52 }
  0x6d   : > { %2003 = vmatpush3.bf16.msra.mxu1 %v2171_v53 }
  0x6e   : > { %2004 = vmatprep.subr.bf16.mxu1 %v2175_v54 }
  0x6f   : > { %1329 = vmatpush1.bf16.msra.mxu0 %v2172_v55 }
  0x70   : > { %1330 = vmatprep.subr.bf16.mxu0 %v2179_v56 }
  0x71   : > { %2005 = vmatpush3.bf16.msra.mxu1 %v2176_v57 }
  0x72   : > { %2006 = vmatprep.subr.bf16.mxu1 %v2180_v58 }
  0x73   : > { %1331 = vmatpush1.bf16.msra.mxu0 %v2177_v59 }
  0x74   : > { %1332 = vmatprep.subr.bf16.mxu0 %v2184_v60 }
  0x75   : > { %2007 = vmatpush3.bf16.msra.mxu1 %v2181_v61 }
  0x76   : > { %2008 = vmatprep.subr.bf16.mxu1 %v2185_v62  ;;  %v1420_v62 = vsub.s32 2, %v2724_v30 }
  0x77   : > { %1333 = vmatpush1.bf16.msra.mxu0 %v2182_v63  ;;  %v1416_v63 = vsub.s32 1, %v2724_v30 }
  0x78   : > { %1334 = vmatprep.subr.bf16.mxu0 %v2189_v0  ;;  %v1421_v0 = vrot.slane %v1408_v35, %v1420_v62 }
  0x79   : > { %2009 = vmatpush3.bf16.msra.mxu1 %v2186_v1 }
  0x7a   : > { %2010 = vmatprep.subr.bf16.mxu1 %v2190_v2  ;;  %v1417_v2 = vrot.slane %v1408_v35, %v1416_v63 }
  0x7b   : > { %1335 = vmatpush1.bf16.msra.mxu0 %v2187_v3 }
  0x7c   : > { %1336 = vmatprep.subr.bf16.mxu0 %v2194_v4 }
  0x7d   : > { %2011 = vmatpush3.bf16.msra.mxu1 %v2191_v5 }
  0x7e   : > { %2012 = vmatprep.subr.bf16.mxu1 %v2195_v6 }
  0x7f   : > { %1337 = vmatpush1.bf16.msra.mxu0 %v2192_v7 }
  0x80   : > { %1338 = vmatprep.subr.bf16.mxu0 %v2199_v8 }
  0x81   : > { %2013 = vmatpush3.bf16.msra.mxu1 %v2196_v9 }
  0x82   : > { %2014 = vmatprep.subr.bf16.mxu1 %v2200_v10 }
  0x83   : > { %1339 = vmatpush1.bf16.msra.mxu0 %v2197_v11 }
  0x84   : > { %1340 = vmatprep.subr.bf16.mxu0 %v2204_v12 }
  0x85   : > { %2015 = vmatpush3.bf16.msra.mxu1 %v2201_v13 }
  0x87   : > { %1341 = vmatpush1.bf16.msra.mxu0 %v2202_v14 }
  0x88   : > { %1398 = vmatmul.mubr.bf16.vlgmr.msra.gmra.mrb[8].mxu1 %v1064_v15  ;;  %1342 = vmatprep.subr.bf16.mxu0 %v2207_v16 }
  0x8b   : > { %1343 = vmatpush1.bf16.msra.mxu0 %v2205_v17 }
  0x8c   : > { %1344 = vmatprep.subr.bf16.mxu0 %v2210_v18 }
  0x8f   : > { %1345 = vmatpush1.bf16.msra.mxu0 %v2208_v32 }
  0x90   : > { %1346 = vmatprep.subr.bf16.mxu0 %v2213_v19 }
  0x93   : > { %1347 = vmatpush1.bf16.msra.mxu0 %v2211_v20 }
  0x94   : > { %1348 = vmatprep.subr.bf16.mxu0 %v2216_v21 }
  0x97   : > { %1349 = vmatpush1.bf16.msra.mxu0 %v2214_v22 }
  0x98   : > { %1350 = vmatprep.subr.bf16.mxu0 %v2219_v23 }
  0x9b   : > { %1351 = vmatpush1.bf16.msra.mxu0 %v2217_v24 }
  0x9c   : > { %1352 = vmatprep.subr.bf16.mxu0 %v2222_v25 }
  0x9f   : > { %1353 = vmatpush1.bf16.msra.mxu0 %v2220_v26 }
  0xa0   : > { %1354 = vmatprep.subr.bf16.mxu0 %v2225_v27 }
  0xa3   : > { %1355 = vmatpush1.bf16.msra.mxu0 %v2223_v28 }
  0xa6   : > { %1357 = vmatmul.mubr.bf16.vlgmr.msra.gmra.mrb[8].mxu0 %v1064_v15  ;;  %v2235_v15 = vmov 1983009808  }
  0xa7   : > { %v1454_v16 = vunpack.c.l.s4 %v2235_v15 }
  0xa9   : > { %v1455_v32 = vunpack.c.0.s8 %v1454_v16 }
  0xab   : > { %v1458_v23 = vsub.s32 %v1455_v32, %v2724_v30 }
  0xf9   : > { %v1972_v34 = vpop.f32.mrb[0].mxu1 }
  0xfa   : > { %v1973_v36 = vpop.f32.mrb[1].mxu1 }
  0xfb   : > { %v1974_v38 = vadd.f32 %v1973_v36, %v1972_v34  ;;  %v1975_v39 = vpop.f32.mrb[2].mxu1 }
  0xfc   : > { %v1976_v40 = vpop.f32.mrb[3].mxu1 }
 0x119   : > { %v613_v41 = vpop.f32.mrb[0].mxu0 }
 0x11a   : > { %v615_v42 = vpop.f32.mrb[1].mxu0 }
 0x11b   : > { %v617_v43 = vpop.f32.mrb[2].mxu0 }
 0x11c   : > { %v618_v44 = vpop.f32.mrb[3].mxu0 }
 0x139   : > { %v1994_v45 = vpop.f32.mrb[4].mxu0 }
 0x13a   : > { %v1995_v46 = vpop.f32.mrb[5].mxu0 }
 0x13b   : > { %v952_v47 = vpop.f32.mrb[4].mxu1  ;;  %v1996_v48 = vadd.f32 %v1995_v46, %v1994_v45  ;;  %v1997_v49 = vpop.f32.mrb[6].mxu0 }
 0x13c   : > { %v953_v50 = vadd.f32 %v952_v47, %v613_v41  ;;  %v954_v51 = vpop.f32.mrb[5].mxu1  ;;  %v1998_v33 = vpop.f32.mrb[7].mxu0 }
 0x13d   : > { %v955_v52 = vadd.f32 %v954_v51, %v615_v42  ;;  %v994_v53 = vadd.f32 %v1996_v48, %v1974_v38  ;;  %v956_v54 = vpop.f32.mrb[6].mxu1 }
 0x13e   : > { %v957_v55 = vpop.f32.mrb[7].mxu1 }
 0x15b   : > { %v2016_v56 = vpop.f32.mrb[8].mxu1 }
 0x15c   : > { %v2017_v57 = vpop.f32.mrb[9].mxu1 }
 0x15d   : > { %v2018_v58 = vadd.f32 %v2017_v57, %v2016_v56  ;;  %v2019_v59 = vpop.f32.mrb[10].mxu1 }
 0x15e   : > { %v2020_v60 = vpop.f32.mrb[11].mxu1 }
 0x15f   : > { %v1407_v61 = vadd.f32 %v2018_v58, %v994_v53 }
 0x161   : > { %v1427_v9 = vadd.f32 %v1421_v0, %v1407_v61 }
 0x163   : > { %v1433_v13 = vmul.f32 0.01, %v1427_v9  ;;  %vm1430_vm1 = vcmp.gt.f32.partialorder %v1427_v9, 0.0 }
 0x165   : > { %v1436_v14 = vsel %vm1430_vm1, %v1427_v9, %v1433_v13 }
 0x179   : > { %v1358_v1 = vpop.f32.mrb[8].mxu0 }
 0x17a   : > { %v1405_v3 = vadd.f32 %v1358_v1, %v953_v50  ;;  %v1360_v4 = vpop.f32.mrb[9].mxu0 }
 0x17b   : > { %v1406_v5 = vadd.f32 %v1360_v4, %v955_v52  ;;  %v1362_v6 = vpop.f32.mrb[10].mxu0 }
 0x17c   : > { %v1425_v7 = vadd.f32 %v1413_v37, %v1405_v3  ;;  %v1363_v8 = vpop.f32.mrb[11].mxu0  ;;  %v1605_v3 = vld [vmem:[%s170_s10] sm:$0xf] }
 0x17d   : > { %v1426_v10 = vadd.f32 %v1417_v2, %v1406_v5 }
 0x17e   : > { %v1431_v18 = vmul.f32 0.01, %v1425_v7  ;;  %vm1428_vm2 = vcmp.gt.f32.partialorder %v1425_v7, 0.0 }
 0x17f   : > { %vm1429_vm0 = vcmp.gt.f32.partialorder %v1426_v10, 0.0  ;;  %v1432_v11 = vmul.f32 0.01, %v1426_v10 }
 0x180   : > { %v1434_v20 = vsel %vm1428_vm2, %v1425_v7, %v1431_v18 }
 0x181   : > { %v1435_v12 = vsel %vm1429_vm0, %v1426_v10, %v1432_v11 }
 0x182   : > { %1439 = vrot.lane.b32.xlu0 %v1435_v12, %s2234_s6 }
 0x186   : > { %1441 = vrot.lane.b32.xlu0 %v1436_v14, %s2234_s6 }
 0x1f4   : > { %v1440_v17 = vpop.permute.xlu0 %1439 }
 0x1f8   : > { %v1442_v19 = vpop.permute.xlu0 %1441 }
 0x1f9   : > { %v1444_v21 = vsel %vm1443_vm3, %v1440_v17, %v1442_v19  ;;  %v1448_v22 = vmax.f32 %v1435_v12, %v1442_v19 }
 0x1fa   : > { %v1447_v24 = vmax.f32 %v1434_v20, %v1444_v21 }
 0x1fc   : > { %v1451_v25 = vcombine.low %v1447_v24, %v1448_v22  ;;  %v1452_v26 = vcombine.high %v1447_v24, %v1448_v22 }
 0x1fe   : > { %v1459_v27 = vrot.slane %v1451_v25, %v1458_v23  ;;  %v1466_v28 = vrot.slane %v1452_v26, %v1458_v23 }
 0x200   : > { %v1467_v29 = vcombine.high %v1459_v27, %v1459_v27  ;;  %v1946_v34 = vrot.slane %v1459_v27, 9  ;;  %v1948_v35 = vrot.slane %v1466_v28, 9 }
 0x202   : > { %v1947_v36 = vrot.slane %v1467_v29, 9  ;;  %v1480_v37 = vmax.f32 %v1459_v27, %v1946_v34  ;;  %v1482_v38 = vmax.f32 %v1466_v28, %v1948_v35 }
 0x204   : > { %v1481_v39 = vmax.f32 %v1467_v29, %v1947_v36  ;;  %v1489_v40 = vrot.slane %v1480_v37, %v2727_v31  ;;  %v1493_v41 = vrot.slane %v1480_v37, %v1420_v62  ;;  %v1505_v42 = vrot.slane %v1482_v38, %v2727_v31 }
 0x205   : > { %v1509_v43 = vrot.slane %v1482_v38, %v1420_v62 }
 0x206   : > { %v1497_v30 = vrot.slane %v1481_v39, %v2727_v31  ;;  %v1501_v44 = vrot.slane %v1481_v39, %v1420_v62  ;;  %v1949_v45 = vpack.c.bf16 %v1493_v41, %v1489_v40 }
 0x207   : > { %v1951_v46 = vpack.c.bf16 %v1509_v43, %v1505_v42 }
 0x208   : > { %v1535_v47 = vrot.slane %v1949_v45, %v1458_v23  ;;  %v1950_v48 = vpack.c.bf16 %v1501_v44, %v1497_v30 }
 0x209   : > { %v1551_v49 = vrot.slane %v1951_v46, %v1458_v23 }
 0x20a   : > { %v1543_v50 = vrot.slane %v1950_v48, %v1458_v23  ;;  %v1558_v51 = vrot.slane %v1535_v47, %v1458_v23 }
 0x20b   : > { %v1572_v33 = vrot.slane %v1551_v49, %v1458_v23 }
 0x20c   : > { %v1565_v52 = vrot.slane %v1543_v50, %v1458_v23  ;;  %v1573_v31 = vunpack.c.l.b16 %v1558_v51  ;;  %v1574_v57 = vunpack.c.h.b16 %v1558_v51 }
 0x20d   : > { %v1577_v53 = vunpack.c.l.b16 %v1572_v33  ;;  %v1578_v54 = vunpack.c.h.b16 %v1572_v33 }
 0x20e   : > { %v1575_v55 = vunpack.c.l.b16 %v1565_v52  ;;  %v1576_v56 = vunpack.c.h.b16 %v1565_v52 }
 0x20f   : > { %v1582_v60 = vrot.slane %v1577_v53, 6  ;;  %v1587_v61 = vrot.slane %v1578_v54, 6 }
 0x210   : > { %v1579_v58 = vrot.slane %v1575_v55, 7  ;;  %v1585_v59 = vrot.slane %v1576_v56, 7 }
 0x212   : > { %v1581_v62 = vsel %vm1580_vm6, %v1579_v58, %v1573_v31  ;;  %v1586_v63 = vsel %vm1580_vm6, %v1585_v59, %v1574_v57 }
 0x213   : > { %v1584_v0 = vsel %vm1583_vm7, %v1582_v60, %v1581_v62  ;;  %v1588_v1 = vsel %vm1583_vm7, %v1587_v61, %v1586_v63 }
 0x214   : > { %v1589_v2 = vpack.c.b16 %v1588_v1, %v1584_v0 }
 0x216   : > { %v1596_v4 = vrot.slane %v1589_v2, %v1458_v23 }
 0x218   : > { %v1606_v5 = vsel %vm1604_vm12, %v1596_v4, %v1605_v3 }
 0x219   : > { %1607 = vst [vmem:[%s170_s10] sm:$0xf] %v1606_v5 }
 0x21a PF: > { %s13_s12 = sadd.s32 1, %s2232_s12  }
 0x21b   : > { %p10_p4 = scmp.ge.s32.totalorder %s13_s12, 4  }
 0x21d   :  { %12 = sbr.rel (!%p10_p4) target bundleno = 1 (0x1), region = 64 }

// kernel: cifar_cnn_forward.5
= control target key start
LH: loop header
LB: loop body
LE: loop exit
PB: predicated region body
PF: predicated region fallthrough
CT: control target
= control target key end

     0   :  { %8 = vsyncpa [#allocation3], 0  ;;  %s3447_s12 = smov 0   ;;  %s3578_s0 = inlined_call_operand.vmem [shape: bf16[2,16,256], index: 0, kind: input, shape index: {}]   ;;  %s3579_s1 = inlined_call_operand.hbm [shape: bf16[5,256,384], index: 1, kind: input, shape index: {}]   ;;  %s3580_s2 = inlined_call_operand.vmem [shape: f32[1,384], index: 2, kind: input, shape index: {}]   ;;  %s3581_s3 = inlined_call_operand.vmem [shape: bf16[2,8,256], index: 3, kind: output, shape index: {}]  }
   0x1 LB: > { %s3453_s13 = sadd.s32 4294967295, %s3419_s12   ;;  %p2632_p0 = scmp.ge.s32.totalorder %s3419_s12, 1  ;;  %s3419_s12 = sphi %s3447_s12, %s14_s12  }
   0x2   : > { %p113_p1 = scmp.lt.s32.totalorder %s3419_s12, 3  ;;  %s3421_s14 = smov [#allocation2]  }
   0x3   : > { %s125_s15 = sshll.u32 %s3421_s14, 4  ;;  %p3582_p3 = scmp.eq.s32.totalorder %s3453_s13, 0  ;;  %s126_s15 = int_to_ptr.vmem [resolvable:$true] %s125_s15 }
   0x4   : > { %p3457_p2 = pnand %p2632_p0, %p113_p1  ;;  %s3381_s20 = scalar_lea.hbm %s3579_s1, 30720 }
   0x5   : > { %p3382_p6 = scmp.ne.s32.totalorder %s3579_s1, %s3381_s20  ;;  %p3388_p10 = scmp.lt.u32.totalorder %s3381_s20, %s3579_s1 }
   0x6   : > { %s3584_s16 = scalar_select %p3457_p2, 1, 0 }
   0x7   : > { %p3035_p4 = pneg %p3457_p2 }
   0x9   : > { %p3466_p5 = pnand %p3582_p3, %p3035_p4 }
   0xb   : > { %p3383_p7 = pneg %p3466_p5 }
   0xd   : > { %p3384_p8 = pnand %p3383_p7, %p3382_p6 }
   0xf   : > { %p3385_p9 = pneg %p3384_p8 }
  0x11   : > { %p3390_p11 = pnand %p3388_p10, %p3385_p9 }
  0x13   : > { %3393 = shalt.err (!%p3390_p11)
}
  0x14   : > { %s3394_s25 = scalar_lea.vmem %s126_s15, 30720  ;;  %p3402_p1 = scmp.lt.s32.totalorder %s126_s15, %s126_s15 }
  0x15   : > { %p3395_p12 = scmp.ne.s32.totalorder %s126_s15, %s3394_s25  ;;  %p3403_p4 = scmp.lt.s32.totalorder %s3394_s25, %s3394_s25 }
  0x17   : > { %p3397_p13 = pnand %p3395_p12, %p3383_p7  ;;  %p3404_p3 = por %p3403_p4, %p3402_p1 }
  0x19   : > { %p3398_p0 = pneg %p3397_p13 }
  0x1b   : > { %p3405_p2 = pnand %p3404_p3, %p3398_p0 }
  0x1d   : > { %3408 = shalt.err (!%p3405_p2)
}
  0x1e   : > { %s3422_s26 = smov 192   ;;  %s3423_s27 = smov 12  }
  0x1f   : > { %3038 = dma.hbm_to_vmem [thread:$0]  (!%p3466_p5), %s3579_s1, 30720, %s126_s15, [#allocation3], %s3422_s26, %s3422_s26, %s3423_s27  }
  0x20   : > { %p3586_p6 = scmp.ne.s32.totalorder %s3584_s16, 0 }
  0x21   : > { %p3587_p8 = scmp.eq.s32.totalorder (!%p3586_p6), %s3453_s13, 0 }
  0x22   : > { %152 = sbr.rel (%p3586_p6) target bundleno = 788 (0x314), region = 32 }
  0x29   : > { %3414 = dma.done.wait (%p3587_p8), [#allocation3], 30720   ;;  %p3588_p7 = pmov %p3587_p8 }
  0x2a   : > { %v3056_v0 = vld [vmem:[#allocation2 + $0x184] ss:$12 sps:$4 sm:$0xff]   ;;  %v3060_v2 = vld [vmem:[#allocation2 + $0x180] ss:$12 sps:$4 sm:$0xff]   ;;  %v3062_v4 = vld [vmem:[#allocation2 + $0x19c] ss:$12 sps:$4 sm:$0xff]  }
  0x2b   : > { %3416 = vsyncadd (%p3588_p7), [#allocation3], 4294936576  ;;  %v3058_v1 = vld [vmem:[#allocation2 + $0x4] ss:$12 sps:$4 sm:$0xff]   ;;  %598 = vmatprep.subr.bf16.mxu1 %v3056_v0  ;;  %v3061_v3 = vld [vmem:[#allocation2] ss:$12 sps:$4 sm:$0xff]  }
  0x2c   : > { %940 = vmatprep.subr.bf16.mxu0 %v3058_v1  ;;  %599 = vmatpush1.bf16.msra.mxu1 %v3060_v2  ;;  %v3064_v5 = vld [vmem:[#allocation2 + $0x1c] ss:$12 sps:$4 sm:$0xff]   ;;  %v3066_v6 = vld [vmem:[#allocation2 + $0x198] ss:$12 sps:$4 sm:$0xff]   ;;  %v3068_v8 = vld [vmem:[#allocation2 + $0x1b4] ss:$12 sps:$4 sm:$0xff]  }
  0x2d   : > { %941 = vmatpush1.bf16.msra.mxu0 %v3061_v3  ;;  %600 = vmatprep.subr.bf16.mxu1 %v3062_v4  ;;  %v3067_v7 = vld [vmem:[#allocation2 + $0x18] ss:$12 sps:$4 sm:$0xff]   ;;  %v3070_v9 = vld [vmem:[#allocation2 + $0x34] ss:$12 sps:$4 sm:$0xff]   ;;  %v3072_v10 = vld [vmem:[#allocation2 + $0x1b0] ss:$12 sps:$4 sm:$0xff]  }
  0x2e   : > { %942 = vmatprep.subr.bf16.mxu0 %v3064_v5  ;;  %v3073_v11 = vld [vmem:[#allocation2 + $0x30] ss:$12 sps:$4 sm:$0xff]   ;;  %v3074_v12 = vld [vmem:[#allocation2 + $0x1cc] ss:$12 sps:$4 sm:$0xff]   ;;  %v3078_v14 = vld [vmem:[#allocation2 + $0x1c8] ss:$12 sps:$4 sm:$0xff]  }
  0x2f   : > { %v3076_v13 = vld [vmem:[#allocation2 + $0x4c] ss:$12 sps:$4 sm:$0xff]   ;;  %v3079_v15 = vld [vmem:[#allocation2 + $0x48] ss:$12 sps:$4 sm:$0xff]   ;;  %v3080_v16 = vld [vmem:[#allocation2 + $0x1e4] ss:$12 sps:$4 sm:$0xff]  }
  0x30   : > { %601 = vmatpush1.bf16.msra.mxu1 %v3066_v6  ;;  %v3082_v17 = vld [vmem:[#allocation2 + $0x64] ss:$12 sps:$4 sm:$0xff]   ;;  %v3084_v18 = vld [vmem:[#allocation2 + $0x1e0] ss:$12 sps:$4 sm:$0xff]   ;;  %v3086_v20 = vld [vmem:[#allocation2 + $0x1fc] ss:$12 sps:$4 sm:$0xff]  }
  0x31   : > { %943 = vmatpush1.bf16.msra.mxu0 %v3067_v7  ;;  %602 = vmatprep.subr.bf16.mxu1 %v3068_v8  ;;  %v3085_v19 = vld [vmem:[#allocation2 + $0x60] ss:$12 sps:$4 sm:$0xff]   ;;  %v3088_v21 = vld [vmem:[#allocation2 + $0x7c] ss:$12 sps:$4 sm:$0xff]   ;;  %v3090_v22 = vld [vmem:[#allocation2 + $0x1f8] ss:$12 sps:$4 sm:$0xff]  }
  0x32   : > { %944 = vmatprep.subr.bf16.mxu0 %v3070_v9  ;;  %v3091_v23 = vld [vmem:[#allocation2 + $0x78] ss:$12 sps:$4 sm:$0xff]   ;;  %v3092_v24 = vld [vmem:[#allocation2 + $0x214] ss:$12 sps:$4 sm:$0xff]   ;;  %v3096_v26 = vld [vmem:[#allocation2 + $0x210] ss:$12 sps:$4 sm:$0xff]  }
  0x33   : > { %v3094_v25 = vld [vmem:[#allocation2 + $0x94] ss:$12 sps:$4 sm:$0xff]   ;;  %v3097_v27 = vld [vmem:[#allocation2 + $0x90] ss:$12 sps:$4 sm:$0xff]   ;;  %v3098_v28 = vld [vmem:[#allocation2 + $0x22c] ss:$12 sps:$4 sm:$0xff]  }
  0x34   : > { %603 = vmatpush1.bf16.msra.mxu1 %v3072_v10  ;;  %v3100_v29 = vld [vmem:[#allocation2 + $0xac] ss:$12 sps:$4 sm:$0xff]   ;;  %v3102_v30 = vld [vmem:[#allocation2 + $0x228] ss:$12 sps:$4 sm:$0xff]   ;;  %v3104_v32 = vld [vmem:[#allocation2 + $0x244] ss:$12 sps:$4 sm:$0xff]  }
  0x35   : > { %945 = vmatpush1.bf16.msra.mxu0 %v3073_v11  ;;  %604 = vmatprep.subr.bf16.mxu1 %v3074_v12  ;;  %v3103_v31 = vld [vmem:[#allocation2 + $0xa8] ss:$12 sps:$4 sm:$0xff]   ;;  %v3106_v33 = vld [vmem:[#allocation2 + $0xc4] ss:$12 sps:$4 sm:$0xff]   ;;  %p176_p2 = scmp.lt.s32.totalorder %s3453_s13, 1  ;;  %s3424_s9 = smov 64  }
  0x36   : > { %946 = vmatprep.subr.bf16.mxu0 %v3076_v13  ;;  %v3108_v34 = vld [vmem:[#allocation2 + $0x240] ss:$12 sps:$4 sm:$0xff]   ;;  %v3110_v36 = vld [vmem:[#allocation2 + $0x25c] ss:$12 sps:$4 sm:$0xff]   ;;  %v3114_v38 = vld [vmem:[#allocation2 + $0x258] ss:$12 sps:$4 sm:$0xff]  }
  0x37   : > { %v3109_v35 = vld [vmem:[#allocation2 + $0xc0] ss:$12 sps:$4 sm:$0xff]   ;;  %v3112_v37 = vld [vmem:[#allocation2 + $0xdc] ss:$12 sps:$4 sm:$0xff]   ;;  %s3590_s13 = smov (!%p176_p2, %s3453_s13), 1  ;;  %vm2326_vm5 = vcmask 523264  }
  0x38   : > { %605 = vmatpush1.bf16.msra.mxu1 %v3078_v14  ;;  %v3115_v39 = vld [vmem:[#allocation2 + $0xd8] ss:$12 sps:$4 sm:$0xff]   ;;  %v3116_v40 = vld [vmem:[#allocation2 + $0x274] ss:$12 sps:$4 sm:$0xff]   ;;  %s2897_s30 = sshll.u32 %s3590_s13, 4  ;;  %vm2521_vm7 = vcmask 1042434  }
  0x39   : > { %947 = vmatpush1.bf16.msra.mxu0 %v3079_v15  ;;  %606 = vmatprep.subr.bf16.mxu1 %v3080_v16  ;;  %v3118_v41 = vld [vmem:[#allocation2 + $0xf4] ss:$12 sps:$4 sm:$0xff]   ;;  %v3120_v42 = vld [vmem:[#allocation2 + $0x270] ss:$12 sps:$4 sm:$0xff]   ;;  %v3122_v44 = vld [vmem:[#allocation2 + $0x28c] ss:$12 sps:$4 sm:$0xff]   ;;  %s3500_s6 = scalar_lea.vmem %s3578_s0, %s2897_s30 }
  0x3a   : > { %948 = vmatprep.subr.bf16.mxu0 %v3082_v17  ;;  %v3121_v43 = vld [vmem:[#allocation2 + $0xf0] ss:$12 sps:$4 sm:$0xff]   ;;  %v3124_v45 = vld [vmem:[#allocation2 + $0x10c] ss:$12 sps:$4 sm:$0xff]   ;;  %v3126_v46 = vld [vmem:[#allocation2 + $0x288] ss:$12 sps:$4 sm:$0xff]  }
  0x3b   : > { %v3127_v47 = vld [vmem:[#allocation2 + $0x108] ss:$12 sps:$4 sm:$0xff]   ;;  %v3503_v48 = vld [vmem:[%s3500_s6 + $0x4] ss:$8 sps:$4 sm:$0xff]   ;;  %v3144_v0 = vld [vmem:[#allocation2 + $0x2d0] ss:$12 sps:$4 sm:$0xff]  }
  0x3c   : > { %607 = vmatpush1.bf16.msra.mxu1 %v3084_v18  ;;  %v3128_v49 = vld [vmem:[#allocation2 + $0x2a4] ss:$12 sps:$4 sm:$0xff]   ;;  %v334_v51 = vshrl.u32 %v3503_v48, 16  ;;  %v336_v52 = vshll.u32 %v3503_v48, 16  ;;  %v3132_v53 = vld [vmem:[#allocation2 + $0x2a0] ss:$12 sps:$4 sm:$0xff]   ;;  %972 = vmatprep.mubr.bf16.mxu0 %v3503_v48 }
  0x3d   : > { %949 = vmatpush1.bf16.msra.mxu0 %v3085_v19  ;;  %608 = vmatprep.subr.bf16.mxu1 %v3086_v20  ;;  %v3130_v50 = vld [vmem:[#allocation2 + $0x124] ss:$12 sps:$4 sm:$0xff]   ;;  %v3133_v54 = vld [vmem:[#allocation2 + $0x120] ss:$12 sps:$4 sm:$0xff]   ;;  %v3134_v56 = vld [vmem:[#allocation2 + $0x2bc] ss:$12 sps:$4 sm:$0xff]  }
  0x3e   : > { %950 = vmatprep.subr.bf16.mxu0 %v3088_v21  ;;  %v338_v55 = vrot.slane %v336_v52, 1  ;;  %v3136_v57 = vld [vmem:[#allocation2 + $0x13c] ss:$12 sps:$4 sm:$0xff]   ;;  %v3138_v59 = vld [vmem:[#allocation2 + $0x2b8] ss:$12 sps:$4 sm:$0xff]   ;;  %v1507_v10 = vrot.slane %v334_v51, 1 }
  0x3f   : > { %v3509_v60 = vld [vmem:[%s3500_s6] ss:$8 sps:$4 sm:$0xff]   ;;  %v3139_v61 = vld [vmem:[#allocation2 + $0x138] ss:$12 sps:$4 sm:$0xff]   ;;  %v3145_v1 = vld [vmem:[#allocation2 + $0x150] ss:$12 sps:$4 sm:$0xff]  }
  0x40   : > { %609 = vmatpush1.bf16.msra.mxu1 %v3090_v22  ;;  %v339_v58 = vor.u32 %v338_v55, %v334_v51  ;;  %v3140_v62 = vld [vmem:[#allocation2 + $0x2d4] ss:$12 sps:$4 sm:$0xff]   ;;  %v329_v2 = vshll.u32 %v3509_v60, 16  ;;  %v3146_v3 = vld [vmem:[#allocation2 + $0x2ec] ss:$12 sps:$4 sm:$0xff]   ;;  %v327_v8 = vshrl.u32 %v3509_v60, 16 }
  0x41   : > { %951 = vmatpush1.bf16.msra.mxu0 %v3091_v23  ;;  %610 = vmatprep.subr.bf16.mxu1 %v3092_v24  ;;  %v3142_v63 = vld [vmem:[#allocation2 + $0x154] ss:$12 sps:$4 sm:$0xff]   ;;  %v3148_v4 = vld [vmem:[#allocation2 + $0x16c] ss:$12 sps:$4 sm:$0xff]   ;;  %v3158_v11 = vld [vmem:[#allocation2 + $0x304] ss:$12 sps:$4 sm:$0xff]  }
  0x42   : > { %952 = vmatprep.subr.bf16.mxu0 %v3094_v25  ;;  %630 = vmatprep.mubr.bf16.mxu1 %v339_v58  ;;  %v3150_v5 = vld [vmem:[#allocation2 + $0x2e8] ss:$12 sps:$4 sm:$0xff]   ;;  %v331_v9 = vrot.slane %v329_v2, 1  ;;  %v1504_v12 = vrot.slane %v327_v8, 1  ;;  %v1508_v13 = vrot.slane %v336_v52, 2  ;;  %v1505_v17 = vrot.slane %v329_v2, 2 }
  0x43   : > { %v3151_v6 = vld [vmem:[#allocation2 + $0x168] ss:$12 sps:$4 sm:$0xff]   ;;  %v3156_v14 = vld [vmem:[#allocation2 + $0x300] ss:$12 sps:$4 sm:$0xff]   ;;  %v3161_v22 = vld [vmem:[#allocation2 + $0x318] ss:$12 sps:$4 sm:$0xff]  }
  0x44   : > { %611 = vmatpush1.bf16.msra.mxu1 %v3096_v26  ;;  %v3155_v7 = vld [vmem:[#allocation2 + $0x248] ss:$12 sps:$4 sm:$0xff]   ;;  %v3513_v15 = vor.u32 %v331_v9, %v327_v8  ;;  %v3160_v18 = vld [vmem:[#allocation2 + $0x260] ss:$12 sps:$4 sm:$0xff]   ;;  %v3515_v19 = vor.u32 %v1508_v13, %v1507_v10  ;;  %v3517_v21 = vor.u32 %v1505_v17, %v1504_v12  ;;  %v1090_v23 = vrot.slane %v3503_v48, 1  ;;  %s3426_s10 = smov 32  }
  0x45   : > { %953 = vmatpush1.bf16.msra.mxu0 %v3097_v27  ;;  %612 = vmatprep.subr.bf16.mxu1 %v3098_v28  ;;  %v3159_v16 = vld [vmem:[#allocation2 + $0x188] ss:$12 sps:$4 sm:$0xff]   ;;  %v3164_v24 = vld [vmem:[#allocation2 + $0x1a0] ss:$12 sps:$4 sm:$0xff]   ;;  %v3165_v25 = vld [vmem:[#allocation2 + $0x278] ss:$12 sps:$4 sm:$0xff]  }
  0x46   : > { %954 = vmatprep.subr.bf16.mxu0 %v3100_v29  ;;  %v3163_v20 = vld [vmem:[#allocation2 + $0x31c] ss:$12 sps:$4 sm:$0xff]   ;;  %v3168_v26 = vld [vmem:[#allocation2 + $0x334] ss:$12 sps:$4 sm:$0xff]   ;;  %v3169_v28 = vld [vmem:[#allocation2 + $0x1b8] ss:$12 sps:$4 sm:$0xff]  }
  0x47   : > { %v3166_v27 = vld [vmem:[#allocation2 + $0x330] ss:$12 sps:$4 sm:$0xff]   ;;  %v3196_v52 = vld [vmem:[#allocation2 + $0x3c0] ss:$12 sps:$4 sm:$0xff]   ;;  %v3221_v9 = vld [vmem:[#allocation2 + $0x438] ss:$12 sps:$4 sm:$0xff]  }
  0x48   : > { %613 = vmatpush1.bf16.msra.mxu1 %v3102_v30  ;;  %v3170_v29 = vld [vmem:[#allocation2 + $0x290] ss:$12 sps:$4 sm:$0xff]   ;;  %v3173_v30 = vld [vmem:[#allocation2 + $0x34c] ss:$12 sps:$4 sm:$0xff]   ;;  %v3228_v12 = vld [vmem:[#allocation2 + $0x454] ss:$12 sps:$4 sm:$0xff]  }
  0x49   : > { %955 = vmatpush1.bf16.msra.mxu0 %v3103_v31  ;;  %614 = vmatprep.subr.bf16.mxu1 %v3104_v32  ;;  %v3171_v31 = vld [vmem:[#allocation2 + $0x348] ss:$12 sps:$4 sm:$0xff]   ;;  %v3174_v32 = vld [vmem:[#allocation2 + $0x1d0] ss:$12 sps:$4 sm:$0xff]   ;;  %v3224_v10 = vld [vmem:[#allocation2 + $0x80] ss:$12 sps:$4 sm:$0xff]  }
  0x4a   : > { %956 = vmatprep.subr.bf16.mxu0 %v3106_v33  ;;  %v3175_v33 = vld [vmem:[#allocation2 + $0x2a8] ss:$12 sps:$4 sm:$0xff]   ;;  %v3198_v51 = vld [vmem:[#allocation2 + $0x3c4] ss:$12 sps:$4 sm:$0xff]   ;;  %vm2524_vm8 = vcmask 1043459   ;;  %vm2527_vm9 = vcmask 1044484  }
  0x4b   : > { %v3203_v55 = vld [vmem:[#allocation2 + $0x3dc] ss:$12 sps:$4 sm:$0xff]   ;;  %vm2530_vm10 = vcmask 1045509   ;;  %vm2533_vm11 = vcmask 1046534   ;;  %vm2553_vm12 = vcmask 1043712   ;;  %vm2556_vm14 = vcmask 785412  }
  0x4c   : > { %615 = vmatpush1.bf16.msra.mxu1 %v3108_v34  ;;  %v3178_v34 = vld [vmem:[#allocation2 + $0x364] ss:$12 sps:$4 sm:$0xff]   ;;  %v3223_v8 = vld [vmem:[#allocation2 + $0x43c] ss:$12 sps:$4 sm:$0xff]   ;;  %vm2554_vm13 = vsmask.f32 3330 }
  0x4d   : > { %957 = vmatpush1.bf16.msra.mxu0 %v3109_v35  ;;  %616 = vmatprep.subr.bf16.mxu1 %v3110_v36  ;;  %v3176_v35 = vld [vmem:[#allocation2 + $0x360] ss:$12 sps:$4 sm:$0xff]   ;;  %v3179_v36 = vld [vmem:[#allocation2 + $0x1e8] ss:$12 sps:$4 sm:$0xff]   ;;  %v3214_v2 = vld [vmem:[#allocation2 + $0x50] ss:$12 sps:$4 sm:$0xff]  }
  0x4e   : > { %958 = vmatprep.subr.bf16.mxu0 %v3112_v37  ;;  %v3180_v37 = vld [vmem:[#allocation2 + $0x2c0] ss:$12 sps:$4 sm:$0xff]   ;;  %v3226_v13 = vld [vmem:[#allocation2 + $0x450] ss:$12 sps:$4 sm:$0xff]   ;;  %v3231_v17 = vld [vmem:[#allocation2 + $0x468] ss:$12 sps:$4 sm:$0xff]  }
  0x4f   : > { %vm2557_vm15 = vsmask.f32 7442  ;;  %s2898_s11 = sshll.u32 %s3590_s13, 3 }
  0x50   : > { %617 = vmatpush1.bf16.msra.mxu1 %v3114_v38  ;;  %v3183_v38 = vld [vmem:[#allocation2 + $0x37c] ss:$12 sps:$4 sm:$0xff]   ;;  %s185_s16 = scalar_lea.vmem %s3581_s3, %s2898_s11 }
  0x51   : > { %959 = vmatpush1.bf16.msra.mxu0 %v3115_v39  ;;  %618 = vmatprep.subr.bf16.mxu1 %v3116_v40  ;;  %v3181_v39 = vld [vmem:[#allocation2 + $0x378] ss:$12 sps:$4 sm:$0xff]   ;;  %v3184_v40 = vld [vmem:[#allocation2 + $0x200] ss:$12 sps:$4 sm:$0xff]  }
  0x52   : > { %960 = vmatprep.subr.bf16.mxu0 %v3118_v41  ;;  %v3185_v41 = vld [vmem:[#allocation2 + $0x2d8] ss:$12 sps:$4 sm:$0xff]  }
  0x54   : > { %619 = vmatpush1.bf16.msra.mxu1 %v3120_v42  ;;  %v3188_v42 = vld [vmem:[#allocation2 + $0x394] ss:$12 sps:$4 sm:$0xff]  }
  0x55   : > { %961 = vmatpush1.bf16.msra.mxu0 %v3121_v43  ;;  %620 = vmatprep.subr.bf16.mxu1 %v3122_v44  ;;  %v3186_v43 = vld [vmem:[#allocation2 + $0x390] ss:$12 sps:$4 sm:$0xff]   ;;  %v3189_v44 = vld [vmem:[#allocation2 + $0x218] ss:$12 sps:$4 sm:$0xff]  }
  0x56   : > { %962 = vmatprep.subr.bf16.mxu0 %v3124_v45  ;;  %v3190_v45 = vld [vmem:[#allocation2 + $0x2f0] ss:$12 sps:$4 sm:$0xff]  }
  0x58   : > { %621 = vmatpush1.bf16.msra.mxu1 %v3126_v46  ;;  %v3193_v46 = vld [vmem:[#allocation2 + $0x3ac] ss:$12 sps:$4 sm:$0xff]  }
  0x59   : > { %963 = vmatpush1.bf16.msra.mxu0 %v3127_v47  ;;  %622 = vmatprep.subr.bf16.mxu1 %v3128_v49  ;;  %v3191_v47 = vld [vmem:[#allocation2 + $0x3a8] ss:$12 sps:$4 sm:$0xff]   ;;  %v3194_v49 = vld [vmem:[#allocation2 + $0x230] ss:$12 sps:$4 sm:$0xff]  }
  0x5a   : > { %964 = vmatprep.subr.bf16.mxu0 %v3130_v50  ;;  %v3195_v50 = vld [vmem:[#allocation2 + $0xc8] ss:$12 sps:$4 sm:$0xff]  }
  0x5c   : > { %623 = vmatpush1.bf16.msra.mxu1 %v3132_v53  ;;  %v3199_v53 = vld [vmem:[#allocation2 + $0x8] ss:$12 sps:$4 sm:$0xff]  }
  0x5d   : > { %965 = vmatpush1.bf16.msra.mxu0 %v3133_v54  ;;  %624 = vmatprep.subr.bf16.mxu1 %v3134_v56  ;;  %v3200_v54 = vld [vmem:[#allocation2 + $0xe0] ss:$12 sps:$4 sm:$0xff]   ;;  %v3201_v56 = vld [vmem:[#allocation2 + $0x3d8] ss:$12 sps:$4 sm:$0xff]  }
  0x5e   : > { %966 = vmatprep.subr.bf16.mxu0 %v3136_v57  ;;  %v3204_v57 = vld [vmem:[#allocation2 + $0x20] ss:$12 sps:$4 sm:$0xff]  }
  0x60   : > { %625 = vmatpush1.bf16.msra.mxu1 %v3138_v59  ;;  %v3208_v59 = vld [vmem:[#allocation2 + $0x3f4] ss:$12 sps:$4 sm:$0xff]  }
  0x61   : > { %967 = vmatpush1.bf16.msra.mxu0 %v3139_v61  ;;  %626 = vmatprep.subr.bf16.mxu1 %v3140_v62  ;;  %v3206_v61 = vld [vmem:[#allocation2 + $0x3f0] ss:$12 sps:$4 sm:$0xff]   ;;  %v3209_v62 = vld [vmem:[#allocation2 + $0x38] ss:$12 sps:$4 sm:$0xff]  }
  0x62   : > { %968 = vmatprep.subr.bf16.mxu0 %v3142_v63  ;;  %v3210_v63 = vld [vmem:[#allocation2 + $0x110] ss:$12 sps:$4 sm:$0xff]  }
  0x64   : > { %627 = vmatpush1.bf16.msra.mxu1 %v3144_v0  ;;  %v3213_v0 = vld [vmem:[#allocation2 + $0x40c] ss:$12 sps:$4 sm:$0xff]  }
  0x65   : > { %969 = vmatpush1.bf16.msra.mxu0 %v3145_v1  ;;  %628 = vmatprep.subr.bf16.mxu1 %v3146_v3  ;;  %v3211_v1 = vld [vmem:[#allocation2 + $0x408] ss:$12 sps:$4 sm:$0xff]  }
  0x66   : > { %970 = vmatprep.subr.bf16.mxu0 %v3148_v4  ;;  %v3215_v3 = vld [vmem:[#allocation2 + $0x128] ss:$12 sps:$4 sm:$0xff]   ;;  %v3218_v4 = vld [vmem:[#allocation2 + $0x424] ss:$12 sps:$4 sm:$0xff]  }
  0x68   : > { %629 = vmatpush1.bf16.msra.mxu1 %v3150_v5  ;;  %v3216_v5 = vld [vmem:[#allocation2 + $0x420] ss:$12 sps:$4 sm:$0xff]  }
  0x69   : > { %971 = vmatpush1.bf16.msra.mxu0 %v3151_v6  ;;  %2905 = vmatprep.subr.bf16.mxu1 %v3155_v7  ;;  %v3219_v6 = vld [vmem:[#allocation2 + $0x68] ss:$12 sps:$4 sm:$0xff]   ;;  %v3220_v7 = vld [vmem:[#allocation2 + $0x140] ss:$12 sps:$4 sm:$0xff]  }
  0x6a   : > { %1349 = vmatprep.subr.bf16.mxu0 %v3158_v11  ;;  %v3225_v11 = vld [vmem:[#allocation2 + $0x158] ss:$12 sps:$4 sm:$0xff]  }
  0x6b   : > { %631 = vmatmul.mubr.bf16.vlgmr.msra.gmra.mrb[0].mxu1 %v3513_v15 }
  0x6c   : > { %973 = vmatmul.mubr.bf16.vlgmr.msra.gmra.mrb[0].mxu0 %v3509_v60  ;;  %2906 = vmatpush3.bf16.msra.mxu1 %v3159_v16  ;;  %v3233_v16 = vld [vmem:[#allocation2 + $0x46c] ss:$12 sps:$4 sm:$0xff]  }
  0x6d   : > { %1350 = vmatpush1.bf16.msra.mxu0 %v3156_v14  ;;  %2907 = vmatprep.subr.bf16.mxu1 %v3160_v18  ;;  %v3229_v14 = vld [vmem:[#allocation2 + $0x98] ss:$12 sps:$4 sm:$0xff]   ;;  %v3234_v18 = vld [vmem:[#allocation2 + $0xb0] ss:$12 sps:$4 sm:$0xff]  }
  0x6e   : > { %1351 = vmatprep.subr.bf16.mxu0 %v3163_v20  ;;  %673 = vmatprep.mubr.bf16.mxu1 %v339_v58  ;;  %v3205_v58 = vld [vmem:[#allocation2 + $0xf8] ss:$12 sps:$4 sm:$0xff]   ;;  %v3235_v20 = vld [vmem:[#allocation2 + $0x3c8] ss:$12 sps:$4 sm:$0xff]  }
  0x6f   : > { %1381 = vmatprep.mubr.bf16.mxu0 %v1090_v23 }
  0x70   : > { %2908 = vmatpush3.bf16.msra.mxu1 %v3164_v24  ;;  %v1089_v24 = vrot.slane %v3509_v60, 1 }
  0x71   : > { %1352 = vmatpush1.bf16.msra.mxu0 %v3161_v22  ;;  %2909 = vmatprep.subr.bf16.mxu1 %v3165_v25  ;;  %v3238_v22 = vld [vmem:[#allocation2 + $0x484] ss:$12 sps:$4 sm:$0xff]   ;;  %v3236_v25 = vld [vmem:[#allocation2 + $0x480] ss:$12 sps:$4 sm:$0xff]  }
  0x72   : > { %1353 = vmatprep.subr.bf16.mxu0 %v3168_v26  ;;  %v3239_v26 = vld [vmem:[#allocation2 + $0x308] ss:$12 sps:$4 sm:$0xff]  }
  0x74   : > { %2910 = vmatpush3.bf16.msra.mxu1 %v3169_v28  ;;  %v3243_v28 = vld [vmem:[#allocation2 + $0x49c] ss:$12 sps:$4 sm:$0xff]  }
  0x75   : > { %1354 = vmatpush1.bf16.msra.mxu0 %v3166_v27  ;;  %2911 = vmatprep.subr.bf16.mxu1 %v3170_v29  ;;  %v3240_v27 = vld [vmem:[#allocation2 + $0x3e0] ss:$12 sps:$4 sm:$0xff]   ;;  %v3241_v29 = vld [vmem:[#allocation2 + $0x498] ss:$12 sps:$4 sm:$0xff]  }
  0x76   : > { %1355 = vmatprep.subr.bf16.mxu0 %v3173_v30  ;;  %v3244_v30 = vld [vmem:[#allocation2 + $0x320] ss:$12 sps:$4 sm:$0xff]  }
  0x78   : > { %2912 = vmatpush3.bf16.msra.mxu1 %v3174_v32  ;;  %v3248_v32 = vld [vmem:[#allocation2 + $0x4b4] ss:$12 sps:$4 sm:$0xff]  }
  0x79   : > { %1356 = vmatpush1.bf16.msra.mxu0 %v3171_v31  ;;  %2913 = vmatprep.subr.bf16.mxu1 %v3175_v33  ;;  %v3245_v31 = vld [vmem:[#allocation2 + $0x3f8] ss:$12 sps:$4 sm:$0xff]   ;;  %v3246_v33 = vld [vmem:[#allocation2 + $0x4b0] ss:$12 sps:$4 sm:$0xff]  }
  0x7a   : > { %1357 = vmatprep.subr.bf16.mxu0 %v3178_v34  ;;  %v3249_v34 = vld [vmem:[#allocation2 + $0x338] ss:$12 sps:$4 sm:$0xff]  }
  0x7c   : > { %2914 = vmatpush3.bf16.msra.mxu1 %v3179_v36  ;;  %v3253_v36 = vld [vmem:[#allocation2 + $0x4cc] ss:$12 sps:$4 sm:$0xff]  }
  0x7d   : > { %1358 = vmatpush1.bf16.msra.mxu0 %v3176_v35  ;;  %2915 = vmatprep.subr.bf16.mxu1 %v3180_v37  ;;  %v3250_v35 = vld [vmem:[#allocation2 + $0x410] ss:$12 sps:$4 sm:$0xff]   ;;  %v3251_v37 = vld [vmem:[#allocation2 + $0x4c8] ss:$12 sps:$4 sm:$0xff]  }
  0x7e   : > { %1359 = vmatprep.subr.bf16.mxu0 %v3183_v38  ;;  %v3254_v38 = vld [vmem:[#allocation2 + $0x350] ss:$12 sps:$4 sm:$0xff]  }
  0x80   : > { %2916 = vmatpush3.bf16.msra.mxu1 %v3184_v40  ;;  %v3258_v40 = vld [vmem:[#allocation2 + $0x4e4] ss:$12 sps:$4 sm:$0xff]  }
  0x81   : > { %1360 = vmatpush1.bf16.msra.mxu0 %v3181_v39  ;;  %2917 = vmatprep.subr.bf16.mxu1 %v3185_v41  ;;  %v3255_v39 = vld [vmem:[#allocation2 + $0x428] ss:$12 sps:$4 sm:$0xff]   ;;  %v3256_v41 = vld [vmem:[#allocation2 + $0x4e0] ss:$12 sps:$4 sm:$0xff]  }
  0x82   : > { %1361 = vmatprep.subr.bf16.mxu0 %v3188_v42  ;;  %v3263_v42 = vld [vmem:[#allocation2 + $0x4fc] ss:$12 sps:$4 sm:$0xff]  }
  0x84   : > { %2918 = vmatpush3.bf16.msra.mxu1 %v3189_v44  ;;  %v3264_v44 = vld [vmem:[#allocation2 + $0x380] ss:$12 sps:$4 sm:$0xff]  }
  0x85   : > { %1362 = vmatpush1.bf16.msra.mxu0 %v3186_v43  ;;  %2919 = vmatprep.subr.bf16.mxu1 %v3190_v45  ;;  %v3261_v43 = vld [vmem:[#allocation2 + $0x4f8] ss:$12 sps:$4 sm:$0xff]  }
  0x86   : > { %1363 = vmatprep.subr.bf16.mxu0 %v3193_v46  ;;  %v3265_v45 = vld [vmem:[#allocation2 + $0x458] ss:$12 sps:$4 sm:$0xff]   ;;  %v3268_v46 = vld [vmem:[#allocation2 + $0x514] ss:$12 sps:$4 sm:$0xff]  }
  0x88   : > { %2920 = vmatpush3.bf16.msra.mxu1 %v3194_v49  ;;  %v3269_v49 = vld [vmem:[#allocation2 + $0x398] ss:$12 sps:$4 sm:$0xff]  }
  0x89   : > { %1364 = vmatpush1.bf16.msra.mxu0 %v3191_v47  ;;  %2927 = vmatprep.subr.bf16.mxu1 %v3195_v50  ;;  %v3266_v47 = vld [vmem:[#allocation2 + $0x510] ss:$12 sps:$4 sm:$0xff]  }
  0x8a   : > { %1365 = vmatprep.subr.bf16.mxu0 %v3198_v51  ;;  %v3270_v50 = vld [vmem:[#allocation2 + $0x470] ss:$12 sps:$4 sm:$0xff]   ;;  %v3273_v51 = vld [vmem:[#allocation2 + $0x52c] ss:$12 sps:$4 sm:$0xff]  }
  0x8b   : > { %674 = vmatmul.mubr.bf16.vlgmr.msra.gmra.mrb[4].mxu1 %v3513_v15  ;;  %v3230_v15 = vld [vmem:[#allocation2 + $0x170] ss:$12 sps:$4 sm:$0xff]  }
  0x8c   : > { %2928 = vmatpush3.bf16.msra.mxu1 %v3199_v53  ;;  %1015 = vmatprep.mubr.bf16.mxu1 %v3503_v48  ;;  %v3259_v48 = vld [vmem:[#allocation2 + $0x368] ss:$12 sps:$4 sm:$0xff]   ;;  %v3274_v53 = vld [vmem:[#allocation2 + $0x3b0] ss:$12 sps:$4 sm:$0xff]  }
  0x8d   : > { %1366 = vmatpush1.bf16.msra.mxu0 %v3196_v52  ;;  %2929 = vmatprep.subr.bf16.mxu1 %v3200_v54  ;;  %v3271_v52 = vld [vmem:[#allocation2 + $0x528] ss:$12 sps:$4 sm:$0xff]   ;;  %v3277_v54 = vld [vmem:[#allocation2 + $0x544] ss:$12 sps:$4 sm:$0xff]  }
  0x8e   : > { %1367 = vmatprep.subr.bf16.mxu0 %v3203_v55  ;;  %v3278_v55 = vld [vmem:[#allocation2 + $0x548] ss:$12 sps:$4 sm:$0xff]  }
  0x90   : > { %2930 = vmatpush3.bf16.msra.mxu1 %v3204_v57  ;;  %v3279_v57 = vld [vmem:[#allocation2 + $0x488] ss:$12 sps:$4 sm:$0xff]  }
  0x91   : > { %1368 = vmatpush1.bf16.msra.mxu0 %v3201_v56  ;;  %2931 = vmatprep.subr.bf16.mxu1 %v3205_v58  ;;  %v3275_v56 = vld [vmem:[#allocation2 + $0x540] ss:$12 sps:$4 sm:$0xff]   ;;  %v3282_v58 = vld [vmem:[#allocation2 + $0x55c] ss:$12 sps:$4 sm:$0xff]  }
  0x92   : > { %1369 = vmatprep.subr.bf16.mxu0 %v3208_v59  ;;  %v3283_v59 = vld [vmem:[#allocation2 + $0x560] ss:$12 sps:$4 sm:$0xff]  }
  0x94   : > { %2932 = vmatpush3.bf16.msra.mxu1 %v3209_v62  ;;  %v3284_v62 = vld [vmem:[#allocation2 + $0x4a0] ss:$12 sps:$4 sm:$0xff]  }
  0x95   : > { %1370 = vmatpush1.bf16.msra.mxu0 %v3206_v61  ;;  %2933 = vmatprep.subr.bf16.mxu1 %v3210_v63  ;;  %v3280_v61 = vld [vmem:[#allocation2 + $0x558] ss:$12 sps:$4 sm:$0xff]   ;;  %v3287_v63 = vld [vmem:[#allocation2 + $0x574] ss:$12 sps:$4 sm:$0xff]  }
  0x96   : > { %1371 = vmatprep.subr.bf16.mxu0 %v3213_v0  ;;  %v3288_v0 = vld [vmem:[#allocation2 + $0x578] ss:$12 sps:$4 sm:$0xff]  }
  0x98   : > { %2934 = vmatpush3.bf16.msra.mxu1 %v3214_v2  ;;  %v3289_v2 = vld [vmem:[#allocation2 + $0x4b8] ss:$12 sps:$4 sm:$0xff]  }
  0x99   : > { %1372 = vmatpush1.bf16.msra.mxu0 %v3211_v1  ;;  %2935 = vmatprep.subr.bf16.mxu1 %v3215_v3  ;;  %v3285_v1 = vld [vmem:[#allocation2 + $0x570] ss:$12 sps:$4 sm:$0xff]   ;;  %v3292_v3 = vld [vmem:[#allocation2 + $0x58c] ss:$12 sps:$4 sm:$0xff]  }
  0x9a   : > { %1373 = vmatprep.subr.bf16.mxu0 %v3218_v4  ;;  %v3293_v4 = vld [vmem:[#allocation2 + $0x590] ss:$12 sps:$4 sm:$0xff]  }
  0x9c   : > { %2936 = vmatpush3.bf16.msra.mxu1 %v3219_v6  ;;  %v3297_v6 = vld [vmem:[#allocation2 + $0x5a4] ss:$12 sps:$4 sm:$0xff]  }
  0x9d   : > { %1374 = vmatpush1.bf16.msra.mxu0 %v3216_v5  ;;  %2937 = vmatprep.subr.bf16.mxu1 %v3220_v7  ;;  %v3290_v5 = vld [vmem:[#allocation2 + $0x588] ss:$12 sps:$4 sm:$0xff]  }
  0x9e   : > { %1375 = vmatprep.subr.bf16.mxu0 %v3223_v8  ;;  %v3298_v7 = vld [vmem:[#allocation2 + $0x5a8] ss:$12 sps:$4 sm:$0xff]   ;;  %v3295_v8 = vld [vmem:[#allocation2 + $0x5a0] ss:$12 sps:$4 sm:$0xff]  }
  0xa0   : > { %2938 = vmatpush3.bf16.msra.mxu1 %v3224_v10  ;;  %v3303_v10 = vld [vmem:[#allocation2 + $0x5c0] ss:$12 sps:$4 sm:$0xff]  }
  0xa1   : > { %1376 = vmatpush1.bf16.msra.mxu0 %v3221_v9  ;;  %2939 = vmatprep.subr.bf16.mxu1 %v3225_v11  ;;  %v3299_v9 = vld [vmem:[#allocation2 + $0x4e8] ss:$12 sps:$4 sm:$0xff]   ;;  %v3300_v11 = vld [vmem:[#allocation2 + $0x5b8] ss:$12 sps:$4 sm:$0xff]  }
  0xa2   : > { %1377 = vmatprep.subr.bf16.mxu0 %v3228_v12  ;;  %v3304_v12 = vld [vmem:[#allocation2 + $0x500] ss:$12 sps:$4 sm:$0xff]  }
  0xa4   : > { %2940 = vmatpush3.bf16.msra.mxu1 %v3229_v14  ;;  %v3308_v14 = vld [vmem:[#allocation2 + $0x5d8] ss:$12 sps:$4 sm:$0xff]  }
  0xa5   : > { %1378 = vmatpush1.bf16.msra.mxu0 %v3226_v13  ;;  %2941 = vmatprep.subr.bf16.mxu1 %v3230_v15  ;;  %v3307_v13 = vld [vmem:[#allocation2 + $0x5d4] ss:$12 sps:$4 sm:$0xff]   ;;  %v3305_v15 = vld [vmem:[#allocation2 + $0x5d0] ss:$12 sps:$4 sm:$0xff]  }
  0xa6   : > { %1379 = vmatprep.subr.bf16.mxu0 %v3233_v16  ;;  %v3309_v16 = vld [vmem:[#allocation2 + $0x518] ss:$12 sps:$4 sm:$0xff]  }
  0xa8   : > { %2942 = vmatpush3.bf16.msra.mxu1 %v3234_v18  ;;  %v3313_v18 = vld [vmem:[#allocation2 + $0x5f0] ss:$12 sps:$4 sm:$0xff]  }
  0xa9   : > { %1380 = vmatpush1.bf16.msra.mxu0 %v3231_v17  ;;  %2949 = vmatprep.subr.bf16.mxu1 %v3235_v20  ;;  %v3312_v17 = vld [vmem:[#allocation2 + $0x5ec] ss:$12 sps:$4 sm:$0xff]   ;;  %v3310_v20 = vld [vmem:[#allocation2 + $0x5e8] ss:$12 sps:$4 sm:$0xff]  }
  0xaa   : > { %1768 = vmatprep.subr.bf16.mxu0 %v3238_v22  ;;  %v3314_v22 = vld [vmem:[#allocation2 + $0x530] ss:$12 sps:$4 sm:$0xff]  }
  0xab   : > { %1016 = vmatmul.mubr.bf16.vlgmr.msra.gmra.mrb[8].mxu1 %v3509_v60  ;;  %v3294_v60 = vld [vmem:[#allocation2 + $0x4d0] ss:$12 sps:$4 sm:$0xff]  }
  0xac   : > { %1382 = vmatmul.mubr.bf16.vlgmr.msra.gmra.mrb[0].mxu0 %v1089_v24  ;;  %2950 = vmatpush3.bf16.msra.mxu1 %v3239_v26  ;;  %v3315_v26 = vld [vmem:[#allocation2 + $0x600] ss:$12 sps:$4 sm:$0xff]  }
  0xad   : > { %1769 = vmatpush1.bf16.msra.mxu0 %v3236_v25  ;;  %2951 = vmatprep.subr.bf16.mxu1 %v3240_v27  ;;  %v3318_v25 = vld [vmem:[#allocation2 + $0x6c8] ss:$12 sps:$4 sm:$0xff]  }
  0xae   : > { %1770 = vmatprep.subr.bf16.mxu0 %v3243_v28  ;;  %1424 = vmatprep.mubr.bf16.mxu1 %v1090_v23  ;;  %v3260_v23 = vld [vmem:[#allocation2 + $0x440] ss:$12 sps:$4 sm:$0xff]   ;;  %v3319_v27 = vld [vmem:[#allocation2 + $0x608] ss:$12 sps:$4 sm:$0xff]  }
  0xaf   : > { %1800 = vmatprep.mubr.bf16.mxu0 %v3515_v19  ;;  %v3322_v28 = vld [vmem:[#allocation2 + $0x61c] ss:$12 sps:$4 sm:$0xff]  }
  0xb0   : > { %2952 = vmatpush3.bf16.msra.mxu1 %v3244_v30  ;;  %v3379_v30 = vld [vmem:[%s3500_s6 + $0x4] ss:$8 sps:$4 sm:$0xff]  }
  0xb1   : > { %1771 = vmatpush1.bf16.msra.mxu0 %v3241_v29  ;;  %2953 = vmatprep.subr.bf16.mxu1 %v3245_v31  ;;  %v3323_v29 = vld [vmem:[#allocation2 + $0x6e0] ss:$12 sps:$4 sm:$0xff]   ;;  %v1924_v31 = vrot.slane %v3379_v30, 2 }
  0xb2   : > { %1772 = vmatprep.subr.bf16.mxu0 %v3248_v32  ;;  %v3320_v32 = vld [vmem:[#allocation2 + $0x618] ss:$12 sps:$4 sm:$0xff]  }
  0xb4   : > { %2954 = vmatpush3.bf16.msra.mxu1 %v3249_v34  ;;  %v3327_v34 = vld [vmem:[#allocation2 + $0x634] ss:$12 sps:$4 sm:$0xff]  }
  0xb5   : > { %1773 = vmatpush1.bf16.msra.mxu0 %v3246_v33  ;;  %2955 = vmatprep.subr.bf16.mxu1 %v3250_v35  ;;  %v3324_v33 = vld [vmem:[#allocation2 + $0x620] ss:$12 sps:$4 sm:$0xff]   ;;  %v3328_v35 = vld [vmem:[#allocation2 + $0x6f8] ss:$12 sps:$4 sm:$0xff]  }
  0xb6   : > { %1774 = vmatprep.subr.bf16.mxu0 %v3253_v36  ;;  %v3325_v36 = vld [vmem:[#allocation2 + $0x630] ss:$12 sps:$4 sm:$0xff]  }
  0xb8   : > { %2956 = vmatpush3.bf16.msra.mxu1 %v3254_v38  ;;  %v3332_v38 = vld [vmem:[#allocation2 + $0x64c] ss:$12 sps:$4 sm:$0xff]  }
  0xb9   : > { %1775 = vmatpush1.bf16.msra.mxu0 %v3251_v37  ;;  %2957 = vmatprep.subr.bf16.mxu1 %v3255_v39  ;;  %v3329_v37 = vld [vmem:[#allocation2 + $0x638] ss:$12 sps:$4 sm:$0xff]   ;;  %v3333_v39 = vld [vmem:[#allocation2 + $0x710] ss:$12 sps:$4 sm:$0xff]  }
  0xba   : > { %1776 = vmatprep.subr.bf16.mxu0 %v3258_v40  ;;  %v3334_v40 = vld [vmem:[#allocation2 + $0x650] ss:$12 sps:$4 sm:$0xff]  }
  0xbc   : > { %2958 = vmatpush3.bf16.msra.mxu1 %v3259_v48  ;;  %v3338_v48 = vld [vmem:[#allocation2 + $0x728] ss:$12 sps:$4 sm:$0xff]  }
  0xbd   : > { %1777 = vmatpush1.bf16.msra.mxu0 %v3256_v41  ;;  %2959 = vmatprep.subr.bf16.mxu1 %v3260_v23  ;;  %v3337_v41 = vld [vmem:[#allocation2 + $0x664] ss:$12 sps:$4 sm:$0xff]   ;;  %v3335_v23 = vld [vmem:[#allocation2 + $0x660] ss:$12 sps:$4 sm:$0xff]  }
  0xbe   : > { %1778 = vmatprep.subr.bf16.mxu0 %v3263_v42  ;;  %v3339_v42 = vld [vmem:[#allocation2 + $0x668] ss:$12 sps:$4 sm:$0xff]  }
  0xc0   : > { %2960 = vmatpush3.bf16.msra.mxu1 %v3264_v44  ;;  %v3343_v44 = vld [vmem:[#allocation2 + $0x740] ss:$12 sps:$4 sm:$0xff]  }
  0xc1   : > { %1779 = vmatpush1.bf16.msra.mxu0 %v3261_v43  ;;  %2961 = vmatprep.subr.bf16.mxu1 %v3265_v45  ;;  %v3342_v43 = vld [vmem:[#allocation2 + $0x67c] ss:$12 sps:$4 sm:$0xff]   ;;  %v3340_v45 = vld [vmem:[#allocation2 + $0x678] ss:$12 sps:$4 sm:$0xff]  }
  0xc2   : > { %1780 = vmatprep.subr.bf16.mxu0 %v3268_v46  ;;  %v3344_v46 = vld [vmem:[#allocation2 + $0x680] ss:$12 sps:$4 sm:$0xff]  }
  0xc4   : > { %2962 = vmatpush3.bf16.msra.mxu1 %v3269_v49  ;;  %v3348_v49 = vld [vmem:[#allocation2 + $0x758] ss:$12 sps:$4 sm:$0xff]  }
  0xc5   : > { %1781 = vmatpush1.bf16.msra.mxu0 %v3266_v47  ;;  %2963 = vmatprep.subr.bf16.mxu1 %v3270_v50  ;;  %v3347_v47 = vld [vmem:[#allocation2 + $0x694] ss:$12 sps:$4 sm:$0xff]   ;;  %v3345_v50 = vld [vmem:[#allocation2 + $0x690] ss:$12 sps:$4 sm:$0xff]  }
  0xc6   : > { %1782 = vmatprep.subr.bf16.mxu0 %v3273_v51  ;;  %v3349_v51 = vld [vmem:[#allocation2 + $0x698] ss:$12 sps:$4 sm:$0xff]  }
  0xc8   : > { %2964 = vmatpush3.bf16.msra.mxu1 %v3274_v53  ;;  %v3353_v53 = vld [vmem:[#allocation2 + $0x770] ss:$12 sps:$4 sm:$0xff]  }
  0xc9   : > { %1783 = vmatpush1.bf16.msra.mxu0 %v3271_v52  ;;  %2971 = vmatprep.subr.bf16.mxu1 %v3278_v55  ;;  %v3352_v52 = vld [vmem:[#allocation2 + $0x6ac] ss:$12 sps:$4 sm:$0xff]   ;;  %v3354_v55 = vld [vmem:[#allocation2 + $0x6b0] ss:$12 sps:$4 sm:$0xff]  }
  0xca   : > { %1784 = vmatprep.subr.bf16.mxu0 %v3277_v54  ;;  %v3350_v54 = vld [vmem:[#allocation2 + $0x6a8] ss:$12 sps:$4 sm:$0xff]  }
  0xcb   : > { %1425 = vmatmul.mubr.bf16.vlgmr.msra.gmra.mrb[12].mxu1 %v1089_v24  ;;  %v3317_v24 = vld [vmem:[#allocation2 + $0x604] ss:$12 sps:$4 sm:$0xff]  }
  0xcc   : > { %2972 = vmatpush3.bf16.msra.mxu1 %v3279_v57  ;;  %1843 = vmatprep.mubr.bf16.mxu1 %v3515_v19  ;;  %v3302_v19 = vld [vmem:[#allocation2 + $0x5bc] ss:$12 sps:$4 sm:$0xff]  }
  0xcd   : > { %1785 = vmatpush1.bf16.msra.mxu0 %v3275_v56  ;;  %2973 = vmatprep.subr.bf16.mxu1 %v3283_v59  ;;  %v3357_v56 = vld [vmem:[#allocation2 + $0x6c4] ss:$12 sps:$4 sm:$0xff]   ;;  %v3380_v57 = vld [vmem:[%s3500_s6] ss:$8 sps:$4 sm:$0xff]  }
  0xce   : > { %1786 = vmatprep.subr.bf16.mxu0 %v3282_v58  ;;  %v1923_v58 = vrot.slane %v3380_v57, 2  ;;  %v3355_v59 = vld [vmem:[#allocation2 + $0x6c0] ss:$12 sps:$4 sm:$0xff]  }
  0xcf   : > { %v2273_v57 = vld [vmem:[%s3580_s2] sm:$0x7] }
  0xd0   : > { %2974 = vmatpush3.bf16.msra.mxu1 %v3284_v62  ;;  %v3358_v62 = vld [vmem:[#allocation2 + $0x6d8] ss:$12 sps:$4 sm:$0xff]  }
  0xd1   : > { %1787 = vmatpush1.bf16.msra.mxu0 %v3280_v61  ;;  %2975 = vmatprep.subr.bf16.mxu1 %v3288_v0  ;;  %v3360_v61 = vld [vmem:[#allocation2 + $0x6dc] ss:$12 sps:$4 sm:$0xff]  }
  0xd2   : > { %1788 = vmatprep.subr.bf16.mxu0 %v3287_v63  ;;  %v3363_v63 = vld [vmem:[#allocation2 + $0x6f4] ss:$12 sps:$4 sm:$0xff]   ;;  %v3361_v0 = vld [vmem:[#allocation2 + $0x6f0] ss:$12 sps:$4 sm:$0xff]  }
  0xd4   : > { %2976 = vmatpush3.bf16.msra.mxu1 %v3289_v2  ;;  %v3364_v2 = vld [vmem:[#allocation2 + $0x708] ss:$12 sps:$4 sm:$0xff]  }
  0xd5   : > { %1789 = vmatpush1.bf16.msra.mxu0 %v3285_v1  ;;  %2977 = vmatprep.subr.bf16.mxu1 %v3293_v4  ;;  %v3366_v1 = vld [vmem:[#allocation2 + $0x70c] ss:$12 sps:$4 sm:$0xff]  }
  0xd6   : > { %1790 = vmatprep.subr.bf16.mxu0 %v3292_v3  ;;  %v3369_v3 = vld [vmem:[#allocation2 + $0x724] ss:$12 sps:$4 sm:$0xff]   ;;  %v3367_v4 = vld [vmem:[#allocation2 + $0x720] ss:$12 sps:$4 sm:$0xff]  }
  0xd8   : > { %2978 = vmatpush3.bf16.msra.mxu1 %v3294_v60  ;;  %v3370_v60 = vld [vmem:[#allocation2 + $0x738] ss:$12 sps:$4 sm:$0xff]  }
  0xd9   : > { %1791 = vmatpush1.bf16.msra.mxu0 %v3290_v5  ;;  %2979 = vmatprep.subr.bf16.mxu1 %v3298_v7  ;;  %v3372_v5 = vld [vmem:[#allocation2 + $0x73c] ss:$12 sps:$4 sm:$0xff]  }
  0xda   : > { %1792 = vmatprep.subr.bf16.mxu0 %v3297_v6  ;;  %v3375_v6 = vld [vmem:[#allocation2 + $0x754] ss:$12 sps:$4 sm:$0xff]   ;;  %v3373_v7 = vld [vmem:[#allocation2 + $0x750] ss:$12 sps:$4 sm:$0xff]  }
  0xdc   : > { %2980 = vmatpush3.bf16.msra.mxu1 %v3299_v9  ;;  %v3376_v9 = vld [vmem:[#allocation2 + $0x768] ss:$12 sps:$4 sm:$0xff]  }
  0xdd   : > { %1793 = vmatpush1.bf16.msra.mxu0 %v3295_v8  ;;  %2981 = vmatprep.subr.bf16.mxu1 %v3303_v10  ;;  %v3378_v8 = vld [vmem:[#allocation2 + $0x76c] ss:$12 sps:$4 sm:$0xff]  }
  0xde   : > { %1794 = vmatprep.subr.bf16.mxu0 %v3302_v19 }
  0xe0   : > { %2982 = vmatpush3.bf16.msra.mxu1 %v3304_v12 }
  0xe1   : > { %1795 = vmatpush1.bf16.msra.mxu0 %v3300_v11  ;;  %2983 = vmatprep.subr.bf16.mxu1 %v3308_v14 }
  0xe2   : > { %1796 = vmatprep.subr.bf16.mxu0 %v3307_v13 }
  0xe4   : > { %2984 = vmatpush3.bf16.msra.mxu1 %v3309_v16 }
  0xe5   : > { %1797 = vmatpush1.bf16.msra.mxu0 %v3305_v15  ;;  %2985 = vmatprep.subr.bf16.mxu1 %v3313_v18 }
  0xe6   : > { %1798 = vmatprep.subr.bf16.mxu0 %v3312_v17 }
  0xe8   : > { %2986 = vmatpush3.bf16.msra.mxu1 %v3314_v22 }
  0xe9   : > { %1799 = vmatpush1.bf16.msra.mxu0 %v3310_v20  ;;  %2993 = vmatprep.subr.bf16.mxu1 %v3318_v25 }
  0xea   : > { %2183 = vmatprep.subr.bf16.mxu0 %v3317_v24 }
  0xeb   : > { %1844 = vmatmul.mubr.bf16.vlgmr.msra.gmra.mrb[16].mxu1 %v3517_v21 }
  0xec   : > { %1801 = vmatmul.mubr.bf16.vlgmr.msra.gmra.mrb[0].mxu0 %v3517_v21  ;;  %2994 = vmatpush3.bf16.msra.mxu1 %v3319_v27  ;;  %v3330_v21 = vld [vmem:[#allocation2 + $0x648] ss:$12 sps:$4 sm:$0xff]  }
  0xed   : > { %2184 = vmatpush1.bf16.msra.mxu0 %v3315_v26  ;;  %2995 = vmatprep.subr.bf16.mxu1 %v3323_v29 }
  0xee   : > { %2185 = vmatprep.subr.bf16.mxu0 %v3322_v28  ;;  %2258 = vmatprep.mubr.bf16.mxu1 %v1924_v31 }
  0xef   : > { %2215 = vmatprep.mubr.bf16.mxu0 %v1924_v31 }
  0xf0   : > { %2996 = vmatpush3.bf16.msra.mxu1 %v3324_v33 }
  0xf1   : > { %2186 = vmatpush1.bf16.msra.mxu0 %v3320_v32  ;;  %2997 = vmatprep.subr.bf16.mxu1 %v3328_v35 }
  0xf2   : > { %2187 = vmatprep.subr.bf16.mxu0 %v3327_v34 }
  0xf4   : > { %2998 = vmatpush3.bf16.msra.mxu1 %v3329_v37 }
  0xf5   : > { %2188 = vmatpush1.bf16.msra.mxu0 %v3325_v36  ;;  %2999 = vmatprep.subr.bf16.mxu1 %v3333_v39 }
  0xf6   : > { %2189 = vmatprep.subr.bf16.mxu0 %v3332_v38 }
  0xf8   : > { %3000 = vmatpush3.bf16.msra.mxu1 %v3334_v40 }
  0xf9   : > { %2190 = vmatpush1.bf16.msra.mxu0 %v3330_v21  ;;  %3001 = vmatprep.subr.bf16.mxu1 %v3338_v48 }
  0xfa   : > { %2191 = vmatprep.subr.bf16.mxu0 %v3337_v41 }
  0xfc   : > { %3002 = vmatpush3.bf16.msra.mxu1 %v3339_v42 }
  0xfd   : > { %2192 = vmatpush1.bf16.msra.mxu0 %v3335_v23  ;;  %3003 = vmatprep.subr.bf16.mxu1 %v3343_v44 }
  0xfe   : > { %2193 = vmatprep.subr.bf16.mxu0 %v3342_v43 }
 0x100   : > { %3004 = vmatpush3.bf16.msra.mxu1 %v3344_v46 }
 0x101   : > { %2194 = vmatpush1.bf16.msra.mxu0 %v3340_v45  ;;  %3005 = vmatprep.subr.bf16.mxu1 %v3348_v49 }
 0x102   : > { %2195 = vmatprep.subr.bf16.mxu0 %v3347_v47 }
 0x104   : > { %3006 = vmatpush3.bf16.msra.mxu1 %v3349_v51 }
 0x105   : > { %2196 = vmatpush1.bf16.msra.mxu0 %v3345_v50  ;;  %3007 = vmatprep.subr.bf16.mxu1 %v3353_v53 }
 0x106   : > { %2197 = vmatprep.subr.bf16.mxu0 %v3352_v52  ;;  %v2275_v52 = vlaneseq }
 0x108   : > { %3008 = vmatpush3.bf16.msra.mxu1 %v3354_v55  ;;  %v2276_v53 = vshrl.u32 %v2275_v52, 7 }
 0x109   : > { %2198 = vmatpush1.bf16.msra.mxu0 %v3350_v54 }
 0x10a   : > { %2199 = vmatprep.subr.bf16.mxu0 %v3357_v56  ;;  %v3540_v54 = vsub.s32 0, %v2276_v53  ;;  %v3542_v55 = vsub.s32 2, %v2276_v53  ;;  %v2281_v56 = vsub.s32 1, %v2276_v53 }
 0x10b   : > { %2259 = vmatmul.mubr.bf16.vlgmr.msra.gmra.mrb[20].mxu1 %v1923_v58 }
 0x10d   : > { %2200 = vmatpush1.bf16.msra.mxu0 %v3355_v59  ;;  %v2286_v59 = vrot.slane %v2273_v57, %v3542_v55 }
 0x10e   : > { %2201 = vmatprep.subr.bf16.mxu0 %v3360_v61 }
 0x111   : > { %2202 = vmatpush1.bf16.msra.mxu0 %v3358_v62  ;;  %v2282_v62 = vrot.slane %v2273_v57, %v2281_v56 }
 0x112   : > { %2203 = vmatprep.subr.bf16.mxu0 %v3363_v63 }
 0x115   : > { %2204 = vmatpush1.bf16.msra.mxu0 %v3361_v0 }
 0x116   : > { %2205 = vmatprep.subr.bf16.mxu0 %v3366_v1 }
 0x119   : > { %2206 = vmatpush1.bf16.msra.mxu0 %v3364_v2 }
 0x11a   : > { %2207 = vmatprep.subr.bf16.mxu0 %v3369_v3 }
 0x11d   : > { %2208 = vmatpush1.bf16.msra.mxu0 %v3367_v4 }
 0x11e   : > { %2209 = vmatprep.subr.bf16.mxu0 %v3372_v5 }
 0x121   : > { %2210 = vmatpush1.bf16.msra.mxu0 %v3370_v60 }
 0x122   : > { %2211 = vmatprep.subr.bf16.mxu0 %v3375_v6 }
 0x125   : > { %2212 = vmatpush1.bf16.msra.mxu0 %v3373_v7 }
 0x126   : > { %2213 = vmatprep.subr.bf16.mxu0 %v3378_v8 }
 0x129   : > { %2214 = vmatpush1.bf16.msra.mxu0 %v3376_v9 }
 0x12c   : > { %2216 = vmatmul.mubr.bf16.vlgmr.msra.gmra.mrb[0].mxu0 %v1923_v58  ;;  %v2278_v58 = vrot.slane %v2273_v57, %v3540_v54 }
 0x13e   : > { %v632_v19 = vpop.f32.mrb[0].mxu1 }
 0x13f   : > { %v634_v10 = vpop.f32.mrb[1].mxu1 }
 0x140   : > { %v636_v11 = vpop.f32.mrb[2].mxu1 }
 0x141   : > { %v638_v12 = vpop.f32.mrb[3].mxu1 }
 0x15e   : > { %v2921_v13 = vpop.f32.mrb[4].mxu1 }
 0x15f   : > { %v2922_v14 = vpop.f32.mrb[5].mxu1 }
 0x160   : > { %v2923_v15 = vadd.f32 %v2922_v14, %v2921_v13  ;;  %v2924_v16 = vpop.f32.mrb[6].mxu1 }
 0x161   : > { %v2925_v17 = vpop.f32.mrb[7].mxu1 }
 0x162   : > { %v2926_v18 = vadd.f32 %v2925_v17, %v2924_v16 }
 0x17e   : > { %v2943_v20 = vpop.f32.mrb[8].mxu1 }
 0x17f   : > { %v2944_v22 = vpop.f32.mrb[9].mxu1 }
 0x180   : > { %v2945_v24 = vadd.f32 %v2944_v22, %v2943_v20  ;;  %v2946_v25 = vpop.f32.mrb[10].mxu1 }
 0x181   : > { %v2947_v26 = vpop.f32.mrb[11].mxu1 }
 0x182   : > { %v1018_v27 = vadd.f32 %v2945_v24, %v2923_v15  ;;  %v2948_v28 = vadd.f32 %v2947_v26, %v2946_v25 }
 0x184   : > { %v1021_v29 = vadd.f32 %v2948_v28, %v2926_v18 }
 0x19e   : > { %v2965_v30 = vpop.f32.mrb[12].mxu1 }
 0x19f   : > { %v2966_v31 = vpop.f32.mrb[13].mxu1 }
 0x1a0   : > { %v2967_v32 = vadd.f32 %v2966_v31, %v2965_v30  ;;  %v2968_v33 = vpop.f32.mrb[14].mxu1 }
 0x1a1   : > { %v2969_v34 = vpop.f32.mrb[15].mxu1 }
 0x1a2   : > { %v1435_v35 = vadd.f32 %v2967_v32, %v1018_v27  ;;  %v2970_v36 = vadd.f32 %v2969_v34, %v2968_v33 }
 0x1a4   : > { %v1438_v37 = vadd.f32 %v2970_v36, %v1021_v29 }
 0x1be   : > { %v2987_v38 = vpop.f32.mrb[16].mxu1 }
 0x1bf   : > { %v2988_v39 = vpop.f32.mrb[17].mxu1 }
 0x1c0   : > { %v2989_v21 = vadd.f32 %v2988_v39, %v2987_v38  ;;  %v2990_v40 = vpop.f32.mrb[18].mxu1 }
 0x1c1   : > { %v2991_v41 = vpop.f32.mrb[19].mxu1 }
 0x1c2   : > { %v1854_v48 = vadd.f32 %v2989_v21, %v1435_v35  ;;  %v2992_v23 = vadd.f32 %v2991_v41, %v2990_v40 }
 0x1c4   : > { %v1857_v42 = vadd.f32 %v2992_v23, %v1438_v37 }
 0x1de   : > { %v3009_v43 = vpop.f32.mrb[20].mxu1 }
 0x1df   : > { %v3010_v44 = vpop.f32.mrb[21].mxu1 }
 0x1e0   : > { %v3011_v45 = vadd.f32 %v3010_v44, %v3009_v43  ;;  %v3012_v46 = vpop.f32.mrb[22].mxu1 }
 0x1e1   : > { %v3013_v47 = vpop.f32.mrb[23].mxu1 }
 0x1e2   : > { %v2269_v49 = vadd.f32 %v3011_v45, %v1854_v48  ;;  %v3014_v50 = vadd.f32 %v3013_v47, %v3012_v46 }
 0x1e4   : > { %v2272_v51 = vadd.f32 %v3014_v50, %v1857_v42  ;;  %v2292_v60 = vadd.f32 %v2286_v59, %v2269_v49 }
 0x1e6   : > { %v2295_v9 = vadd.f32 %v2286_v59, %v2272_v51  ;;  %v2304_v17 = vmul.f32 0.01, %v2292_v60  ;;  %vm2298_vm2 = vcmp.gt.f32.partialorder %v2292_v60, 0.0 }
 0x1e8   : > { %vm2301_vm3 = vcmp.gt.f32.partialorder %v2295_v9, 0.0 }
 0x1ff   : > { %v2217_v61 = vpop.f32.mrb[0].mxu0 }
 0x200   : > { %v3015_v63 = vadd.f32 %v2217_v61, %v632_v19  ;;  %v2219_v0 = vpop.f32.mrb[1].mxu0 }
 0x201   : > { %v3016_v1 = vadd.f32 %v2219_v0, %v634_v10  ;;  %v2221_v2 = vpop.f32.mrb[2].mxu0  ;;  %v2307_v10 = vmul.f32 0.01, %v2295_v9 }
 0x202   : > { %v2290_v3 = vadd.f32 %v3015_v63, %v2278_v58  ;;  %v3017_v4 = vadd.f32 %v2221_v2, %v636_v11  ;;  %v2223_v5 = vpop.f32.mrb[3].mxu0  ;;  %v2310_v11 = vsel %vm2298_vm2, %v2292_v60, %v2304_v17  ;;  %vm2550_vm2 = vcmask 261120  }
 0x203   : > { %v2291_v6 = vadd.f32 %v3016_v1, %v2282_v62  ;;  %v3018_v7 = vadd.f32 %v2223_v5, %v638_v12  ;;  %v2313_v18 = vsel %vm2301_vm3, %v2295_v9, %v2307_v10  ;;  %v3425_v12 = vmov 1983009808  }
 0x204   : > { %v2293_v8 = vadd.f32 %v3017_v4, %v2278_v58  ;;  %v2344_v20 = vunpack.c.l.s4 %v3425_v12  ;;  %v2302_v24 = vmul.f32 0.01, %v2290_v3  ;;  %vm2296_vm4 = vcmp.gt.f32.partialorder %v2290_v3, 0.0 }
 0x205   : > { %v2294_v13 = vadd.f32 %v3018_v7, %v2282_v62  ;;  %vm2297_vm0 = vcmp.gt.f32.partialorder %v2291_v6, 0.0  ;;  %v2303_v14 = vmul.f32 0.01, %v2291_v6 }
 0x206   : > { %v2345_v26 = vunpack.c.0.s8 %v2344_v20  ;;  %v2305_v27 = vmul.f32 0.01, %v2293_v8  ;;  %vm2299_vm6 = vcmp.gt.f32.partialorder %v2293_v8, 0.0  ;;  %v2308_v29 = vsel %vm2296_vm4, %v2290_v3, %v2302_v24 }
 0x207   : > { %v2309_v15 = vsel %vm2297_vm0, %v2291_v6, %v2303_v14  ;;  %vm2300_vm1 = vcmp.gt.f32.partialorder %v2294_v13, 0.0  ;;  %v2306_v16 = vmul.f32 0.01, %v2294_v13  ;;  %vm2555_vm0 = vmand %vm2553_vm12, %vm2554_vm13 }
 0x208   : > { %2318 = vrot.lane.b32.xlu0 %v2309_v15, %s3424_s9  ;;  %v2348_v32 = vsub.s32 %v2345_v26, %v2276_v53  ;;  %v2311_v35 = vsel %vm2299_vm6, %v2293_v8, %v2305_v27 }
 0x209   : > { %v2312_v19 = vsel %vm2300_vm1, %v2294_v13, %v2306_v16  ;;  %vm2558_vm1 = vmand %vm2556_vm14, %vm2557_vm15 }
 0x20a   : > { %2322 = vrot.lane.b32.xlu1 %v2312_v19, %s3424_s9  ;;  %vm2559_vm3 = vmor %vm2558_vm1, %vm2555_vm0 }
 0x20c   : > { %2320 = vrot.lane.b32.xlu0 %v2310_v11, %s3424_s9 }
 0x20e   : > { %2324 = vrot.lane.b32.xlu1 %v2313_v18, %s3424_s9 }
 0x27a   : > { %v2319_v22 = vpop.permute.xlu0 %2318 }
 0x27c   : > { %v2323_v25 = vpop.permute.xlu1 %2322 }
 0x27e   : > { %v2321_v28 = vpop.permute.xlu0 %2320 }
 0x27f   : > { %v2327_v30 = vsel %vm2326_vm5, %v2319_v22, %v2321_v28  ;;  %v2334_v31 = vmax.f32 %v2309_v15, %v2321_v28 }
 0x280   : > { %v2333_v33 = vmax.f32 %v2308_v29, %v2327_v30  ;;  %v2325_v34 = vpop.permute.xlu1 %2324 }
 0x281   : > { %v2328_v36 = vsel %vm2326_vm5, %v2323_v25, %v2325_v34  ;;  %v2336_v37 = vmax.f32 %v2312_v19, %v2325_v34 }
 0x282   : > { %v2341_v38 = vcombine.low %v2333_v33, %v2334_v31  ;;  %v2342_v39 = vcombine.high %v2333_v33, %v2334_v31  ;;  %v2335_v21 = vmax.f32 %v2311_v35, %v2328_v36 }
 0x284   : > { %v2349_v40 = vrot.slane %v2341_v38, %v2348_v32  ;;  %v2356_v41 = vrot.slane %v2342_v39, %v2348_v32  ;;  %v2359_v48 = vcombine.low %v2335_v21, %v2336_v37 }
 0x286   : > { %v2357_v23 = vcombine.high %v2349_v40, %v2349_v40  ;;  %v2358_v42 = vcombine.high %v2356_v41, %v2356_v41  ;;  %v2883_v43 = vrot.slane %v2349_v40, 9  ;;  %v2885_v44 = vrot.slane %v2356_v41, 9 }
 0x287   : > { %v2366_v45 = vrot.slane %v2359_v48, %v2348_v32 }
 0x288   : > { %v2884_v46 = vrot.slane %v2357_v23, 9  ;;  %v2886_v47 = vrot.slane %v2358_v42, 9  ;;  %v2392_v49 = vmax.f32 %v2349_v40, %v2883_v43  ;;  %v2394_v50 = vmax.f32 %v2356_v41, %v2885_v44 }
 0x289   : > { %v2367_v51 = vcombine.high %v2366_v45, %v2366_v45  ;;  %v2887_v52 = vrot.slane %v2366_v45, 9 }
 0x28a   : > { %v2393_v53 = vmax.f32 %v2357_v23, %v2884_v46  ;;  %v2395_v56 = vmax.f32 %v2358_v42, %v2886_v47  ;;  %v2407_v57 = vrot.slane %v2392_v49, %v3540_v54  ;;  %v2411_v58 = vrot.slane %v2392_v49, %v3542_v55 }
 0x28b   : > { %v2423_v59 = vrot.slane %v2394_v50, %v3540_v54  ;;  %v2427_v61 = vrot.slane %v2394_v50, %v3542_v55  ;;  %v2888_v62 = vrot.slane %v2367_v51, 9  ;;  %v2396_v63 = vmax.f32 %v2366_v45, %v2887_v52 }
 0x28c   : > { %v2415_v0 = vrot.slane %v2393_v53, %v3540_v54  ;;  %v2419_v1 = vrot.slane %v2393_v53, %v3542_v55  ;;  %v2431_v2 = vrot.slane %v2395_v56, %v3540_v54  ;;  %v2435_v3 = vrot.slane %v2395_v56, %v3542_v55 }
 0x28d   : > { %v2899_v4 = vpack.c.bf16 %v2411_v58, %v2407_v57  ;;  %v2901_v5 = vpack.c.bf16 %v2427_v61, %v2423_v59  ;;  %v2397_v60 = vmax.f32 %v2367_v51, %v2888_v62  ;;  %v2439_v6 = vrot.slane %v2396_v63, %v3540_v54 }
 0x28e   : > { %v2900_v7 = vpack.c.bf16 %v2419_v1, %v2415_v0  ;;  %v2902_v8 = vpack.c.bf16 %v2435_v3, %v2431_v2  ;;  %v2443_v9 = vrot.slane %v2396_v63, %v3542_v55 }
 0x28f   : > { %v2507_v13 = vunpack.c.l.b16 %v2899_v4  ;;  %v2508_v14 = vunpack.c.h.b16 %v2899_v4  ;;  %v2511_v15 = vunpack.c.l.b16 %v2901_v5  ;;  %v2512_v16 = vunpack.c.h.b16 %v2901_v5 }
 0x290   : > { %v2509_v17 = vunpack.c.l.b16 %v2900_v7  ;;  %v2510_v19 = vunpack.c.h.b16 %v2900_v7  ;;  %v2447_v10 = vrot.slane %v2397_v60, %v3540_v54  ;;  %v2451_v11 = vrot.slane %v2397_v60, %v3542_v55 }
 0x291   : > { %v2519_v18 = vrot.slane %v2507_v13, 7  ;;  %v2535_v12 = vrot.slane %v2508_v14, 7  ;;  %v2903_v20 = vpack.c.bf16 %v2443_v9, %v2439_v6  ;;  %v2513_v22 = vunpack.c.l.b16 %v2902_v8 }
 0x292   : > { %v2904_v24 = vpack.c.bf16 %v2451_v11, %v2447_v10  ;;  %v2514_v25 = vunpack.c.h.b16 %v2902_v8  ;;  %v2520_v26 = vrot.slane %v2509_v17, 6  ;;  %v2523_v27 = vrot.slane %v2511_v15, 5 }
 0x293   : > { %v2515_v28 = vunpack.c.l.b16 %v2903_v20  ;;  %v2516_v29 = vunpack.c.h.b16 %v2903_v20  ;;  %v2526_v30 = vrot.slane %v2513_v22, 4  ;;  %v2536_v31 = vrot.slane %v2510_v19, 6 }
 0x294   : > { %v2517_v32 = vunpack.c.l.b16 %v2904_v24  ;;  %v2518_v33 = vunpack.c.h.b16 %v2904_v24  ;;  %v2522_v34 = vsel %vm2521_vm7, %v2520_v26, %v2519_v18  ;;  %v2538_v35 = vrot.slane %v2512_v16, 5 }
 0x295   : > { %v2525_v54 = vsel %vm2524_vm8, %v2523_v27, %v2522_v34  ;;  %v2529_v55 = vrot.slane %v2515_v28, 3  ;;  %v2537_v36 = vsel %vm2521_vm7, %v2536_v31, %v2535_v12  ;;  %v2540_v37 = vrot.slane %v2514_v25, 4 }
 0x296   : > { %v2528_v38 = vsel %vm2527_vm9, %v2526_v30, %v2525_v54  ;;  %v2532_v39 = vrot.slane %v2517_v32, 2  ;;  %v2539_v21 = vsel %vm2524_vm8, %v2538_v35, %v2537_v36  ;;  %v2542_v40 = vrot.slane %v2516_v29, 3 }
 0x297   : > { %v2531_v41 = vsel %vm2530_vm10, %v2529_v55, %v2528_v38  ;;  %v2541_v48 = vsel %vm2527_vm9, %v2540_v37, %v2539_v21  ;;  %v2544_v23 = vrot.slane %v2518_v33, 2 }
 0x298   : > { %v2534_v42 = vsel %vm2533_vm11, %v2532_v39, %v2531_v41  ;;  %v2543_v43 = vsel %vm2530_vm10, %v2542_v40, %v2541_v48 }
 0x299   : > { %v2545_v44 = vsel %vm2533_vm11, %v2544_v23, %v2543_v43 }
 0x29a   : > { %v2546_v45 = vpack.c.b16 %v2545_v44, %v2534_v42 }
 0x29c   : > { %2547 = vrot.lane.b32.xlu0 %v2546_v45, %s3426_s10 }
 0x30e   : > { %v2548_v46 = vpop.permute.xlu0 %2547 }
 0x30f   : > { %v2549_v47 = vrot.slane %v2548_v46, 4 }
 0x311   : > { %v2551_v49 = vsel %vm2550_vm2, %v2549_v47, %v2548_v46 }
 0x312   : > { %v2561_v50 = vsel %vm2559_vm3, %v2551_v49, 0 }
 0x313   : > { %2562 = vst [vmem:[%s185_s16] sm:$0xff] %v2561_v50 }
 0x314 PF: > { %s14_s12 = sadd.s32 1, %s3419_s12  }
 0x315   : > { %p11_p3 = scmp.ge.s32.totalorder %s14_s12, 4  }
 0x317   :  { %13 = sbr.rel (!%p11_p3) target bundleno = 1 (0x1), region = 71 }
 0x31e   :  { %2584 = vsyncpa [#allocation3], 1 }
 0x31f   :  { %2586 = vsyncpa [#allocation3 + $0x1], 1 }

</bundles_post_ra>
